<compile_context>
chip_gen: v5e
topology: v5e:2x2
jax: 0.10.0
libtpu: 0.0.40
codegen_flags: <defaults>
</compile_context>

<pallas_src>
import functools

import jax
import jax.numpy as jnp
from jax import lax
from jax.experimental import pallas as pl
from jax.experimental.pallas import tpu as pltpu

EPS = 1e-5
# MXU operand dtype (accumulation stays f32, all elementwise math stays f32).
# Set to jnp.float32 for bit-closer parity with the PyTorch reference.
MXU_DTYPE = jnp.bfloat16


def _vmem_capacity_bytes():
    """Physical VMEM per TensorCore (generation-aware); conservative fallback = v7x."""
    try:
        info = pltpu.get_tpu_info()
        cap = getattr(info, "vmem_capacity_bytes", None)
        if cap:
            return int(cap)
    except Exception:
        pass
    return 64 * 1024 * 1024


def _choose_tile_n(n, rows_per_tile, max_tile=512, budget_bytes=4 << 20):
    """Largest spatial tile that is a multiple of 128, divides n, fits the VMEM budget."""
    if n % 128 != 0:
        return n                                  # small / odd inputs: single block
    cap = max(128, (budget_bytes // (rows_per_tile * 4)) // 128 * 128)
    t = min(n, max_tile, cap)
    t = max(128, (t // 128) * 128)
    while t > 128 and n % t != 0:
        t -= 128
    return t if n % t == 0 else n


# ---------------------------------------------------------------------------
# Kernel 1: fused conv1x1 + BN1 + ReLU + Encoding + BN2 + ReLU + Mean + fc/se
# ---------------------------------------------------------------------------
def _encode_kernel(x_ref, w_ref, g1_ref, b1_ref, cw_ref, cwm_ref, cc_ref, sc_ref,
                   g2_ref, b2_ref, wfc_ref, bfc_ref, wse_ref, bse_ref,
                   gamma_ref, se_ref, *scratch, n_total, use_cache):
    s1_ref, sq1_ref, eacc_ref, asum_ref = scratch[:4]
    y_ref = scratch[4] if use_cache else None          # conv-output VMEM cache

    p = pl.program_id(0)                 # 0: conv + BN1 stats (+ cache fill), 1: encoding
    t = pl.program_id(1)                 # spatial tile
    nt = pl.num_programs(1)
    B, C, TN = x_ref.shape
    K = cw_ref.shape[0]

    off = t * TN
    if TN % 128 == 0:
        off = pl.multiple_of(off, 128)

    # Zero cross-tile accumulators once, at the very first grid step.
    @pl.when(jnp.logical_and(p == 0, t == 0))
    def _init():
        s1_ref[...] = jnp.zeros_like(s1_ref)
        sq1_ref[...] = jnp.zeros_like(sq1_ref)
        eacc_ref[...] = jnp.zeros_like(eacc_ref)
        asum_ref[...] = jnp.zeros_like(asum_ref)

    # ---- pass 0: conv + per-channel sum / sum-of-squares (single-pass BN1 stats) ----
    @pl.when(p == 0)
    def _stats_pass():
        ssum = jnp.zeros((C, 1), jnp.float32)
        ssq = jnp.zeros((C, 1), jnp.float32)
        for b in range(B):
            y = jnp.dot(w_ref[...], x_ref[b].astype(MXU_DTYPE),
                        preferred_element_type=jnp.float32)          # (C, TN)
            ssum = ssum + jnp.sum(y, axis=1, keepdims=True)
            ssq = ssq + jnp.sum(y * y, axis=1, keepdims=True)
            if use_cache:
                y_ref[b, :, pl.ds(off, TN)] = y                       # persist conv output
        s1_ref[...] += ssum
        sq1_ref[...] += ssq

    # ---- pass 1: BN1+ReLU + scaled-L2 softmax + aggregation (+ finalize) ----
    @pl.when(p == 1)
    def _encode_pass():
        inv_n1 = 1.0 / float(B * n_total)
        mu1 = s1_ref[...] * inv_n1                                    # (C, 1)
        var1 = sq1_ref[...] * inv_n1 - mu1 * mu1
        a1 = g1_ref[...] * lax.rsqrt(var1 + EPS)                      # fused BN scale
        c1 = b1_ref[...] - mu1 * a1                                   # fused BN shift

        cc = cc_ref[...]                                              # (K, 1) ||c_k||^2 (pre-computed)
        sc = sc_ref[...]                                              # (K, 1) smoothing

        for b in range(B):
            if use_cache:
                y = y_ref[b, :, pl.ds(off, TN)]                       # no x DMA, no re-conv
            else:
                y = jnp.dot(w_ref[...], x_ref[b].astype(MXU_DTYPE),
                            preferred_element_type=jnp.float32)       # recompute fallback
            z = jnp.maximum(y * a1 + c1, 0.0)                         # BN1 + ReLU
            z_m = z.astype(MXU_DTYPE)
            zz = jnp.sum(z * z, axis=0, keepdims=True)                # (1, TN)
            zc = jnp.dot(cwm_ref[...], z_m, preferred_element_type=jnp.float32)   # (K, TN)
            sl = sc * (zz + cc - 2.0 * zc)                            # scaled L2
            sl = sl - jnp.max(sl, axis=0, keepdims=True)
            pe = jnp.exp(sl)
            A = pe / jnp.sum(pe, axis=0, keepdims=True)               # softmax over K
            contrib = lax.dot_general(A.astype(MXU_DTYPE), z_m,
                                      (((1,), (1,)), ((), ())),
                                      preferred_element_type=jnp.float32)  # (K, C)
            eacc_ref[b] = eacc_ref[b] + contrib
            asum_ref[b] = asum_ref[b] + jnp.sum(A, axis=1, keepdims=True)

        # ---- finalize on the last tile: BN2+ReLU+Mean, fc gate, se logits ----
        @pl.when(t == nt - 1)
        def _finalize():
            E = eacc_ref[...] - asum_ref[...] * cw_ref[...][None, :, :]        # (B, K, C)
            inv_n2 = 1.0 / float(B * C)
            s2 = jnp.sum(jnp.sum(E, axis=2, keepdims=True), axis=0, keepdims=True)
            q2 = jnp.sum(jnp.sum(E * E, axis=2, keepdims=True), axis=0, keepdims=True)
            mu2 = s2 * inv_n2                                         # (1, K, 1)
            var2 = q2 * inv_n2 - mu2 * mu2
            Eh = (E - mu2) * lax.rsqrt(var2 + EPS)
            Eh = Eh * g2_ref[...][None, :, :] + b2_ref[...][None, :, :]
            Eh = jnp.maximum(Eh, 0.0)
            en = jnp.sum(Eh, axis=1) * (1.0 / K)                      # (B, C) Mean(dim=1)

            # gamma^T = sigmoid(W_fc @ en^T + b_fc)  -> stored as (C, B)
            gam_t = jax.nn.sigmoid(
                lax.dot_general(wfc_ref[...], en, (((1,), (1,)), ((), ())),
                                preferred_element_type=jnp.float32) + bfc_ref[...])
            gamma_ref[...] = gam_t
            se_ref[...] = (lax.dot_general(en, wse_ref[...], (((1,), (1,)), ((), ())),
                                           preferred_element_type=jnp.float32)
                           + bse_ref[...])


# ---------------------------------------------------------------------------
# Kernel 2: SE gating   out = relu(x * (1 + gamma))   (purely mem-bound, parallel)
# ---------------------------------------------------------------------------
def _gate_kernel(x_ref, g_ref, o_ref):
    B = x_ref.shape[0]
    gp = 1.0 + g_ref[...]                              # (C, B): hoisted "1 + gamma"
    for b in range(B):
        o_ref[b] = jnp.maximum(x_ref[b] * gp[:, b:b + 1], 0.0)


# ---------------------------------------------------------------------------
# Wrapper
# ---------------------------------------------------------------------------
def enc_module_forward(x_nchw, params, *, force_no_cache=False):
    """EncModule.forward: returns (relu(x + x*gamma) in NCHW, se logits)."""
    B, C, H, W = x_nchw.shape
    N = H * W
    x = x_nchw.reshape(B, C, N)                        # NCHW -> (B, C, HW): free reshape
    K = params['codewords'].shape[0]
    nclass = params['se_w'].shape[0]

    # Generation-aware scoped-VMEM budget (v5e/v6e: 128 MiB physical, v7x: 64 MiB).
    vmem_cap = _vmem_capacity_bytes()
    vmem_limit = int(min(vmem_cap * 3 // 4, 96 * 1024 * 1024))

    # Pre-cast MXU operands once in the wrapper (not on the VPU every grid step) and
    # hoist the codeword L2 norms out of the per-tile softmax body.
    w_mxu = params['conv_w'].astype(MXU_DTYPE)
    cw = params['codewords']
    cw_mxu = cw.astype(MXU_DTYPE)
    cc = jnp.sum(cw * cw, axis=1, keepdims=True)       # (K, 1)

    tn = _choose_tile_n(N, rows_per_tile=3 * B * C, max_tile=512, budget_bytes=6 << 20)
    nt = N // tn

    # y-cache: keep the full conv output resident in VMEM across the two passes so the
    # encoding pass does zero HBM reads and no duplicated conv.  Fall back to recompute
    # when it does not fit this generation's VMEM budget.
    cache_bytes = B * C * N * 4
    resident_bytes = 3 * B * C * tn * 4 + B * K * C * 4 + (8 << 20)   # x bufs + acc + headroom
    use_cache = (not force_no_cache) and (cache_bytes + resident_bytes <= vmem_limit)

    if use_cache:
        # pass 1 pins x to the last tile -> no x DMA at all during the encoding pass
        x_spec = pl.BlockSpec((B, C, tn),
                              lambda p, t: (0, 0, (1 - p) * t + p * (nt - 1)))
    else:
        # recompute path: pass 0 is stats-only (low arithmetic intensity), so deepen the
        # x pipelining to hide the otherwise-exposed DMA.
        try:
            x_spec = pl.BlockSpec((B, C, tn), lambda p, t: (0, 0, t),
                                  pipeline_mode=pl.Buffered(3))
        except TypeError:
            x_spec = pl.BlockSpec((B, C, tn), lambda p, t: (0, 0, t))

    def _pspec(shape):
        return pl.BlockSpec(shape, lambda p, t, _s=len(shape): (0,) * _s)

    scratch = [pltpu.VMEM((C, 1), jnp.float32),        # sum(y)   per channel (BN1)
               pltpu.VMEM((C, 1), jnp.float32),        # sum(y^2) per channel (BN1)
               pltpu.VMEM((B, K, C), jnp.float32),     # sum_n A*z
               pltpu.VMEM((B, K, 1), jnp.float32)]     # sum_n A
    if use_cache:
        scratch.append(pltpu.VMEM((B, C, N), jnp.float32))   # persistent conv-output cache

    conv_mult = 1 if use_cache else 2
    flops = conv_mult * 2 * B * N * C * C + 2 * 2 * B * N * K * C
    byts = ((1 if use_cache else 2) * B * C * N * 4
            + (3 * C * C + 3 * K * C + nclass * C) * 4)

    gamma_t, se = pl.pallas_call(
        functools.partial(_encode_kernel, n_total=N, use_cache=use_cache),
        out_shape=(jax.ShapeDtypeStruct((C, B), jnp.float32),
                   jax.ShapeDtypeStruct((B, nclass), jnp.float32)),
        grid=(2, nt),
        in_specs=[
            x_spec,
            _pspec((C, C)), _pspec((C, 1)), _pspec((C, 1)),
            _pspec((K, C)), _pspec((K, C)), _pspec((K, 1)), _pspec((K, 1)),
            _pspec((K, 1)), _pspec((K, 1)),
            _pspec((C, C)), _pspec((C, 1)), _pspec((nclass, C)), _pspec((1, nclass)),
        ],
        out_specs=(pl.BlockSpec((C, B), lambda p, t: (0, 0)),
                   pl.BlockSpec((B, nclass), lambda p, t: (0, 0))),
        scratch_shapes=scratch,
        compiler_params=pltpu.CompilerParams(
            dimension_semantics=("arbitrary", "arbitrary"),   # cross-tile accumulators
            vmem_limit_bytes=vmem_limit),
        cost_estimate=pl.CostEstimate(flops=flops, transcendentals=B * N * K,
                                      bytes_accessed=byts),
    )(x, w_mxu, params['bn1_g'], params['bn1_b'],
      cw, cw_mxu, cc, params['scale'], params['bn2_g'], params['bn2_b'],
      params['fc_w'], params['fc_b'], params['se_w'], params['se_b'])

    # Kernel 2 is pure HBM-bound: large lane-dense tiles, budgeted for in+out double
    # buffers, and megacore-parallel.
    tn_g = _choose_tile_n(N, rows_per_tile=4 * B * C, max_tile=2048, budget_bytes=16 << 20)
    out = pl.pallas_call(
        _gate_kernel,
        out_shape=jax.ShapeDtypeStruct((B, C, N), jnp.float32),
        grid=(N // tn_g,),
        in_specs=[pl.BlockSpec((B, C, tn_g), lambda t: (0, 0, t)),
                  pl.BlockSpec((C, B), lambda t: (0, 0))],
        out_specs=pl.BlockSpec((B, C, tn_g), lambda t: (0, 0, t)),
        compiler_params=pltpu.CompilerParams(
            dimension_semantics=("parallel",),                # megacore-shardable
            vmem_limit_bytes=vmem_limit),
        cost_estimate=pl.CostEstimate(flops=2 * B * C * N, transcendentals=0,
                                      bytes_accessed=2 * B * C * N * 4 + C * B * 4),
    )(x, gamma_t)

    return out.reshape(B, C, H, W), se


# ---------------------------------------------------------------------------
# Pure-JAX reference (mimics the kernel's bf16 MXU operand casts)
# ---------------------------------------------------------------------------
def enc_module_reference(x_nchw, params):
    B, C, H, W = x_nchw.shape
    N = H * W
    x = x_nchw.reshape(B, C, N)
    K = params['codewords'].shape[0]

    y = jnp.einsum('oc,bcn->bon', params['conv_w'].astype(MXU_DTYPE),
                   x.astype(MXU_DTYPE), preferred_element_type=jnp.float32)
    mu1 = jnp.mean(y, axis=(0, 2), keepdims=True)
    var1 = jnp.mean(y * y, axis=(0, 2), keepdims=True) - mu1 * mu1
    z = jnp.maximum((y - mu1) * lax.rsqrt(var1 + EPS) * params['bn1_g'].reshape(1, C, 1)
                    + params['bn1_b'].reshape(1, C, 1), 0.0)          # (B, C, N)

    zt = jnp.transpose(z, (0, 2, 1))                                   # (B, N, C)
    cw = params['codewords']                                           # (K, C)
    zz = jnp.sum(zt * zt, axis=2, keepdims=True)                       # (B, N, 1)
    cc = jnp.sum(cw * cw, axis=1)                                      # (K,)
    zc = jnp.einsum('bnc,kc->bnk', zt.astype(MXU_DTYPE), cw.astype(MXU_DTYPE),
                    preferred_element_type=jnp.float32)
    sl = params['scale'].reshape(1, 1, K) * (zz + cc.reshape(1, 1, K) - 2.0 * zc)
    A = jax.nn.softmax(sl, axis=2)                                     # (B, N, K)
    E = (jnp.einsum('bnk,bnc->bkc', A.astype(MXU_DTYPE), zt.astype(MXU_DTYPE),
                    preferred_element_type=jnp.float32)
         - jnp.sum(A, axis=1)[:, :, None] * cw[None, :, :])            # (B, K, C)

    mu2 = jnp.mean(E, axis=(0, 2), keepdims=True)
    var2 = jnp.mean(E * E, axis=(0, 2), keepdims=True) - mu2 * mu2
    Eh = jnp.maximum((E - mu2) * lax.rsqrt(var2 + EPS) * params['bn2_g'].reshape(1, K, 1)
                     + params['bn2_b'].reshape(1, K, 1), 0.0)
    en = jnp.mean(Eh, axis=1)                                          # (B, C)

    gamma = jax.nn.sigmoid(jnp.dot(en, params['fc_w'].T,
                                   precision=lax.Precision.HIGHEST)
                           + params['fc_b'].reshape(1, C))
    out = jnp.maximum(x + x * gamma[:, :, None], 0.0).reshape(B, C, H, W)
    se = jnp.dot(en, params['se_w'].T, precision=lax.Precision.HIGHEST) + params['se_b']
    return out, se


# ---------------------------------------------------------------------------
# Deterministic parameter init (mirrors module __init__ shapes / init ranges)
# ---------------------------------------------------------------------------
def init_params(key, C, K, nclass):
    ks = jax.random.split(key, 5)
    f32 = jnp.float32
    std_enc = 1.0 / (K * C) ** 0.5
    bound_fc = 1.0 / C ** 0.5
    return dict(
        conv_w=jax.random.normal(ks[0], (C, C), f32) * (1.0 / C ** 0.5),   # (Cout, Cin)
        bn1_g=jnp.ones((C, 1), f32),
        bn1_b=jnp.zeros((C, 1), f32),
        codewords=jax.random.uniform(ks[1], (K, C), f32, -std_enc, std_enc),
        scale=jax.random.uniform(ks[2], (K, 1), f32, -1.0, 0.0),           # Encoding.scale
        bn2_g=jnp.ones((K, 1), f32),
        bn2_b=jnp.zeros((K, 1), f32),
        fc_w=jax.random.uniform(ks[3], (C, C), f32, -bound_fc, bound_fc),  # (Cout, Cin)
        fc_b=jnp.zeros((C, 1), f32),
        se_w=jax.random.uniform(ks[4], (nclass, C), f32, -bound_fc, bound_fc),
        se_b=jnp.zeros((1, nclass), f32),
    )


if __name__ == "__main__":
    B, C, H, W = 2, 64, 32, 32     # batch, channels, spatial (N=1024 -> 2 tiles of 512)
    K, NCLASS = 32, 8              # ncodes, nclass

    key = jax.random.PRNGKey(0)
    kx, kp = jax.random.split(key)
    x = jax.random.normal(kx, (B, C, H, W), jnp.float32)
    params = init_params(kp, C, K, NCLASS)

    fwd = jax.jit(functools.partial(enc_module_forward, force_no_cache=False))
    fwd_nocache = jax.jit(functools.partial(enc_module_forward, force_no_cache=True))
    ref = jax.jit(enc_module_reference)

    out_c, se_c = jax.block_until_ready(fwd(x, params))          # y-cache path
    out_n, se_n = jax.block_until_ready(fwd_nocache(x, params))  # recompute fallback path
    out_r, se_r = jax.block_until_ready(ref(x, params))          # pure-JAX reference

    assert out_c.shape == (B, C, H, W) and out_c.dtype == jnp.float32
    assert se_c.shape == (B, NCLASS) and se_c.dtype == jnp.float32
    assert bool(jnp.all(out_c >= 0.0))
    assert bool(jnp.all(jnp.isfinite(out_c))) and bool(jnp.all(jnp.isfinite(se_c)))
    # cached and recompute paths compute the same math
    assert bool(jnp.allclose(out_c, out_n, rtol=1e-5, atol=1e-5))
    assert bool(jnp.allclose(se_c, se_n, rtol=1e-5, atol=1e-5))
    # and both match the reference (bf16 MXU casts mimicked -> tight-ish tolerance)
    assert bool(jnp.allclose(out_c, out_r, rtol=2e-2, atol=2e-2))
    assert bool(jnp.allclose(se_c, se_r, rtol=2e-2, atol=2e-2))
    print("KERNEL_OK")
</pallas_src>

<mosaic_0001>
module attributes {stable_mosaic.version = 11 : i64} {
  func.func @_gate_kernel(%arg0: i32, %arg1: memref<2x64x1024xf32, #tpu.memory_space<vmem>>, %arg2: memref<64x2xf32, #tpu.memory_space<vmem>>, %arg3: memref<2x64x1024xf32, #tpu.memory_space<vmem>>) attributes {dimension_semantics = [#tpu.dimension_semantics<parallel>], iteration_bounds = array<i64: 1>, scalar_prefetch = 0 : i64, scratch_operands = 0 : i64, tpu.core_type = #tpu.core_type<tc>, window_params = [{transform_indices = @transform_0, window_bounds = array<i64: 2, 64, 1024>}, {pipeline_mode = #tpu.pipeline_mode<synchronous>, transform_indices = @transform_1, window_bounds = array<i64: 64, 2>}, {transform_indices = @transform_2, window_bounds = array<i64: 2, 64, 1024>}]} {
    %c0 = arith.constant 0 : index
    %c0_0 = arith.constant 0 : index
    %0 = vector.load %arg2[%c0, %c0_0] : memref<64x2xf32, #tpu.memory_space<vmem>>, vector<64x2xf32>
    %cst = arith.constant 1.000000e+00 : f32
    %1 = vector.broadcast %cst : f32 to vector<64x2xf32>
    %2 = arith.addf %1, %0 : vector<64x2xf32>
    %c0_1 = arith.constant 0 : index
    %c0_2 = arith.constant 0 : index
    %c0_3 = arith.constant 0 : index
    %3 = vector.load %arg1[%c0_1, %c0_2, %c0_3] : memref<2x64x1024xf32, #tpu.memory_space<vmem>>, vector<1x64x1024xf32>
    %4 = vector.shape_cast %3 : vector<1x64x1024xf32> to vector<64x1024xf32>
    %5 = vector.extract_strided_slice %2 {offsets = [0, 0], sizes = [64, 1], strides = [1, 1]} : vector<64x2xf32> to vector<64x1xf32>
    %6 = vector.broadcast %5 : vector<64x1xf32> to vector<64x1024xf32>
    %7 = arith.mulf %4, %6 : vector<64x1024xf32>
    %cst_4 = arith.constant 0.000000e+00 : f32
    %8 = vector.broadcast %cst_4 : f32 to vector<64x1024xf32>
    %9 = arith.maximumf %7, %8 : vector<64x1024xf32>
    %c0_5 = arith.constant 0 : index
    %c0_6 = arith.constant 0 : index
    %c0_7 = arith.constant 0 : index
    %10 = vector.load %arg3[%c0_5, %c0_6, %c0_7] : memref<2x64x1024xf32, #tpu.memory_space<vmem>>, vector<1x64x1024xf32>
    %11 = vector.shape_cast %10 : vector<1x64x1024xf32> to vector<64x1024xf32>
    %12 = vector.shape_cast %9 : vector<64x1024xf32> to vector<1x64x1024xf32>
    tpu.vector_store %arg3[%c0_5, %c0_6, %c0_7], %12 {strides = array<i32>} : memref<2x64x1024xf32, #tpu.memory_space<vmem>>, vector<1x64x1024xf32>,
    %c1 = arith.constant 1 : index
    %c0_8 = arith.constant 0 : index
    %c0_9 = arith.constant 0 : index
    %13 = vector.load %arg1[%c1, %c0_8, %c0_9] : memref<2x64x1024xf32, #tpu.memory_space<vmem>>, vector<1x64x1024xf32>
    %14 = vector.shape_cast %13 : vector<1x64x1024xf32> to vector<64x1024xf32>
    %15 = vector.extract_strided_slice %2 {offsets = [0, 1], sizes = [64, 1], strides = [1, 1]} : vector<64x2xf32> to vector<64x1xf32>
    %16 = vector.broadcast %15 : vector<64x1xf32> to vector<64x1024xf32>
    %17 = arith.mulf %14, %16 : vector<64x1024xf32>
    %cst_10 = arith.constant 0.000000e+00 : f32
    %18 = vector.broadcast %cst_10 : f32 to vector<64x1024xf32>
    %19 = arith.maximumf %17, %18 : vector<64x1024xf32>
    %c1_11 = arith.constant 1 : index
    %c0_12 = arith.constant 0 : index
    %c0_13 = arith.constant 0 : index
    %20 = vector.load %arg3[%c1_11, %c0_12, %c0_13] : memref<2x64x1024xf32, #tpu.memory_space<vmem>>, vector<1x64x1024xf32>
    %21 = vector.shape_cast %20 : vector<1x64x1024xf32> to vector<64x1024xf32>
    %22 = vector.shape_cast %19 : vector<64x1024xf32> to vector<1x64x1024xf32>
    tpu.vector_store %arg3[%c1_11, %c0_12, %c0_13], %22 {strides = array<i32>} : memref<2x64x1024xf32, #tpu.memory_space<vmem>>, vector<1x64x1024xf32>,
    return
  }
  func.func @transform_0(%arg0: i32) -> (i32, i32, i32) {
    %c0_i32 = arith.constant 0 : i32
    %c0_i32_0 = arith.constant 0 : i32
    %c0_i32_1 = arith.constant 0 : i32
    return %c0_i32, %c0_i32_0, %arg0 : i32, i32, i32
  }
  func.func @transform_1(%arg0: i32) -> (i32, i32) {
    %c0_i32 = arith.constant 0 : i32
    %c0_i32_0 = arith.constant 0 : i32
    %c0_i32_1 = arith.constant 0 : i32
    return %c0_i32, %c0_i32_0 : i32, i32
  }
  func.func @transform_2(%arg0: i32) -> (i32, i32, i32) {
    %c0_i32 = arith.constant 0 : i32
    %c0_i32_0 = arith.constant 0 : i32
    %c0_i32_1 = arith.constant 0 : i32
    return %c0_i32, %c0_i32_0, %arg0 : i32, i32, i32
  }
}

module attributes {stable_mosaic.version = 11 : i64} {
  func.func @_encode_kernel(%arg0: i32, %arg1: i32, %arg2: memref<2x64x512xf32, #tpu.memory_space<vmem>>, %arg3: memref<64x64xbf16, #tpu.memory_space<vmem>>, %arg4: memref<64x1xf32, #tpu.memory_space<vmem>>, %arg5: memref<64x1xf32, #tpu.memory_space<vmem>>, %arg6: memref<32x64xf32, #tpu.memory_space<vmem>>, %arg7: memref<32x64xbf16, #tpu.memory_space<vmem>>, %arg8: memref<32x1xf32, #tpu.memory_space<vmem>>, %arg9: memref<32x1xf32, #tpu.memory_space<vmem>>, %arg10: memref<32x1xf32, #tpu.memory_space<vmem>>, %arg11: memref<32x1xf32, #tpu.memory_space<vmem>>, %arg12: memref<64x64xf32, #tpu.memory_space<vmem>>, %arg13: memref<64x1xf32, #tpu.memory_space<vmem>>, %arg14: memref<8x64xf32, #tpu.memory_space<vmem>>, %arg15: memref<1x8xf32, #tpu.memory_space<vmem>>, %arg16: memref<64x2xf32, #tpu.memory_space<vmem>>, %arg17: memref<2x8xf32, #tpu.memory_space<vmem>>, %arg18: memref<64x1xf32, #tpu.memory_space<vmem>>, %arg19: memref<64x1xf32, #tpu.memory_space<vmem>>, %arg20: memref<2x32x64xf32, #tpu.memory_space<vmem>>, %arg21: memref<2x32x1xf32, #tpu.memory_space<vmem>>, %arg22: memref<2x64x1024xf32, #tpu.memory_space<vmem>>) attributes {dimension_semantics = [#tpu.dimension_semantics<arbitrary>, #tpu.dimension_semantics<arbitrary>], iteration_bounds = array<i64: 2, 2>, scalar_prefetch = 0 : i64, scratch_operands = 5 : i64, tpu.core_type = #tpu.core_type<tc>, window_params = [{transform_indices = @transform_0, window_bounds = array<i64: 2, 64, 512>}, {pipeline_mode = #tpu.pipeline_mode<synchronous>, transform_indices = @transform_1, window_bounds = array<i64: 64, 64>}, {pipeline_mode = #tpu.pipeline_mode<synchronous>, transform_indices = @transform_2, window_bounds = array<i64: 64, 1>}, {pipeline_mode = #tpu.pipeline_mode<synchronous>, transform_indices = @transform_3, window_bounds = array<i64: 64, 1>}, {pipeline_mode = #tpu.pipeline_mode<synchronous>, transform_indices = @transform_4, window_bounds = array<i64: 32, 64>}, {pipeline_mode = #tpu.pipeline_mode<synchronous>, transform_indices = @transform_5, window_bounds = array<i64: 32, 64>}, {pipeline_mode = #tpu.pipeline_mode<synchronous>, transform_indices = @transform_6, window_bounds = array<i64: 32, 1>}, {pipeline_mode = #tpu.pipeline_mode<synchronous>, transform_indices = @transform_7, window_bounds = array<i64: 32, 1>}, {pipeline_mode = #tpu.pipeline_mode<synchronous>, transform_indices = @transform_8, window_bounds = array<i64: 32, 1>}, {pipeline_mode = #tpu.pipeline_mode<synchronous>, transform_indices = @transform_9, window_bounds = array<i64: 32, 1>}, {pipeline_mode = #tpu.pipeline_mode<synchronous>, transform_indices = @transform_10, window_bounds = array<i64: 64, 64>}, {pipeline_mode = #tpu.pipeline_mode<synchronous>, transform_indices = @transform_11, window_bounds = array<i64: 64, 1>}, {pipeline_mode = #tpu.pipeline_mode<synchronous>, transform_indices = @transform_12, window_bounds = array<i64: 8, 64>}, {pipeline_mode = #tpu.pipeline_mode<synchronous>, transform_indices = @transform_13, window_bounds = array<i64: 1, 8>}, {pipeline_mode = #tpu.pipeline_mode<synchronous>, transform_indices = @transform_14, window_bounds = array<i64: 64, 2>}, {pipeline_mode = #tpu.pipeline_mode<synchronous>, transform_indices = @transform_15, window_bounds = array<i64: 2, 8>}]} {
    %c512_i32 = arith.constant 512 : i32
    %0 = arith.muli %arg1, %c512_i32 : i32
    %1 = tpu.assume_multiple %0, 128 : i32
    %c0_i32 = arith.constant 0 : i32
    %2 = arith.cmpi eq, %arg0, %c0_i32 : i32
    %c0_i32_0 = arith.constant 0 : i32
    %3 = arith.cmpi eq, %arg1, %c0_i32_0 : i32
    %4 = arith.andi %2, %3 : i1
    %5 = arith.extui %4 : i1 to i32
    %c0_i32_1 = arith.constant 0 : i32
    %6 = arith.cmpi ne, %5, %c0_i32_1 : i32
    scf.if %6 {
      %cst = arith.constant 0.000000e+00 : f32
      %13 = vector.broadcast %cst : f32 to vector<64x1xf32>
      %c0 = arith.constant 0 : index
      %c0_5 = arith.constant 0 : index
      %14 = vector.load %arg18[%c0, %c0_5] : memref<64x1xf32, #tpu.memory_space<vmem>>, vector<64x1xf32>
      tpu.vector_store %arg18[%c0, %c0_5], %13 {strides = array<i32>} : memref<64x1xf32, #tpu.memory_space<vmem>>, vector<64x1xf32>,
      %cst_6 = arith.constant 0.000000e+00 : f32
      %15 = vector.broadcast %cst_6 : f32 to vector<64x1xf32>
      %c0_7 = arith.constant 0 : index
      %c0_8 = arith.constant 0 : index
      %16 = vector.load %arg19[%c0_7, %c0_8] : memref<64x1xf32, #tpu.memory_space<vmem>>, vector<64x1xf32>
      tpu.vector_store %arg19[%c0_7, %c0_8], %15 {strides = array<i32>} : memref<64x1xf32, #tpu.memory_space<vmem>>, vector<64x1xf32>,
      %cst_9 = arith.constant 0.000000e+00 : f32
      %17 = vector.broadcast %cst_9 : f32 to vector<2x32x64xf32>
      %c0_10 = arith.constant 0 : index
      %c0_11 = arith.constant 0 : index
      %c0_12 = arith.constant 0 : index
      %18 = vector.load %arg20[%c0_10, %c0_11, %c0_12] : memref<2x32x64xf32, #tpu.memory_space<vmem>>, vector<2x32x64xf32>
      tpu.vector_store %arg20[%c0_10, %c0_11, %c0_12], %17 {strides = array<i32>} : memref<2x32x64xf32, #tpu.memory_space<vmem>>, vector<2x32x64xf32>,
      %cst_13 = arith.constant 0.000000e+00 : f32
      %19 = vector.broadcast %cst_13 : f32 to vector<2x32x1xf32>
      %c0_14 = arith.constant 0 : index
      %c0_15 = arith.constant 0 : index
      %c0_16 = arith.constant 0 : index
      %20 = vector.load %arg21[%c0_14, %c0_15, %c0_16] : memref<2x32x1xf32, #tpu.memory_space<vmem>>, vector<2x32x1xf32>
      tpu.vector_store %arg21[%c0_14, %c0_15, %c0_16], %19 {strides = array<i32>} : memref<2x32x1xf32, #tpu.memory_space<vmem>>, vector<2x32x1xf32>,
    } else {
    }
    %c0_i32_2 = arith.constant 0 : i32
    %7 = arith.cmpi eq, %arg0, %c0_i32_2 : i32
    %8 = arith.extui %7 : i1 to i32
    %c0_i32_3 = arith.constant 0 : i32
    %9 = arith.cmpi ne, %8, %c0_i32_3 : i32
    scf.if %9 {
      %cst = arith.constant 0.000000e+00 : f32
      %13 = vector.broadcast %cst : f32 to vector<64x1xf32>
      %cst_5 = arith.constant 0.000000e+00 : f32
      %14 = vector.broadcast %cst_5 : f32 to vector<64x1xf32>
      %c0 = arith.constant 0 : index
      %c0_6 = arith.constant 0 : index
      %15 = vector.load %arg3[%c0, %c0_6] : memref<64x64xbf16, #tpu.memory_space<vmem>>, vector<64x64xbf16>
      %c0_7 = arith.constant 0 : index
      %c0_8 = arith.constant 0 : index
      %c0_9 = arith.constant 0 : index
      %16 = vector.load %arg2[%c0_7, %c0_8, %c0_9] : memref<2x64x512xf32, #tpu.memory_space<vmem>>, vector<1x64x512xf32>
      %17 = vector.shape_cast %16 : vector<1x64x512xf32> to vector<64x512xf32>
      %18 = arith.truncf %17 : vector<64x512xf32> to vector<64x512xbf16>
      %cst_10 = arith.constant dense<0.000000e+00> : vector<64x512xf32>
      %19 = tpu.matmul %15, %18, %cst_10 {dimension_numbers = #tpu.dot_dimension_numbers<[1], [0], [0], [1], [0, 0, 1, 1], [], []>} : vector<64x64xbf16>, vector<64x512xbf16>, vector<64x512xf32> -> vector<64x512xf32>
      %cst_11 = arith.constant dense<0.000000e+00> : vector<64xf32>
      %20 = vector.multi_reduction <add>, %19, %cst_11 [1] : vector<64x512xf32> to vector<64xf32>
      %21 = vector.shape_cast %20 : vector<64xf32> to vector<64x1xf32>
      %22 = arith.addf %13, %21 : vector<64x1xf32>
      %23 = arith.mulf %19, %19 : vector<64x512xf32>
      %cst_12 = arith.constant dense<0.000000e+00> : vector<64xf32>
      %24 = vector.multi_reduction <add>, %23, %cst_12 [1] : vector<64x512xf32> to vector<64xf32>
      %25 = vector.shape_cast %24 : vector<64xf32> to vector<64x1xf32>
      %26 = arith.addf %14, %25 : vector<64x1xf32>
      %c0_13 = arith.constant 0 : index
      %c0_14 = arith.constant 0 : index
      %27 = arith.index_cast %1 : i32 to index
      %28 = vector.load %arg22[%c0_13, %c0_14, %27] : memref<2x64x1024xf32, #tpu.memory_space<vmem>>, vector<1x64x512xf32>
      %29 = vector.shape_cast %28 : vector<1x64x512xf32> to vector<64x512xf32>
      %30 = vector.shape_cast %19 : vector<64x512xf32> to vector<1x64x512xf32>
      tpu.vector_store %arg22[%c0_13, %c0_14, %27], %30 {strides = array<i32>} : memref<2x64x1024xf32, #tpu.memory_space<vmem>>, vector<1x64x512xf32>,
      %c0_15 = arith.constant 0 : index
      %c0_16 = arith.constant 0 : index
      %31 = vector.load %arg3[%c0_15, %c0_16] : memref<64x64xbf16, #tpu.memory_space<vmem>>, vector<64x64xbf16>
      %c1 = arith.constant 1 : index
      %c0_17 = arith.constant 0 : index
      %c0_18 = arith.constant 0 : index
      %32 = vector.load %arg2[%c1, %c0_17, %c0_18] : memref<2x64x512xf32, #tpu.memory_space<vmem>>, vector<1x64x512xf32>
      %33 = vector.shape_cast %32 : vector<1x64x512xf32> to vector<64x512xf32>
      %34 = arith.truncf %33 : vector<64x512xf32> to vector<64x512xbf16>
      %cst_19 = arith.constant dense<0.000000e+00> : vector<64x512xf32>
      %35 = tpu.matmul %31, %34, %cst_19 {dimension_numbers = #tpu.dot_dimension_numbers<[1], [0], [0], [1], [0, 0, 1, 1], [], []>} : vector<64x64xbf16>, vector<64x512xbf16>, vector<64x512xf32> -> vector<64x512xf32>
      %cst_20 = arith.constant dense<0.000000e+00> : vector<64xf32>
      %36 = vector.multi_reduction <add>, %35, %cst_20 [1] : vector<64x512xf32> to vector<64xf32>
      %37 = vector.shape_cast %36 : vector<64xf32> to vector<64x1xf32>
      %38 = arith.addf %22, %37 : vector<64x1xf32>
      %39 = arith.mulf %35, %35 : vector<64x512xf32>
      %cst_21 = arith.constant dense<0.000000e+00> : vector<64xf32>
      %40 = vector.multi_reduction <add>, %39, %cst_21 [1] : vector<64x512xf32> to vector<64xf32>
      %41 = vector.shape_cast %40 : vector<64xf32> to vector<64x1xf32>
      %42 = arith.addf %26, %41 : vector<64x1xf32>
      %c1_22 = arith.constant 1 : index
      %c0_23 = arith.constant 0 : index
      %43 = arith.index_cast %1 : i32 to index
      %44 = vector.load %arg22[%c1_22, %c0_23, %43] : memref<2x64x1024xf32, #tpu.memory_space<vmem>>, vector<1x64x512xf32>
      %45 = vector.shape_cast %44 : vector<1x64x512xf32> to vector<64x512xf32>
      %46 = vector.shape_cast %35 : vector<64x512xf32> to vector<1x64x512xf32>
      tpu.vector_store %arg22[%c1_22, %c0_23, %43], %46 {strides = array<i32>} : memref<2x64x1024xf32, #tpu.memory_space<vmem>>, vector<1x64x512xf32>,
      %c0_24 = arith.constant 0 : index
      %c0_25 = arith.constant 0 : index
      %47 = vector.load %arg18[%c0_24, %c0_25] : memref<64x1xf32, #tpu.memory_space<vmem>>, vector<64x1xf32>
      %48 = arith.addf %47, %38 : vector<64x1xf32>
      %c0_26 = arith.constant 0 : index
      %c0_27 = arith.constant 0 : index
      %49 = vector.load %arg18[%c0_26, %c0_27] : memref<64x1xf32, #tpu.memory_space<vmem>>, vector<64x1xf32>
      tpu.vector_store %arg18[%c0_26, %c0_27], %48 {strides = array<i32>} : memref<64x1xf32, #tpu.memory_space<vmem>>, vector<64x1xf32>,
      %c0_28 = arith.constant 0 : index
      %c0_29 = arith.constant 0 : index
      %50 = vector.load %arg19[%c0_28, %c0_29] : memref<64x1xf32, #tpu.memory_space<vmem>>, vector<64x1xf32>
      %51 = arith.addf %50, %42 : vector<64x1xf32>
      %c0_30 = arith.constant 0 : index
      %c0_31 = arith.constant 0 : index
      %52 = vector.load %arg19[%c0_30, %c0_31] : memref<64x1xf32, #tpu.memory_space<vmem>>, vector<64x1xf32>
      tpu.vector_store %arg19[%c0_30, %c0_31], %51 {strides = array<i32>} : memref<64x1xf32, #tpu.memory_space<vmem>>, vector<64x1xf32>,
    } else {
    }
    %c1_i32 = arith.constant 1 : i32
    %10 = arith.cmpi eq, %arg0, %c1_i32 : i32
    %11 = arith.extui %10 : i1 to i32
    %c0_i32_4 = arith.constant 0 : i32
    %12 = arith.cmpi ne, %11, %c0_i32_4 : i32
    scf.if %12 {
      %c0 = arith.constant 0 : index
      %c0_5 = arith.constant 0 : index
      %13 = vector.load %arg18[%c0, %c0_5] : memref<64x1xf32, #tpu.memory_space<vmem>>, vector<64x1xf32>
      %cst = arith.constant 4.8828125E-4 : f32
      %14 = vector.broadcast %cst : f32 to vector<64x1xf32>
      %15 = arith.mulf %13, %14 : vector<64x1xf32>
      %c0_6 = arith.constant 0 : index
      %c0_7 = arith.constant 0 : index
      %16 = vector.load %arg19[%c0_6, %c0_7] : memref<64x1xf32, #tpu.memory_space<vmem>>, vector<64x1xf32>
      %cst_8 = arith.constant 4.8828125E-4 : f32
      %17 = vector.broadcast %cst_8 : f32 to vector<64x1xf32>
      %18 = arith.mulf %16, %17 : vector<64x1xf32>
      %19 = arith.mulf %15, %15 : vector<64x1xf32>
      %20 = arith.subf %18, %19 : vector<64x1xf32>
      %c0_9 = arith.constant 0 : index
      %c0_10 = arith.constant 0 : index
      %21 = vector.load %arg4[%c0_9, %c0_10] : memref<64x1xf32, #tpu.memory_space<vmem>>, vector<64x1xf32>
      %cst_11 = arith.constant 9.99999974E-6 : f32
      %22 = vector.broadcast %cst_11 : f32 to vector<64x1xf32>
      %23 = arith.addf %20, %22 : vector<64x1xf32>
      %24 = math.rsqrt %23 : vector<64x1xf32>
      %25 = arith.mulf %21, %24 : vector<64x1xf32>
      %c0_12 = arith.constant 0 : index
      %c0_13 = arith.constant 0 : index
      %26 = vector.load %arg5[%c0_12, %c0_13] : memref<64x1xf32, #tpu.memory_space<vmem>>, vector<64x1xf32>
      %27 = arith.mulf %15, %25 : vector<64x1xf32>
      %28 = arith.subf %26, %27 : vector<64x1xf32>
      %c0_14 = arith.constant 0 : index
      %c0_15 = arith.constant 0 : index
      %29 = vector.load %arg8[%c0_14, %c0_15] : memref<32x1xf32, #tpu.memory_space<vmem>>, vector<32x1xf32>
      %c0_16 = arith.constant 0 : index
      %c0_17 = arith.constant 0 : index
      %30 = vector.load %arg9[%c0_16, %c0_17] : memref<32x1xf32, #tpu.memory_space<vmem>>, vector<32x1xf32>
      %c0_18 = arith.constant 0 : index
      %c0_19 = arith.constant 0 : index
      %31 = arith.index_cast %1 : i32 to index
      %32 = vector.load %arg22[%c0_18, %c0_19, %31] : memref<2x64x1024xf32, #tpu.memory_space<vmem>>, vector<1x64x512xf32>
      %33 = vector.shape_cast %32 : vector<1x64x512xf32> to vector<64x512xf32>
      %34 = vector.broadcast %25 : vector<64x1xf32> to vector<64x512xf32>
      %35 = arith.mulf %33, %34 : vector<64x512xf32>
      %36 = vector.broadcast %28 : vector<64x1xf32> to vector<64x512xf32>
      %37 = arith.addf %35, %36 : vector<64x512xf32>
      %cst_20 = arith.constant 0.000000e+00 : f32
      %38 = vector.broadcast %cst_20 : f32 to vector<64x512xf32>
      %39 = arith.maximumf %37, %38 : vector<64x512xf32>
      %40 = arith.truncf %39 : vector<64x512xf32> to vector<64x512xbf16>
      %41 = arith.mulf %39, %39 : vector<64x512xf32>
      %cst_21 = arith.constant dense<0.000000e+00> : vector<512xf32>
      %42 = vector.multi_reduction <add>, %41, %cst_21 [0] : vector<64x512xf32> to vector<512xf32>
      %43 = vector.shape_cast %42 : vector<512xf32> to vector<1x512xf32>
      %c0_22 = arith.constant 0 : index
      %c0_23 = arith.constant 0 : index
      %44 = vector.load %arg7[%c0_22, %c0_23] : memref<32x64xbf16, #tpu.memory_space<vmem>>, vector<32x64xbf16>
      %cst_24 = arith.constant dense<0.000000e+00> : vector<32x512xf32>
      %45 = tpu.matmul %44, %40, %cst_24 {dimension_numbers = #tpu.dot_dimension_numbers<[1], [0], [0], [1], [0, 0, 1, 1], [], []>} : vector<32x64xbf16>, vector<64x512xbf16>, vector<32x512xf32> -> vector<32x512xf32>
      %46 = vector.broadcast %43 : vector<1x512xf32> to vector<32x512xf32>
      %47 = vector.broadcast %29 : vector<32x1xf32> to vector<32x512xf32>
      %48 = arith.addf %46, %47 : vector<32x512xf32>
      %cst_25 = arith.constant 2.000000e+00 : f32
      %49 = vector.broadcast %cst_25 : f32 to vector<32x512xf32>
      %50 = arith.mulf %49, %45 : vector<32x512xf32>
      %51 = arith.subf %48, %50 : vector<32x512xf32>
      %52 = vector.broadcast %30 : vector<32x1xf32> to vector<32x512xf32>
      %53 = arith.mulf %52, %51 : vector<32x512xf32>
      %cst_26 = arith.constant dense<0xFF800000> : vector<512xf32>
      %54 = vector.multi_reduction <maximumf>, %53, %cst_26 [0] : vector<32x512xf32> to vector<512xf32>
      %55 = vector.shape_cast %54 : vector<512xf32> to vector<1x512xf32>
      %56 = vector.broadcast %55 : vector<1x512xf32> to vector<32x512xf32>
      %57 = arith.subf %53, %56 : vector<32x512xf32>
      %58 = math.exp %57 : vector<32x512xf32>
      %cst_27 = arith.constant dense<0.000000e+00> : vector<512xf32>
      %59 = vector.multi_reduction <add>, %58, %cst_27 [0] : vector<32x512xf32> to vector<512xf32>
      %60 = vector.shape_cast %59 : vector<512xf32> to vector<1x512xf32>
      %61 = vector.broadcast %60 : vector<1x512xf32> to vector<32x512xf32>
      %62 = arith.divf %58, %61 : vector<32x512xf32>
      %63 = arith.truncf %62 : vector<32x512xf32> to vector<32x512xbf16>
      %cst_28 = arith.constant dense<0.000000e+00> : vector<32x64xf32>
      %64 = tpu.matmul %63, %40, %cst_28 {dimension_numbers = #tpu.dot_dimension_numbers<[1], [1], [0], [0], [0, 0, 1, 0], [], []>} : vector<32x512xbf16>, vector<64x512xbf16>, vector<32x64xf32> -> vector<32x64xf32>
      %c0_29 = arith.constant 0 : index
      %c0_30 = arith.constant 0 : index
      %c0_31 = arith.constant 0 : index
      %65 = vector.load %arg20[%c0_29, %c0_30, %c0_31] : memref<2x32x64xf32, #tpu.memory_space<vmem>>, vector<1x32x64xf32>
      %66 = vector.shape_cast %65 : vector<1x32x64xf32> to vector<32x64xf32>
      %67 = arith.addf %66, %64 : vector<32x64xf32>
      %c0_32 = arith.constant 0 : index
      %c0_33 = arith.constant 0 : index
      %c0_34 = arith.constant 0 : index
      %68 = vector.load %arg20[%c0_32, %c0_33, %c0_34] : memref<2x32x64xf32, #tpu.memory_space<vmem>>, vector<1x32x64xf32>
      %69 = vector.shape_cast %68 : vector<1x32x64xf32> to vector<32x64xf32>
      %70 = vector.shape_cast %67 : vector<32x64xf32> to vector<1x32x64xf32>
      tpu.vector_store %arg20[%c0_32, %c0_33, %c0_34], %70 {strides = array<i32>} : memref<2x32x64xf32, #tpu.memory_space<vmem>>, vector<1x32x64xf32>,
      %c0_35 = arith.constant 0 : index
      %c0_36 = arith.constant 0 : index
      %c0_37 = arith.constant 0 : index
      %71 = vector.load %arg21[%c0_35, %c0_36, %c0_37] : memref<2x32x1xf32, #tpu.memory_space<vmem>>, vector<1x32x1xf32>
      %72 = vector.shape_cast %71 : vector<1x32x1xf32> to vector<32x1xf32>
      %cst_38 = arith.constant dense<0.000000e+00> : vector<32xf32>
      %73 = vector.multi_reduction <add>, %62, %cst_38 [1] : vector<32x512xf32> to vector<32xf32>
      %74 = vector.shape_cast %73 : vector<32xf32> to vector<32x1xf32>
      %75 = arith.addf %72, %74 : vector<32x1xf32>
      %c0_39 = arith.constant 0 : index
      %c0_40 = arith.constant 0 : index
      %c0_41 = arith.constant 0 : index
      %76 = vector.load %arg21[%c0_39, %c0_40, %c0_41] : memref<2x32x1xf32, #tpu.memory_space<vmem>>, vector<1x32x1xf32>
      %77 = vector.shape_cast %76 : vector<1x32x1xf32> to vector<32x1xf32>
      %78 = vector.shape_cast %75 : vector<32x1xf32> to vector<1x32x1xf32>
      tpu.vector_store %arg21[%c0_39, %c0_40, %c0_41], %78 {strides = array<i32>} : memref<2x32x1xf32, #tpu.memory_space<vmem>>, vector<1x32x1xf32>,
      %c1 = arith.constant 1 : index
      %c0_42 = arith.constant 0 : index
      %79 = arith.index_cast %1 : i32 to index
      %80 = vector.load %arg22[%c1, %c0_42, %79] : memref<2x64x1024xf32, #tpu.memory_space<vmem>>, vector<1x64x512xf32>
      %81 = vector.shape_cast %80 : vector<1x64x512xf32> to vector<64x512xf32>
      %82 = vector.broadcast %25 : vector<64x1xf32> to vector<64x512xf32>
      %83 = arith.mulf %81, %82 : vector<64x512xf32>
      %84 = vector.broadcast %28 : vector<64x1xf32> to vector<64x512xf32>
      %85 = arith.addf %83, %84 : vector<64x512xf32>
      %cst_43 = arith.constant 0.000000e+00 : f32
      %86 = vector.broadcast %cst_43 : f32 to vector<64x512xf32>
      %87 = arith.maximumf %85, %86 : vector<64x512xf32>
      %88 = arith.truncf %87 : vector<64x512xf32> to vector<64x512xbf16>
      %89 = arith.mulf %87, %87 : vector<64x512xf32>
      %cst_44 = arith.constant dense<0.000000e+00> : vector<512xf32>
      %90 = vector.multi_reduction <add>, %89, %cst_44 [0] : vector<64x512xf32> to vector<512xf32>
      %91 = vector.shape_cast %90 : vector<512xf32> to vector<1x512xf32>
      %c0_45 = arith.constant 0 : index
      %c0_46 = arith.constant 0 : index
      %92 = vector.load %arg7[%c0_45, %c0_46] : memref<32x64xbf16, #tpu.memory_space<vmem>>, vector<32x64xbf16>
      %cst_47 = arith.constant dense<0.000000e+00> : vector<32x512xf32>
      %93 = tpu.matmul %92, %88, %cst_47 {dimension_numbers = #tpu.dot_dimension_numbers<[1], [0], [0], [1], [0, 0, 1, 1], [], []>} : vector<32x64xbf16>, vector<64x512xbf16>, vector<32x512xf32> -> vector<32x512xf32>
      %94 = vector.broadcast %91 : vector<1x512xf32> to vector<32x512xf32>
      %95 = vector.broadcast %29 : vector<32x1xf32> to vector<32x512xf32>
      %96 = arith.addf %94, %95 : vector<32x512xf32>
      %cst_48 = arith.constant 2.000000e+00 : f32
      %97 = vector.broadcast %cst_48 : f32 to vector<32x512xf32>
      %98 = arith.mulf %97, %93 : vector<32x512xf32>
      %99 = arith.subf %96, %98 : vector<32x512xf32>
      %100 = vector.broadcast %30 : vector<32x1xf32> to vector<32x512xf32>
      %101 = arith.mulf %100, %99 : vector<32x512xf32>
      %cst_49 = arith.constant dense<0xFF800000> : vector<512xf32>
      %102 = vector.multi_reduction <maximumf>, %101, %cst_49 [0] : vector<32x512xf32> to vector<512xf32>
      %103 = vector.shape_cast %102 : vector<512xf32> to vector<1x512xf32>
      %104 = vector.broadcast %103 : vector<1x512xf32> to vector<32x512xf32>
      %105 = arith.subf %101, %104 : vector<32x512xf32>
      %106 = math.exp %105 : vector<32x512xf32>
      %cst_50 = arith.constant dense<0.000000e+00> : vector<512xf32>
      %107 = vector.multi_reduction <add>, %106, %cst_50 [0] : vector<32x512xf32> to vector<512xf32>
      %108 = vector.shape_cast %107 : vector<512xf32> to vector<1x512xf32>
      %109 = vector.broadcast %108 : vector<1x512xf32> to vector<32x512xf32>
      %110 = arith.divf %106, %109 : vector<32x512xf32>
      %111 = arith.truncf %110 : vector<32x512xf32> to vector<32x512xbf16>
      %cst_51 = arith.constant dense<0.000000e+00> : vector<32x64xf32>
      %112 = tpu.matmul %111, %88, %cst_51 {dimension_numbers = #tpu.dot_dimension_numbers<[1], [1], [0], [0], [0, 0, 1, 0], [], []>} : vector<32x512xbf16>, vector<64x512xbf16>, vector<32x64xf32> -> vector<32x64xf32>
      %c1_52 = arith.constant 1 : index
      %c0_53 = arith.constant 0 : index
      %c0_54 = arith.constant 0 : index
      %113 = vector.load %arg20[%c1_52, %c0_53, %c0_54] : memref<2x32x64xf32, #tpu.memory_space<vmem>>, vector<1x32x64xf32>
      %114 = vector.shape_cast %113 : vector<1x32x64xf32> to vector<32x64xf32>
      %115 = arith.addf %114, %112 : vector<32x64xf32>
      %c1_55 = arith.constant 1 : index
      %c0_56 = arith.constant 0 : index
      %c0_57 = arith.constant 0 : index
      %116 = vector.load %arg20[%c1_55, %c0_56, %c0_57] : memref<2x32x64xf32, #tpu.memory_space<vmem>>, vector<1x32x64xf32>
      %117 = vector.shape_cast %116 : vector<1x32x64xf32> to vector<32x64xf32>
      %118 = vector.shape_cast %115 : vector<32x64xf32> to vector<1x32x64xf32>
      tpu.vector_store %arg20[%c1_55, %c0_56, %c0_57], %118 {strides = array<i32>} : memref<2x32x64xf32, #tpu.memory_space<vmem>>, vector<1x32x64xf32>,
      %c1_58 = arith.constant 1 : index
      %c0_59 = arith.constant 0 : index
      %c0_60 = arith.constant 0 : index
      %119 = vector.load %arg21[%c1_58, %c0_59, %c0_60] : memref<2x32x1xf32, #tpu.memory_space<vmem>>, vector<1x32x1xf32>
      %120 = vector.shape_cast %119 : vector<1x32x1xf32> to vector<32x1xf32>
      %cst_61 = arith.constant dense<0.000000e+00> : vector<32xf32>
      %121 = vector.multi_reduction <add>, %110, %cst_61 [1] : vector<32x512xf32> to vector<32xf32>
      %122 = vector.shape_cast %121 : vector<32xf32> to vector<32x1xf32>
      %123 = arith.addf %120, %122 : vector<32x1xf32>
      %c1_62 = arith.constant 1 : index
      %c0_63 = arith.constant 0 : index
      %c0_64 = arith.constant 0 : index
      %124 = vector.load %arg21[%c1_62, %c0_63, %c0_64] : memref<2x32x1xf32, #tpu.memory_space<vmem>>, vector<1x32x1xf32>
      %125 = vector.shape_cast %124 : vector<1x32x1xf32> to vector<32x1xf32>
      %126 = vector.shape_cast %123 : vector<32x1xf32> to vector<1x32x1xf32>
      tpu.vector_store %arg21[%c1_62, %c0_63, %c0_64], %126 {strides = array<i32>} : memref<2x32x1xf32, #tpu.memory_space<vmem>>, vector<1x32x1xf32>,
      %c1_i32_65 = arith.constant 1 : i32
      %127 = arith.cmpi eq, %arg1, %c1_i32_65 : i32
      %128 = arith.extui %127 : i1 to i32
      %c0_i32_66 = arith.constant 0 : i32
      %129 = arith.cmpi ne, %128, %c0_i32_66 : i32
      scf.if %129 {
        %c0_67 = arith.constant 0 : index
        %c0_68 = arith.constant 0 : index
        %c0_69 = arith.constant 0 : index
        %130 = vector.load %arg20[%c0_67, %c0_68, %c0_69] : memref<2x32x64xf32, #tpu.memory_space<vmem>>, vector<2x32x64xf32>
        %c0_70 = arith.constant 0 : index
        %c0_71 = arith.constant 0 : index
        %c0_72 = arith.constant 0 : index
        %131 = vector.load %arg21[%c0_70, %c0_71, %c0_72] : memref<2x32x1xf32, #tpu.memory_space<vmem>>, vector<2x32x1xf32>
        %c0_73 = arith.constant 0 : index
        %c0_74 = arith.constant 0 : index
        %132 = vector.load %arg6[%c0_73, %c0_74] : memref<32x64xf32, #tpu.memory_space<vmem>>, vector<32x64xf32>
        %133 = vector.shape_cast %132 : vector<32x64xf32> to vector<1x32x64xf32>
        %134 = vector.broadcast %131 : vector<2x32x1xf32> to vector<2x32x64xf32>
        %135 = vector.broadcast %133 : vector<1x32x64xf32> to vector<2x32x64xf32>
        %136 = arith.mulf %134, %135 : vector<2x32x64xf32>
        %137 = arith.subf %130, %136 : vector<2x32x64xf32>
        %cst_75 = arith.constant dense<0.000000e+00> : vector<2x32xf32>
        %138 = vector.multi_reduction <add>, %137, %cst_75 [2] : vector<2x32x64xf32> to vector<2x32xf32>
        %139 = vector.shape_cast %138 : vector<2x32xf32> to vector<2x32x1xf32>
        %cst_76 = arith.constant dense<0.000000e+00> : vector<32x1xf32>
        %140 = vector.multi_reduction <add>, %139, %cst_76 [0] : vector<2x32x1xf32> to vector<32x1xf32>
        %141 = vector.shape_cast %140 : vector<32x1xf32> to vector<1x32x1xf32>
        %142 = arith.mulf %137, %137 : vector<2x32x64xf32>
        %cst_77 = arith.constant dense<0.000000e+00> : vector<2x32xf32>
        %143 = vector.multi_reduction <add>, %142, %cst_77 [2] : vector<2x32x64xf32> to vector<2x32xf32>
        %144 = vector.shape_cast %143 : vector<2x32xf32> to vector<2x32x1xf32>
        %cst_78 = arith.constant dense<0.000000e+00> : vector<32x1xf32>
        %145 = vector.multi_reduction <add>, %144, %cst_78 [0] : vector<2x32x1xf32> to vector<32x1xf32>
        %146 = vector.shape_cast %145 : vector<32x1xf32> to vector<1x32x1xf32>
        %cst_79 = arith.constant 7.812500e-03 : f32
        %147 = vector.broadcast %cst_79 : f32 to vector<1x32x1xf32>
        %148 = arith.mulf %141, %147 : vector<1x32x1xf32>
        %cst_80 = arith.constant 7.812500e-03 : f32
        %149 = vector.broadcast %cst_80 : f32 to vector<1x32x1xf32>
        %150 = arith.mulf %146, %149 : vector<1x32x1xf32>
        %151 = arith.mulf %148, %148 : vector<1x32x1xf32>
        %152 = arith.subf %150, %151 : vector<1x32x1xf32>
        %153 = vector.broadcast %148 : vector<1x32x1xf32> to vector<2x32x64xf32>
        %154 = arith.subf %137, %153 : vector<2x32x64xf32>
        %cst_81 = arith.constant 9.99999974E-6 : f32
        %155 = vector.broadcast %cst_81 : f32 to vector<1x32x1xf32>
        %156 = arith.addf %152, %155 : vector<1x32x1xf32>
        %157 = math.rsqrt %156 : vector<1x32x1xf32>
        %158 = vector.broadcast %157 : vector<1x32x1xf32> to vector<2x32x64xf32>
        %159 = arith.mulf %154, %158 : vector<2x32x64xf32>
        %c0_82 = arith.constant 0 : index
        %c0_83 = arith.constant 0 : index
        %160 = vector.load %arg10[%c0_82, %c0_83] : memref<32x1xf32, #tpu.memory_space<vmem>>, vector<32x1xf32>
        %161 = vector.shape_cast %160 : vector<32x1xf32> to vector<1x32x1xf32>
        %162 = vector.broadcast %161 : vector<1x32x1xf32> to vector<2x32x64xf32>
        %163 = arith.mulf %159, %162 : vector<2x32x64xf32>
        %c0_84 = arith.constant 0 : index
        %c0_85 = arith.constant 0 : index
        %164 = vector.load %arg11[%c0_84, %c0_85] : memref<32x1xf32, #tpu.memory_space<vmem>>, vector<32x1xf32>
        %165 = vector.shape_cast %164 : vector<32x1xf32> to vector<1x32x1xf32>
        %166 = vector.broadcast %165 : vector<1x32x1xf32> to vector<2x32x64xf32>
        %167 = arith.addf %163, %166 : vector<2x32x64xf32>
        %cst_86 = arith.constant 0.000000e+00 : f32
        %168 = vector.broadcast %cst_86 : f32 to vector<2x32x64xf32>
        %169 = arith.maximumf %167, %168 : vector<2x32x64xf32>
        %cst_87 = arith.constant dense<0.000000e+00> : vector<2x64xf32>
        %170 = vector.multi_reduction <add>, %169, %cst_87 [1] : vector<2x32x64xf32> to vector<2x64xf32>
        %cst_88 = arith.constant 3.125000e-02 : f32
        %171 = vector.broadcast %cst_88 : f32 to vector<2x64xf32>
        %172 = arith.mulf %170, %171 : vector<2x64xf32>
        %c0_89 = arith.constant 0 : index
        %c0_90 = arith.constant 0 : index
        %173 = vector.load %arg12[%c0_89, %c0_90] : memref<64x64xf32, #tpu.memory_space<vmem>>, vector<64x64xf32>
        %cst_91 = arith.constant dense<0.000000e+00> : vector<64x2xf32>
        %174 = tpu.matmul %173, %172, %cst_91 {dimension_numbers = #tpu.dot_dimension_numbers<[1], [1], [0], [0], [0, 0, 1, 0], [], []>} : vector<64x64xf32>, vector<2x64xf32>, vector<64x2xf32> -> vector<64x2xf32>
        %c0_92 = arith.constant 0 : index
        %c0_93 = arith.constant 0 : index
        %175 = vector.load %arg13[%c0_92, %c0_93] : memref<64x1xf32, #tpu.memory_space<vmem>>, vector<64x1xf32>
        %176 = vector.broadcast %175 : vector<64x1xf32> to vector<64x2xf32>
        %177 = arith.addf %174, %176 : vector<64x2xf32>
        %178 = arith.negf %177 : vector<64x2xf32>
        %179 = math.exp %178 : vector<64x2xf32>
        %cst_94 = arith.constant 1.000000e+00 : f32
        %180 = vector.broadcast %cst_94 : f32 to vector<64x2xf32>
        %181 = arith.addf %180, %179 : vector<64x2xf32>
        %182 = arith.divf %180, %181 : vector<64x2xf32>
        %c0_95 = arith.constant 0 : index
        %c0_96 = arith.constant 0 : index
        %183 = vector.load %arg16[%c0_95, %c0_96] : memref<64x2xf32, #tpu.memory_space<vmem>>, vector<64x2xf32>
        tpu.vector_store %arg16[%c0_95, %c0_96], %182 {strides = array<i32>} : memref<64x2xf32, #tpu.memory_space<vmem>>, vector<64x2xf32>,
        %c0_97 = arith.constant 0 : index
        %c0_98 = arith.constant 0 : index
        %184 = vector.load %arg14[%c0_97, %c0_98] : memref<8x64xf32, #tpu.memory_space<vmem>>, vector<8x64xf32>
        %cst_99 = arith.constant dense<0.000000e+00> : vector<2x8xf32>
        %185 = tpu.matmul %172, %184, %cst_99 {dimension_numbers = #tpu.dot_dimension_numbers<[1], [1], [0], [0], [0, 0, 1, 0], [], []>} : vector<2x64xf32>, vector<8x64xf32>, vector<2x8xf32> -> vector<2x8xf32>
        %c0_100 = arith.constant 0 : index
        %c0_101 = arith.constant 0 : index
        %186 = vector.load %arg15[%c0_100, %c0_101] : memref<1x8xf32, #tpu.memory_space<vmem>>, vector<1x8xf32>
        %187 = vector.broadcast %186 : vector<1x8xf32> to vector<2x8xf32>
        %188 = arith.addf %185, %187 : vector<2x8xf32>
        %c0_102 = arith.constant 0 : index
        %c0_103 = arith.constant 0 : index
        %189 = vector.load %arg17[%c0_102, %c0_103] : memref<2x8xf32, #tpu.memory_space<vmem>>, vector<2x8xf32>
        tpu.vector_store %arg17[%c0_102, %c0_103], %188 {strides = array<i32>} : memref<2x8xf32, #tpu.memory_space<vmem>>, vector<2x8xf32>,
      } else {
      }
    } else {
    }
    return
  }
  func.func @transform_0(%arg0: i32, %arg1: i32) -> (i32, i32, i32) {
    %c1_i32 = arith.constant 1 : i32
    %0 = arith.subi %c1_i32, %arg0 : i32
    %1 = arith.muli %0, %arg1 : i32
    %c1_i32_0 = arith.constant 1 : i32
    %2 = arith.muli %arg0, %c1_i32_0 : i32
    %3 = arith.addi %1, %2 : i32
    %c0_i32 = arith.constant 0 : i32
    %c0_i32_1 = arith.constant 0 : i32
    %c0_i32_2 = arith.constant 0 : i32
    return %c0_i32, %c0_i32_1, %3 : i32, i32, i32
  }
  func.func @transform_1(%arg0: i32, %arg1: i32) -> (i32, i32) {
    %c0_i32 = arith.constant 0 : i32
    %c0_i32_0 = arith.constant 0 : i32
    %c0_i32_1 = arith.constant 0 : i32
    return %c0_i32, %c0_i32_0 : i32, i32
  }
  func.func @transform_2(%arg0: i32, %arg1: i32) -> (i32, i32) {
    %c0_i32 = arith.constant 0 : i32
    %c0_i32_0 = arith.constant 0 : i32
    %c0_i32_1 = arith.constant 0 : i32
    return %c0_i32, %c0_i32_0 : i32, i32
  }
  func.func @transform_3(%arg0: i32, %arg1: i32) -> (i32, i32) {
    %c0_i32 = arith.constant 0 : i32
    %c0_i32_0 = arith.constant 0 : i32
    %c0_i32_1 = arith.constant 0 : i32
    return %c0_i32, %c0_i32_0 : i32, i32
  }
  func.func @transform_4(%arg0: i32, %arg1: i32) -> (i32, i32) {
    %c0_i32 = arith.constant 0 : i32
    %c0_i32_0 = arith.constant 0 : i32
    %c0_i32_1 = arith.constant 0 : i32
    return %c0_i32, %c0_i32_0 : i32, i32
  }
  func.func @transform_5(%arg0: i32, %arg1: i32) -> (i32, i32) {
    %c0_i32 = arith.constant 0 : i32
    %c0_i32_0 = arith.constant 0 : i32
    %c0_i32_1 = arith.constant 0 : i32
    return %c0_i32, %c0_i32_0 : i32, i32
  }
  func.func @transform_6(%arg0: i32, %arg1: i32) -> (i32, i32) {
    %c0_i32 = arith.constant 0 : i32
    %c0_i32_0 = arith.constant 0 : i32
    %c0_i32_1 = arith.constant 0 : i32
    return %c0_i32, %c0_i32_0 : i32, i32
  }
  func.func @transform_7(%arg0: i32, %arg1: i32) -> (i32, i32) {
    %c0_i32 = arith.constant 0 : i32
    %c0_i32_0 = arith.constant 0 : i32
    %c0_i32_1 = arith.constant 0 : i32
    return %c0_i32, %c0_i32_0 : i32, i32
  }
  func.func @transform_8(%arg0: i32, %arg1: i32) -> (i32, i32) {
    %c0_i32 = arith.constant 0 : i32
    %c0_i32_0 = arith.constant 0 : i32
    %c0_i32_1 = arith.constant 0 : i32
    return %c0_i32, %c0_i32_0 : i32, i32
  }
  func.func @transform_9(%arg0: i32, %arg1: i32) -> (i32, i32) {
    %c0_i32 = arith.constant 0 : i32
    %c0_i32_0 = arith.constant 0 : i32
    %c0_i32_1 = arith.constant 0 : i32
    return %c0_i32, %c0_i32_0 : i32, i32
  }
  func.func @transform_10(%arg0: i32, %arg1: i32) -> (i32, i32) {
    %c0_i32 = arith.constant 0 : i32
    %c0_i32_0 = arith.constant 0 : i32
    %c0_i32_1 = arith.constant 0 : i32
    return %c0_i32, %c0_i32_0 : i32, i32
  }
  func.func @transform_11(%arg0: i32, %arg1: i32) -> (i32, i32) {
    %c0_i32 = arith.constant 0 : i32
    %c0_i32_0 = arith.constant 0 : i32
    %c0_i32_1 = arith.constant 0 : i32
    return %c0_i32, %c0_i32_0 : i32, i32
  }
  func.func @transform_12(%arg0: i32, %arg1: i32) -> (i32, i32) {
    %c0_i32 = arith.constant 0 : i32
    %c0_i32_0 = arith.constant 0 : i32
    %c0_i32_1 = arith.constant 0 : i32
    return %c0_i32, %c0_i32_0 : i32, i32
  }
  func.func @transform_13(%arg0: i32, %arg1: i32) -> (i32, i32) {
    %c0_i32 = arith.constant 0 : i32
    %c0_i32_0 = arith.constant 0 : i32
    %c0_i32_1 = arith.constant 0 : i32
    return %c0_i32, %c0_i32_0 : i32, i32
  }
  func.func @transform_14(%arg0: i32, %arg1: i32) -> (i32, i32) {
    %c0_i32 = arith.constant 0 : i32
    %c0_i32_0 = arith.constant 0 : i32
    %c0_i32_1 = arith.constant 0 : i32
    return %c0_i32, %c0_i32_0 : i32, i32
  }
  func.func @transform_15(%arg0: i32, %arg1: i32) -> (i32, i32) {
    %c0_i32 = arith.constant 0 : i32
    %c0_i32_0 = arith.constant 0 : i32
    %c0_i32_1 = arith.constant 0 : i32
    return %c0_i32, %c0_i32_0 : i32, i32
  }
}

</mosaic_0001>

<bundles_post_ra>
// kernel: enc_module_forward.3
= control target key start
LH: loop header
LB: loop body
LE: loop exit
PB: predicated region body
PF: predicated region fallthrough
CT: control target
= control target key end

     0   :  { %v753_v0 = vmov 0   ;;  %v754_v17 = vmov 1   ;;  %s1562_s1 = inlined_call_operand.vmem [shape: f32[64,2], index: 1, kind: input, shape index: {}]   ;;  %s1563_s0 = inlined_call_operand.vmem [shape: f32[2,64,1024], index: 0, kind: input, shape index: {}]   ;;  %s1564_s2 = inlined_call_operand.vmem [shape: f32[2,64,1024], index: 2, kind: output, shape index: {}]  }
   0x1   :  { %748 = vset.pattern.permute.xlu1 %v753_v0  ;;  %747 = vset.pattern.permute.xlu0 %v753_v0  ;;  %v13_v1 = vld [vmem:[%s1562_s1 + $0x10] sm:$0xff]  ;;  %v11_v2 = vld [vmem:[%s1562_s1] sm:$0xff]  ;;  %v14_v7 = vld [vmem:[%s1562_s1 + $0x18] sm:$0xff] }
   0x2   :  { %v21_v3 = vadd.f32 1.0, %v13_v1  ;;  %v19_v4 = vadd.f32 1.0, %v11_v2  ;;  %749 = vset.pattern.permute.xlu2 %v753_v0  ;;  %v15_v5 = vld [vmem:[%s1562_s1 + $0x20] sm:$0xff]  ;;  %v12_v8 = vld [vmem:[%s1562_s1 + $0x8] sm:$0xff]  ;;  %v22_v10 = vadd.f32 1.0, %v14_v7  ;;  %v18_v13 = vld [vmem:[%s1562_s1 + $0x38] sm:$0xff] }
   0x3   :  { %v23_v6 = vadd.f32 1.0, %v15_v5  ;;  %v16_v9 = vld [vmem:[%s1562_s1 + $0x28] sm:$0xff]  ;;  %v20_v11 = vadd.f32 1.0, %v12_v8  ;;  %v17_v14 = vld [vmem:[%s1562_s1 + $0x30] sm:$0xff]  ;;  %v26_v15 = vadd.f32 1.0, %v18_v13  ;;  %v59_v18 = vld [vmem:[%s1563_s0 + $0x100] sm:$0xff] }
   0x4   :  { %103 = vperm.xlu1 %748, %v21_v3   ;;  %93 = vperm.xlu0 %747, %v19_v4   ;;  %v24_v12 = vadd.f32 1.0, %v16_v9  ;;  %v25_v16 = vadd.f32 1.0, %v17_v14  ;;  %v60_v19 = vld [vmem:[%s1563_s0 + $0x108] sm:$0xff]  ;;  %v61_v20 = vld [vmem:[%s1563_s0 + $0x110] sm:$0xff]  ;;  %v62_v21 = vld [vmem:[%s1563_s0 + $0x118] sm:$0xff] }
   0x5   :  { %113 = vperm.xlu2 %749, %v23_v6   ;;  %v63_v22 = vld [vmem:[%s1563_s0 + $0x120] sm:$0xff]  ;;  %v64_v23 = vld [vmem:[%s1563_s0 + $0x128] sm:$0xff]  ;;  %v65_v25 = vld [vmem:[%s1563_s0 + $0x130] sm:$0xff] }
   0x6   :  { %v66_v26 = vld [vmem:[%s1563_s0 + $0x138] sm:$0xff]  ;;  %v67_v41 = vld [vmem:[%s1563_s0 + $0x140] sm:$0xff]  ;;  %v68_v42 = vld [vmem:[%s1563_s0 + $0x148] sm:$0xff] }
   0x7   :  { %v69_v44 = vld [vmem:[%s1563_s0 + $0x150] sm:$0xff]  ;;  %v70_v45 = vld [vmem:[%s1563_s0 + $0x158] sm:$0xff]  ;;  %v71_v46 = vld [vmem:[%s1563_s0 + $0x160] sm:$0xff] }
   0x8   :  { %v72_v49 = vld [vmem:[%s1563_s0 + $0x168] sm:$0xff]  ;;  %v73_v50 = vld [vmem:[%s1563_s0 + $0x170] sm:$0xff]  ;;  %v74_v51 = vld [vmem:[%s1563_s0 + $0x178] sm:$0xff] }
   0x9   :  { %v44_v5 = vld [vmem:[%s1563_s0 + $0x88] sm:$0xff]  ;;  %v46_v7 = vld [vmem:[%s1563_s0 + $0x98] sm:$0xff]  ;;  %v47_v8 = vld [vmem:[%s1563_s0 + $0xa0] sm:$0xff] }
   0xa   :  { %v48_v9 = vld [vmem:[%s1563_s0 + $0xa8] sm:$0xff] }
   0xc   :  { %108 = vperm.xlu1 %748, %v22_v10   ;;  %98 = vperm.xlu0 %747, %v20_v11  }
   0xd   :  { %118 = vperm.xlu2 %749, %v24_v12  }
  0x14   :  { %128 = vperm.xlu1 %748, %v26_v15   ;;  %123 = vperm.xlu0 %747, %v25_v16  }
  0x15   :  { %750 = vset.pattern.permute.xlu2 %v754_v17 }
  0x16   :  { %389 = vperm.xlu2 %750, %v19_v4   ;;  %v43_v4 = vld [vmem:[%s1563_s0 + $0x80] sm:$0xff] }
  0x1c   :  { %752 = vset.pattern.permute.xlu1 %v754_v17  ;;  %751 = vset.pattern.permute.xlu0 %v754_v17 }
  0x1d   :  { %397 = vperm.xlu1 %752, %v21_v3   ;;  %393 = vperm.xlu0 %751, %v20_v11   ;;  %v49_v11 = vld [vmem:[%s1563_s0 + $0xb0] sm:$0xff] }
  0x1e   :  { %401 = vperm.xlu2 %750, %v22_v10  }
  0x25   :  { %405 = vperm.xlu1 %752, %v23_v6   ;;  %413 = vperm.xlu0 %751, %v25_v16   ;;  %v45_v6 = vld [vmem:[%s1563_s0 + $0x90] sm:$0xff] }
  0x26   :  { %409 = vperm.xlu2 %750, %v24_v12   ;;  %v50_v12 = vld [vmem:[%s1563_s0 + $0xb8] sm:$0xff] }
  0x2d   :  { %417 = vperm.xlu1 %752, %v26_v15  }
  0x5f   :  { %v114_v24 = vpop.permute.xlu2 %113 }
  0x60   :  { %v163_v27 = vmul.f32 %v114_v24, %v59_v18  ;;  %v164_v28 = vmul.f32 %v114_v24, %v60_v19  ;;  %v165_v29 = vmul.f32 %v114_v24, %v61_v20  ;;  %v166_v30 = vmul.f32 %v114_v24, %v62_v21  ;;  %v27_v19 = vld [vmem:[%s1563_s0] sm:$0xff] }
  0x61   :  { %v167_v31 = vmul.f32 %v114_v24, %v63_v22  ;;  %v168_v32 = vmul.f32 %v114_v24, %v64_v23  ;;  %v169_v33 = vmul.f32 %v114_v24, %v65_v25  ;;  %v170_v37 = vmul.f32 %v114_v24, %v66_v26  ;;  %v28_v24 = vld [vmem:[%s1563_s0 + $0x8] sm:$0xff] }
  0x62   :  { %v227_v34 = vmax.f32 %v163_v27, 0.0  ;;  %v228_v35 = vmax.f32 %v164_v28, 0.0  ;;  %v229_v36 = vmax.f32 %v165_v29, 0.0  ;;  %v230_v38 = vmax.f32 %v166_v30, 0.0  ;;  %v29_v28 = vld [vmem:[%s1563_s0 + $0x10] sm:$0xff]  ;;  %v30_v30 = vld [vmem:[%s1563_s0 + $0x18] sm:$0xff] }
  0x63   :  { %v231_v39 = vmax.f32 %v167_v31, 0.0  ;;  %v232_v40 = vmax.f32 %v168_v32, 0.0  ;;  %v233_v43 = vmax.f32 %v169_v33, 0.0  ;;  %v234_v47 = vmax.f32 %v170_v37, 0.0  ;;  %v31_v33 = vld [vmem:[%s1563_s0 + $0x20] sm:$0xff] }
  0x64   :  { %291 = vst [vmem:[%s1564_s2 + $0x100] sm:$0xff] %v227_v34 }
  0x65   :  { %292 = vst [vmem:[%s1564_s2 + $0x108] sm:$0xff] %v228_v35 }
  0x66   :  { %293 = vst [vmem:[%s1564_s2 + $0x110] sm:$0xff] %v229_v36  ;;  %v32_v36 = vld [vmem:[%s1563_s0 + $0x28] sm:$0xff] }
  0x67   :  { %294 = vst [vmem:[%s1564_s2 + $0x118] sm:$0xff] %v230_v38  ;;  %v119_v48 = vpop.permute.xlu2 %118 }
  0x68   :  { %295 = vst [vmem:[%s1564_s2 + $0x120] sm:$0xff] %v231_v39  ;;  %v171_v52 = vmul.f32 %v119_v48, %v67_v41  ;;  %v172_v53 = vmul.f32 %v119_v48, %v68_v42  ;;  %v173_v54 = vmul.f32 %v119_v48, %v69_v44  ;;  %v174_v55 = vmul.f32 %v119_v48, %v70_v45  ;;  %v33_v39 = vld [vmem:[%s1563_s0 + $0x30] sm:$0xff]  ;;  %v34_v41 = vld [vmem:[%s1563_s0 + $0x38] sm:$0xff] }
  0x69   :  { %296 = vst [vmem:[%s1564_s2 + $0x128] sm:$0xff] %v232_v40  ;;  %v175_v56 = vmul.f32 %v119_v48, %v71_v46  ;;  %v176_v57 = vmul.f32 %v119_v48, %v72_v49  ;;  %v177_v58 = vmul.f32 %v119_v48, %v73_v50  ;;  %v178_v62 = vmul.f32 %v119_v48, %v74_v51  ;;  %v52_v50 = vld [vmem:[%s1563_s0 + $0xc8] sm:$0xff] }
  0x6a   :  { %297 = vst [vmem:[%s1564_s2 + $0x130] sm:$0xff] %v233_v43  ;;  %v235_v59 = vmax.f32 %v171_v52, 0.0  ;;  %v236_v60 = vmax.f32 %v172_v53, 0.0  ;;  %v237_v61 = vmax.f32 %v173_v54, 0.0  ;;  %v238_v63 = vmax.f32 %v174_v55, 0.0  ;;  %v53_v53 = vld [vmem:[%s1563_s0 + $0xd0] sm:$0xff] }
  0x6b   :  { %298 = vst [vmem:[%s1564_s2 + $0x138] sm:$0xff] %v234_v47  ;;  %v239_v0 = vmax.f32 %v175_v56, 0.0  ;;  %v240_v1 = vmax.f32 %v176_v57, 0.0  ;;  %v241_v2 = vmax.f32 %v177_v58, 0.0  ;;  %v242_v3 = vmax.f32 %v178_v62, 0.0  ;;  %v51_v47 = vld [vmem:[%s1563_s0 + $0xc0] sm:$0xff] }
  0x6c   :  { %299 = vst [vmem:[%s1564_s2 + $0x140] sm:$0xff] %v235_v59  ;;  %v54_v55 = vld [vmem:[%s1563_s0 + $0xd8] sm:$0xff]  ;;  %v55_v58 = vld [vmem:[%s1563_s0 + $0xe0] sm:$0xff] }
  0x6d   :  { %300 = vst [vmem:[%s1564_s2 + $0x148] sm:$0xff] %v236_v60 }
  0x6e   :  { %301 = vst [vmem:[%s1564_s2 + $0x150] sm:$0xff] %v237_v61  ;;  %v56_v61 = vld [vmem:[%s1563_s0 + $0xe8] sm:$0xff] }
  0x6f   :  { %302 = vst [vmem:[%s1564_s2 + $0x158] sm:$0xff] %v238_v63 }
  0x70   :  { %303 = vst [vmem:[%s1564_s2 + $0x160] sm:$0xff] %v239_v0  ;;  %v57_v0 = vld [vmem:[%s1563_s0 + $0xf0] sm:$0xff] }
  0x71   :  { %304 = vst [vmem:[%s1564_s2 + $0x168] sm:$0xff] %v240_v1 }
  0x72   :  { %305 = vst [vmem:[%s1564_s2 + $0x170] sm:$0xff] %v241_v2  ;;  %v58_v2 = vld [vmem:[%s1563_s0 + $0xf8] sm:$0xff] }
  0x73   :  { %306 = vst [vmem:[%s1564_s2 + $0x178] sm:$0xff] %v242_v3 }
  0x76   :  { %v104_v10 = vpop.permute.xlu1 %103  ;;  %v94_v27 = vpop.permute.xlu0 %93 }
  0x77   :  { %v147_v13 = vmul.f32 %v104_v10, %v43_v4  ;;  %v148_v14 = vmul.f32 %v104_v10, %v44_v5  ;;  %v149_v15 = vmul.f32 %v104_v10, %v45_v6  ;;  %v150_v16 = vmul.f32 %v104_v10, %v46_v7 }
  0x78   :  { %v151_v17 = vmul.f32 %v104_v10, %v47_v8  ;;  %v152_v18 = vmul.f32 %v104_v10, %v48_v9  ;;  %v153_v20 = vmul.f32 %v104_v10, %v49_v11  ;;  %v154_v25 = vmul.f32 %v104_v10, %v50_v12  ;;  %v35_v8 = vld [vmem:[%s1563_s0 + $0x40] sm:$0xff]  ;;  %v36_v11 = vld [vmem:[%s1563_s0 + $0x48] sm:$0xff] }
  0x79   :  { %v211_v21 = vmax.f32 %v147_v13, 0.0  ;;  %v212_v22 = vmax.f32 %v148_v14, 0.0  ;;  %v213_v23 = vmax.f32 %v149_v15, 0.0  ;;  %v214_v26 = vmax.f32 %v150_v16, 0.0  ;;  %v37_v14 = vld [vmem:[%s1563_s0 + $0x50] sm:$0xff]  ;;  %v38_v16 = vld [vmem:[%s1563_s0 + $0x58] sm:$0xff] }
  0x7a   :  { %v215_v29 = vmax.f32 %v151_v17, 0.0  ;;  %v131_v31 = vmul.f32 %v94_v27, %v27_v19  ;;  %v216_v32 = vmax.f32 %v152_v18, 0.0  ;;  %v132_v34 = vmul.f32 %v94_v27, %v28_v24  ;;  %v39_v19 = vld [vmem:[%s1563_s0 + $0x60] sm:$0xff] }
  0x7b   :  { %275 = vst [vmem:[%s1564_s2 + $0x80] sm:$0xff] %v211_v21  ;;  %v217_v35 = vmax.f32 %v153_v20, 0.0  ;;  %v133_v37 = vmul.f32 %v94_v27, %v29_v28  ;;  %v218_v38 = vmax.f32 %v154_v25, 0.0  ;;  %v134_v40 = vmul.f32 %v94_v27, %v30_v30  ;;  %v41_v25 = vld [vmem:[%s1563_s0 + $0x70] sm:$0xff] }
  0x7c   :  { %276 = vst [vmem:[%s1564_s2 + $0x88] sm:$0xff] %v212_v22  ;;  %v135_v42 = vmul.f32 %v94_v27, %v31_v33  ;;  %v195_v43 = vmax.f32 %v131_v31, 0.0  ;;  %v136_v44 = vmul.f32 %v94_v27, %v32_v36  ;;  %v196_v45 = vmax.f32 %v132_v34, 0.0  ;;  %v40_v22 = vld [vmem:[%s1563_s0 + $0x68] sm:$0xff] }
  0x7d   :  { %277 = vst [vmem:[%s1564_s2 + $0x90] sm:$0xff] %v213_v23  ;;  %v137_v48 = vmul.f32 %v94_v27, %v33_v39  ;;  %v197_v49 = vmax.f32 %v133_v37, 0.0  ;;  %v138_v51 = vmul.f32 %v94_v27, %v34_v41  ;;  %v198_v52 = vmax.f32 %v134_v40, 0.0  ;;  %v42_v27 = vld [vmem:[%s1563_s0 + $0x78] sm:$0xff]  ;;  %v619_v39 = vld [vmem:[%s1563_s0 + $0x210] sm:$0xff] }
  0x7e   :  { %278 = vst [vmem:[%s1564_s2 + $0x98] sm:$0xff] %v214_v26  ;;  %v109_v46 = vpop.permute.xlu1 %108  ;;  %v199_v54 = vmax.f32 %v135_v42, 0.0  ;;  %v200_v57 = vmax.f32 %v136_v44, 0.0  ;;  %v99_v7 = vpop.permute.xlu0 %98  ;;  %v620_v41 = vld [vmem:[%s1563_s0 + $0x218] sm:$0xff]  ;;  %v621_v44 = vld [vmem:[%s1563_s0 + $0x220] sm:$0xff] }
  0x7f   :  { %279 = vst [vmem:[%s1564_s2 + $0xa0] sm:$0xff] %v215_v29  ;;  %v155_v56 = vmul.f32 %v109_v46, %v51_v47  ;;  %v156_v59 = vmul.f32 %v109_v46, %v52_v50  ;;  %v201_v60 = vmax.f32 %v137_v48, 0.0  ;;  %v157_v62 = vmul.f32 %v109_v46, %v53_v53  ;;  %v622_v47 = vld [vmem:[%s1563_s0 + $0x228] sm:$0xff]  ;;  %v623_v50 = vld [vmem:[%s1563_s0 + $0x230] sm:$0xff] }
  0x80   :  { %280 = vst [vmem:[%s1564_s2 + $0xa8] sm:$0xff] %v216_v32  ;;  %v202_v63 = vmax.f32 %v138_v51, 0.0  ;;  %v158_v1 = vmul.f32 %v109_v46, %v54_v55  ;;  %v159_v3 = vmul.f32 %v109_v46, %v55_v58  ;;  %v160_v5 = vmul.f32 %v109_v46, %v56_v61  ;;  %v617_v32 = vld [vmem:[%s1563_s0 + $0x200] sm:$0xff]  ;;  %v84_v61 = vld [vmem:[%s1563_s0 + $0x1c8] sm:$0xff] }
  0x81   :  { %281 = vst [vmem:[%s1564_s2 + $0xb0] sm:$0xff] %v217_v35  ;;  %v219_v4 = vmax.f32 %v155_v56, 0.0  ;;  %v220_v6 = vmax.f32 %v156_v59, 0.0  ;;  %v161_v9 = vmul.f32 %v109_v46, %v57_v0  ;;  %v221_v10 = vmax.f32 %v157_v62, 0.0  ;;  %v618_v35 = vld [vmem:[%s1563_s0 + $0x208] sm:$0xff]  ;;  %v83_v58 = vld [vmem:[%s1563_s0 + $0x1c0] sm:$0xff] }
  0x82   :  { %282 = vst [vmem:[%s1564_s2 + $0xb8] sm:$0xff] %v218_v38  ;;  %v162_v12 = vmul.f32 %v109_v46, %v58_v2  ;;  %v222_v13 = vmax.f32 %v158_v1, 0.0  ;;  %v223_v15 = vmax.f32 %v159_v3, 0.0  ;;  %v139_v17 = vmul.f32 %v99_v7, %v35_v8  ;;  %v390_v38 = vpop.permute.xlu2 %389  ;;  %v85_v0 = vld [vmem:[%s1563_s0 + $0x1d0] sm:$0xff]  ;;  %v86_v2 = vld [vmem:[%s1563_s0 + $0x1d8] sm:$0xff]  ;;  %v88_v8 = vld [vmem:[%s1563_s0 + $0x1e8] sm:$0xff] }
  0x83   :  { %259 = vst [vmem:[%s1564_s2] sm:$0xff] %v195_v43  ;;  %v224_v18 = vmax.f32 %v160_v5, 0.0  ;;  %v140_v20 = vmul.f32 %v99_v7, %v36_v11  ;;  %v225_v21 = vmax.f32 %v161_v9, 0.0  ;;  %v141_v23 = vmul.f32 %v99_v7, %v37_v14  ;;  %v87_v5 = vld [vmem:[%s1563_s0 + $0x1e0] sm:$0xff]  ;;  %v89_v11 = vld [vmem:[%s1563_s0 + $0x1f0] sm:$0xff] }
  0x84   :  { %260 = vst [vmem:[%s1564_s2 + $0x8] sm:$0xff] %v196_v45  ;;  %v226_v24 = vmax.f32 %v162_v12, 0.0  ;;  %v142_v26 = vmul.f32 %v99_v7, %v38_v16  ;;  %v143_v28 = vmul.f32 %v99_v7, %v39_v19  ;;  %v203_v29 = vmax.f32 %v139_v17, 0.0  ;;  %v75_v19 = vld [vmem:[%s1563_s0 + $0x180] sm:$0xff] }
  0x85   :  { %261 = vst [vmem:[%s1564_s2 + $0x10] sm:$0xff] %v197_v49  ;;  %v144_v30 = vmul.f32 %v99_v7, %v40_v22  ;;  %v204_v31 = vmax.f32 %v140_v20, 0.0  ;;  %v145_v33 = vmul.f32 %v99_v7, %v41_v25  ;;  %v205_v34 = vmax.f32 %v141_v23, 0.0  ;;  %v76_v22 = vld [vmem:[%s1563_s0 + $0x188] sm:$0xff]  ;;  %v77_v25 = vld [vmem:[%s1563_s0 + $0x190] sm:$0xff] }
  0x86   :  { %262 = vst [vmem:[%s1564_s2 + $0x18] sm:$0xff] %v198_v52  ;;  %v146_v36 = vmul.f32 %v99_v7, %v42_v27  ;;  %v206_v37 = vmax.f32 %v142_v26, 0.0  ;;  %v207_v40 = vmax.f32 %v143_v28, 0.0  ;;  %v420_v42 = vmul.f32 %v617_v32, %v390_v38  ;;  %v624_v52 = vld [vmem:[%s1563_s0 + $0x238] sm:$0xff] }
  0x87   :  { %263 = vst [vmem:[%s1564_s2 + $0x20] sm:$0xff] %v199_v54  ;;  %v208_v43 = vmax.f32 %v144_v30, 0.0  ;;  %v421_v45 = vmul.f32 %v618_v35, %v390_v38  ;;  %v209_v46 = vmax.f32 %v145_v33, 0.0  ;;  %v422_v48 = vmul.f32 %v619_v39, %v390_v38  ;;  %v78_v27 = vld [vmem:[%s1563_s0 + $0x198] sm:$0xff]  ;;  %v79_v30 = vld [vmem:[%s1563_s0 + $0x1a0] sm:$0xff]  ;;  %v80_v33 = vld [vmem:[%s1563_s0 + $0x1a8] sm:$0xff] }
  0x88   :  { %264 = vst [vmem:[%s1564_s2 + $0x28] sm:$0xff] %v200_v57  ;;  %v210_v49 = vmax.f32 %v146_v36, 0.0  ;;  %v423_v51 = vmul.f32 %v620_v41, %v390_v38  ;;  %v424_v53 = vmul.f32 %v621_v44, %v390_v38  ;;  %v484_v54 = vmax.f32 %v420_v42, 0.0  ;;  %v129_v57 = vpop.permute.xlu1 %128  ;;  %v81_v36 = vld [vmem:[%s1563_s0 + $0x1b0] sm:$0xff] }
  0x89   :  { %265 = vst [vmem:[%s1564_s2 + $0x30] sm:$0xff] %v201_v60  ;;  %v425_v55 = vmul.f32 %v622_v47, %v390_v38  ;;  %v485_v56 = vmax.f32 %v421_v45, 0.0  ;;  %v426_v59 = vmul.f32 %v623_v50, %v390_v38  ;;  %v486_v60 = vmax.f32 %v422_v48, 0.0  ;;  %v643_v50 = vld [vmem:[%s1563_s0 + $0x2d0] sm:$0xff] }
  0x8a   :  { %266 = vst [vmem:[%s1564_s2 + $0x38] sm:$0xff] %v202_v63  ;;  %v427_v62 = vmul.f32 %v624_v52, %v390_v38  ;;  %v487_v63 = vmax.f32 %v423_v51, 0.0  ;;  %v488_v1 = vmax.f32 %v424_v53, 0.0  ;;  %v187_v3 = vmul.f32 %v129_v57, %v83_v58  ;;  %v82_v38 = vld [vmem:[%s1563_s0 + $0x1b8] sm:$0xff]  ;;  %v646_v58 = vld [vmem:[%s1563_s0 + $0x2e8] sm:$0xff] }
  0x8b   :  { %283 = vst [vmem:[%s1564_s2 + $0xc0] sm:$0xff] %v219_v4  ;;  %v489_v4 = vmax.f32 %v425_v55, 0.0  ;;  %v490_v7 = vmax.f32 %v426_v59, 0.0  ;;  %v189_v9 = vmul.f32 %v129_v57, %v85_v0  ;;  %v190_v12 = vmul.f32 %v129_v57, %v86_v2  ;;  %v644_v52 = vld [vmem:[%s1563_s0 + $0x2d8] sm:$0xff]  ;;  %v645_v55 = vld [vmem:[%s1563_s0 + $0x2e0] sm:$0xff] }
  0x8c   :  { %284 = vst [vmem:[%s1564_s2 + $0xc8] sm:$0xff] %v220_v6  ;;  %v188_v6 = vmul.f32 %v129_v57, %v84_v61  ;;  %v191_v14 = vmul.f32 %v129_v57, %v87_v5  ;;  %v192_v16 = vmul.f32 %v129_v57, %v88_v8  ;;  %v193_v20 = vmul.f32 %v129_v57, %v89_v11  ;;  %v647_v61 = vld [vmem:[%s1563_s0 + $0x2f0] sm:$0xff]  ;;  %v633_v5 = vld [vmem:[%s1563_s0 + $0x280] sm:$0xff]  ;;  %v634_v8 = vld [vmem:[%s1563_s0 + $0x288] sm:$0xff] }
  0x8d   :  { %285 = vst [vmem:[%s1564_s2 + $0xd0] sm:$0xff] %v221_v10  ;;  %v491_v10 = vmax.f32 %v427_v62, 0.0  ;;  %v635_v11 = vld [vmem:[%s1563_s0 + $0x290] sm:$0xff] }
  0x8e   :  { %286 = vst [vmem:[%s1564_s2 + $0xd8] sm:$0xff] %v222_v13  ;;  %v90_v13 = vld [vmem:[%s1563_s0 + $0x1f8] sm:$0xff]  ;;  %v252_v17 = vmax.f32 %v188_v6, 0.0  ;;  %v255_v26 = vmax.f32 %v191_v14, 0.0  ;;  %v257_v32 = vmax.f32 %v193_v20, 0.0 }
  0x8f   :  { %287 = vst [vmem:[%s1564_s2 + $0xe0] sm:$0xff] %v223_v15  ;;  %v251_v15 = vmax.f32 %v187_v3, 0.0  ;;  %v194_v23 = vmul.f32 %v129_v57, %v90_v13  ;;  %v636_v13 = vld [vmem:[%s1563_s0 + $0x298] sm:$0xff] }
  0x90   :  { %288 = vst [vmem:[%s1564_s2 + $0xe8] sm:$0xff] %v224_v18  ;;  %v124_v18 = vpop.permute.xlu0 %123 }
  0x91   :  { %289 = vst [vmem:[%s1564_s2 + $0xf0] sm:$0xff] %v225_v21  ;;  %v253_v21 = vmax.f32 %v189_v9, 0.0  ;;  %v179_v28 = vmul.f32 %v124_v18, %v75_v19  ;;  %v258_v35 = vmax.f32 %v194_v23, 0.0  ;;  %v183_v39 = vmul.f32 %v124_v18, %v79_v30  ;;  %v638_v19 = vld [vmem:[%s1563_s0 + $0x2a8] sm:$0xff]  ;;  %v657_v30 = vld [vmem:[%s1563_s0 + $0x340] sm:$0xff] }
  0x92   :  { %290 = vst [vmem:[%s1564_s2 + $0xf8] sm:$0xff] %v226_v24  ;;  %v254_v24 = vmax.f32 %v190_v12, 0.0  ;;  %v184_v41 = vmul.f32 %v124_v18, %v80_v33  ;;  %v185_v44 = vmul.f32 %v124_v18, %v81_v36  ;;  %v186_v47 = vmul.f32 %v124_v18, %v82_v38  ;;  %v658_v33 = vld [vmem:[%s1563_s0 + $0x348] sm:$0xff]  ;;  %v659_v36 = vld [vmem:[%s1563_s0 + $0x350] sm:$0xff]  ;;  %v660_v38 = vld [vmem:[%s1563_s0 + $0x358] sm:$0xff] }
  0x93   :  { %267 = vst [vmem:[%s1564_s2 + $0x40] sm:$0xff] %v203_v29  ;;  %v256_v29 = vmax.f32 %v192_v16, 0.0  ;;  %v247_v51 = vmax.f32 %v183_v39, 0.0  ;;  %v637_v16 = vld [vmem:[%s1563_s0 + $0x2a0] sm:$0xff] }
  0x94   :  { %268 = vst [vmem:[%s1564_s2 + $0x48] sm:$0xff] %v204_v31  ;;  %v180_v31 = vmul.f32 %v124_v18, %v76_v22  ;;  %v249_v57 = vmax.f32 %v185_v44, 0.0  ;;  %v639_v22 = vld [vmem:[%s1563_s0 + $0x2b0] sm:$0xff]  ;;  %v662_v44 = vld [vmem:[%s1563_s0 + $0x368] sm:$0xff] }
  0x95   :  { %269 = vst [vmem:[%s1564_s2 + $0x50] sm:$0xff] %v205_v34  ;;  %v181_v34 = vmul.f32 %v124_v18, %v77_v25 }
  0x96   :  { %270 = vst [vmem:[%s1564_s2 + $0x58] sm:$0xff] %v206_v37  ;;  %v182_v37 = vmul.f32 %v124_v18, %v78_v27  ;;  %v244_v42 = vmax.f32 %v180_v31, 0.0 }
  0x97   :  { %271 = vst [vmem:[%s1564_s2 + $0x60] sm:$0xff] %v207_v40  ;;  %v243_v40 = vmax.f32 %v179_v28, 0.0  ;;  %v245_v45 = vmax.f32 %v181_v34, 0.0 }
  0x98   :  { %272 = vst [vmem:[%s1564_s2 + $0x68] sm:$0xff] %v208_v43  ;;  %v641_v43 = vld [vmem:[%s1563_s0 + $0x2c0] sm:$0xff]  ;;  %v246_v48 = vmax.f32 %v182_v37, 0.0 }
  0x99   :  { %273 = vst [vmem:[%s1564_s2 + $0x70] sm:$0xff] %v209_v46  ;;  %v642_v46 = vld [vmem:[%s1563_s0 + $0x2c8] sm:$0xff] }
  0x9a   :  { %274 = vst [vmem:[%s1564_s2 + $0x78] sm:$0xff] %v210_v49  ;;  %v402_v49 = vpop.permute.xlu2 %401 }
  0x9b   :  { %681 = vst [vmem:[%s1564_s2 + $0x200] sm:$0xff] %v484_v54  ;;  %v444_v53 = vmul.f32 %v641_v43, %v402_v49  ;;  %v248_v54 = vmax.f32 %v184_v41, 0.0  ;;  %v446_v59 = vmul.f32 %v643_v50, %v402_v49  ;;  %v447_v62 = vmul.f32 %v644_v52, %v402_v49  ;;  %v661_v41 = vld [vmem:[%s1563_s0 + $0x360] sm:$0xff] }
  0x9c   :  { %682 = vst [vmem:[%s1564_s2 + $0x208] sm:$0xff] %v485_v56  ;;  %v445_v56 = vmul.f32 %v642_v46, %v402_v49  ;;  %v448_v0 = vmul.f32 %v645_v55, %v402_v49  ;;  %v449_v2 = vmul.f32 %v646_v58, %v402_v49  ;;  %v450_v6 = vmul.f32 %v647_v61, %v402_v49  ;;  %v627_v61 = vld [vmem:[%s1563_s0 + $0x250] sm:$0xff] }
  0x9d   :  { %683 = vst [vmem:[%s1564_s2 + $0x210] sm:$0xff] %v486_v60  ;;  %v250_v60 = vmax.f32 %v186_v47, 0.0  ;;  %v663_v47 = vld [vmem:[%s1563_s0 + $0x370] sm:$0xff] }
  0x9e   :  { %684 = vst [vmem:[%s1564_s2 + $0x218] sm:$0xff] %v487_v63  ;;  %v648_v63 = vld [vmem:[%s1563_s0 + $0x2f8] sm:$0xff]  ;;  %v509_v3 = vmax.f32 %v445_v56, 0.0  ;;  %v512_v12 = vmax.f32 %v448_v0, 0.0  ;;  %v514_v18 = vmax.f32 %v450_v6, 0.0 }
  0x9f   :  { %685 = vst [vmem:[%s1564_s2 + $0x220] sm:$0xff] %v488_v1  ;;  %v508_v1 = vmax.f32 %v444_v53, 0.0  ;;  %v451_v9 = vmul.f32 %v648_v63, %v402_v49  ;;  %v664_v49 = vld [vmem:[%s1563_s0 + $0x378] sm:$0xff] }
  0xa0   :  { %686 = vst [vmem:[%s1564_s2 + $0x228] sm:$0xff] %v489_v4  ;;  %v398_v4 = vpop.permute.xlu1 %397  ;;  %v628_v63 = vld [vmem:[%s1563_s0 + $0x258] sm:$0xff] }
  0xa1   :  { %687 = vst [vmem:[%s1564_s2 + $0x230] sm:$0xff] %v490_v7  ;;  %v510_v7 = vmax.f32 %v446_v59, 0.0  ;;  %v436_v14 = vmul.f32 %v633_v5, %v398_v4  ;;  %v438_v20 = vmul.f32 %v635_v11, %v398_v4  ;;  %v439_v23 = vmul.f32 %v636_v13, %v398_v4  ;;  %v630_v5 = vld [vmem:[%s1563_s0 + $0x268] sm:$0xff] }
  0xa2   :  { %688 = vst [vmem:[%s1564_s2 + $0x238] sm:$0xff] %v491_v10  ;;  %v511_v10 = vmax.f32 %v447_v62, 0.0  ;;  %v440_v25 = vmul.f32 %v637_v16, %v398_v4  ;;  %v441_v27 = vmul.f32 %v638_v19, %v398_v4  ;;  %v442_v31 = vmul.f32 %v639_v22, %v398_v4  ;;  %v649_v16 = vld [vmem:[%s1563_s0 + $0x300] sm:$0xff]  ;;  %v650_v19 = vld [vmem:[%s1563_s0 + $0x308] sm:$0xff]  ;;  %v651_v22 = vld [vmem:[%s1563_s0 + $0x310] sm:$0xff] }
  0xa3   :  { %315 = vst [vmem:[%s1564_s2 + $0x1c0] sm:$0xff] %v251_v15  ;;  %v513_v15 = vmax.f32 %v449_v2, 0.0  ;;  %v629_v2 = vld [vmem:[%s1563_s0 + $0x260] sm:$0xff] }
  0xa4   :  { %316 = vst [vmem:[%s1564_s2 + $0x1c8] sm:$0xff] %v252_v17  ;;  %v437_v17 = vmul.f32 %v634_v8, %v398_v4  ;;  %v504_v37 = vmax.f32 %v440_v25, 0.0  ;;  %v506_v43 = vmax.f32 %v442_v31, 0.0  ;;  %v631_v8 = vld [vmem:[%s1563_s0 + $0x270] sm:$0xff] }
  0xa5   :  { %317 = vst [vmem:[%s1564_s2 + $0x1d0] sm:$0xff] %v253_v21  ;;  %v515_v21 = vmax.f32 %v451_v9, 0.0 }
  0xa6   :  { %318 = vst [vmem:[%s1564_s2 + $0x1d8] sm:$0xff] %v254_v24  ;;  %v640_v24 = vld [vmem:[%s1563_s0 + $0x2b8] sm:$0xff]  ;;  %v501_v28 = vmax.f32 %v437_v17, 0.0 }
  0xa7   :  { %319 = vst [vmem:[%s1564_s2 + $0x1e0] sm:$0xff] %v255_v26  ;;  %v500_v26 = vmax.f32 %v436_v14, 0.0  ;;  %v443_v34 = vmul.f32 %v640_v24, %v398_v4  ;;  %v652_v24 = vld [vmem:[%s1563_s0 + $0x318] sm:$0xff] }
  0xa8   :  { %320 = vst [vmem:[%s1564_s2 + $0x1e8] sm:$0xff] %v256_v29  ;;  %v410_v29 = vpop.permute.xlu2 %409 }
  0xa9   :  { %321 = vst [vmem:[%s1564_s2 + $0x1f0] sm:$0xff] %v257_v32  ;;  %v502_v32 = vmax.f32 %v438_v20, 0.0  ;;  %v460_v39 = vmul.f32 %v657_v30, %v410_v29  ;;  %v507_v46 = vmax.f32 %v443_v34, 0.0  ;;  %v464_v50 = vmul.f32 %v661_v41, %v410_v29  ;;  %v654_v30 = vld [vmem:[%s1563_s0 + $0x328] sm:$0xff]  ;;  %v665_v41 = vld [vmem:[%s1563_s0 + $0x380] sm:$0xff] }
  0xaa   :  { %322 = vst [vmem:[%s1564_s2 + $0x1f8] sm:$0xff] %v258_v35  ;;  %v503_v35 = vmax.f32 %v439_v23, 0.0  ;;  %v465_v52 = vmul.f32 %v662_v44, %v410_v29  ;;  %v466_v55 = vmul.f32 %v663_v47, %v410_v29  ;;  %v467_v58 = vmul.f32 %v664_v49, %v410_v29  ;;  %v666_v44 = vld [vmem:[%s1563_s0 + $0x388] sm:$0xff]  ;;  %v667_v47 = vld [vmem:[%s1563_s0 + $0x390] sm:$0xff]  ;;  %v668_v49 = vld [vmem:[%s1563_s0 + $0x398] sm:$0xff] }
  0xab   :  { %307 = vst [vmem:[%s1564_s2 + $0x180] sm:$0xff] %v243_v40  ;;  %v505_v40 = vmax.f32 %v441_v27, 0.0  ;;  %v528_v62 = vmax.f32 %v464_v50, 0.0  ;;  %v653_v27 = vld [vmem:[%s1563_s0 + $0x320] sm:$0xff] }
  0xac   :  { %308 = vst [vmem:[%s1564_s2 + $0x188] sm:$0xff] %v244_v42  ;;  %v461_v42 = vmul.f32 %v658_v33, %v410_v29  ;;  %v530_v4 = vmax.f32 %v466_v55, 0.0  ;;  %v655_v33 = vld [vmem:[%s1563_s0 + $0x330] sm:$0xff]  ;;  %v670_v55 = vld [vmem:[%s1563_s0 + $0x3a8] sm:$0xff] }
  0xad   :  { %309 = vst [vmem:[%s1564_s2 + $0x190] sm:$0xff] %v245_v45  ;;  %v462_v45 = vmul.f32 %v659_v36, %v410_v29 }
  0xae   :  { %310 = vst [vmem:[%s1564_s2 + $0x198] sm:$0xff] %v246_v48  ;;  %v463_v48 = vmul.f32 %v660_v38, %v410_v29  ;;  %v525_v53 = vmax.f32 %v461_v42, 0.0 }
  0xaf   :  { %311 = vst [vmem:[%s1564_s2 + $0x1a0] sm:$0xff] %v247_v51  ;;  %v524_v51 = vmax.f32 %v460_v39, 0.0  ;;  %v526_v56 = vmax.f32 %v462_v45, 0.0 }
  0xb0   :  { %312 = vst [vmem:[%s1564_s2 + $0x1a8] sm:$0xff] %v248_v54  ;;  %v625_v54 = vld [vmem:[%s1563_s0 + $0x240] sm:$0xff]  ;;  %v527_v59 = vmax.f32 %v463_v48, 0.0 }
  0xb1   :  { %313 = vst [vmem:[%s1564_s2 + $0x1b0] sm:$0xff] %v249_v57  ;;  %v626_v57 = vld [vmem:[%s1563_s0 + $0x248] sm:$0xff] }
  0xb2   :  { %314 = vst [vmem:[%s1564_s2 + $0x1b8] sm:$0xff] %v250_v60  ;;  %v394_v60 = vpop.permute.xlu0 %393 }
  0xb3   :  { %705 = vst [vmem:[%s1564_s2 + $0x2c0] sm:$0xff] %v508_v1  ;;  %v428_v0 = vmul.f32 %v625_v54, %v394_v60  ;;  %v529_v1 = vmax.f32 %v465_v52, 0.0  ;;  %v430_v6 = vmul.f32 %v627_v61, %v394_v60  ;;  %v431_v9 = vmul.f32 %v628_v63, %v394_v60  ;;  %v669_v52 = vld [vmem:[%s1563_s0 + $0x3a0] sm:$0xff] }
  0xb4   :  { %706 = vst [vmem:[%s1564_s2 + $0x2c8] sm:$0xff] %v509_v3  ;;  %v429_v3 = vmul.f32 %v626_v57, %v394_v60  ;;  %v432_v11 = vmul.f32 %v629_v2, %v394_v60  ;;  %v433_v13 = vmul.f32 %v630_v5, %v394_v60  ;;  %v434_v17 = vmul.f32 %v631_v8, %v394_v60  ;;  %v673_v2 = vld [vmem:[%s1563_s0 + $0x3c0] sm:$0xff]  ;;  %v674_v5 = vld [vmem:[%s1563_s0 + $0x3c8] sm:$0xff]  ;;  %v675_v8 = vld [vmem:[%s1563_s0 + $0x3d0] sm:$0xff] }
  0xb5   :  { %707 = vst [vmem:[%s1564_s2 + $0x2d0] sm:$0xff] %v510_v7  ;;  %v531_v7 = vmax.f32 %v467_v58, 0.0  ;;  %v671_v58 = vld [vmem:[%s1563_s0 + $0x3b0] sm:$0xff] }
  0xb6   :  { %708 = vst [vmem:[%s1564_s2 + $0x2d8] sm:$0xff] %v511_v10  ;;  %v632_v10 = vld [vmem:[%s1563_s0 + $0x278] sm:$0xff]  ;;  %v493_v14 = vmax.f32 %v429_v3, 0.0  ;;  %v496_v23 = vmax.f32 %v432_v11, 0.0  ;;  %v498_v29 = vmax.f32 %v434_v17, 0.0 }
  0xb7   :  { %709 = vst [vmem:[%s1564_s2 + $0x2e0] sm:$0xff] %v512_v12  ;;  %v492_v12 = vmax.f32 %v428_v0, 0.0  ;;  %v435_v20 = vmul.f32 %v632_v10, %v394_v60  ;;  %v672_v60 = vld [vmem:[%s1563_s0 + $0x3b8] sm:$0xff] }
  0xb8   :  { %710 = vst [vmem:[%s1564_s2 + $0x2e8] sm:$0xff] %v513_v15  ;;  %v406_v15 = vpop.permute.xlu1 %405  ;;  %v676_v10 = vld [vmem:[%s1563_s0 + $0x3d8] sm:$0xff] }
  0xb9   :  { %711 = vst [vmem:[%s1564_s2 + $0x2f0] sm:$0xff] %v514_v18  ;;  %v494_v18 = vmax.f32 %v430_v6, 0.0  ;;  %v452_v25 = vmul.f32 %v649_v16, %v406_v15  ;;  %v454_v31 = vmul.f32 %v651_v22, %v406_v15  ;;  %v455_v34 = vmul.f32 %v652_v24, %v406_v15  ;;  %v678_v16 = vld [vmem:[%s1563_s0 + $0x3e8] sm:$0xff] }
  0xba   :  { %712 = vst [vmem:[%s1564_s2 + $0x2f8] sm:$0xff] %v515_v21  ;;  %v495_v21 = vmax.f32 %v431_v9, 0.0  ;;  %v456_v36 = vmul.f32 %v653_v27, %v406_v15  ;;  %v457_v38 = vmul.f32 %v654_v30, %v406_v15  ;;  %v458_v42 = vmul.f32 %v655_v33, %v406_v15 }
  0xbb   :  { %697 = vst [vmem:[%s1564_s2 + $0x280] sm:$0xff] %v500_v26  ;;  %v497_v26 = vmax.f32 %v433_v13, 0.0  ;;  %v677_v13 = vld [vmem:[%s1563_s0 + $0x3e0] sm:$0xff] }
  0xbc   :  { %698 = vst [vmem:[%s1564_s2 + $0x288] sm:$0xff] %v501_v28  ;;  %v453_v28 = vmul.f32 %v650_v19, %v406_v15  ;;  %v520_v48 = vmax.f32 %v456_v36, 0.0  ;;  %v522_v54 = vmax.f32 %v458_v42, 0.0  ;;  %v679_v19 = vld [vmem:[%s1563_s0 + $0x3f0] sm:$0xff] }
  0xbd   :  { %699 = vst [vmem:[%s1564_s2 + $0x290] sm:$0xff] %v502_v32  ;;  %v499_v32 = vmax.f32 %v435_v20, 0.0 }
  0xbe   :  { %700 = vst [vmem:[%s1564_s2 + $0x298] sm:$0xff] %v503_v35  ;;  %v656_v35 = vld [vmem:[%s1563_s0 + $0x338] sm:$0xff]  ;;  %v517_v39 = vmax.f32 %v453_v28, 0.0 }
  0xbf   :  { %701 = vst [vmem:[%s1564_s2 + $0x2a0] sm:$0xff] %v504_v37  ;;  %v516_v37 = vmax.f32 %v452_v25, 0.0  ;;  %v459_v45 = vmul.f32 %v656_v35, %v406_v15 }
  0xc0   :  { %702 = vst [vmem:[%s1564_s2 + $0x2a8] sm:$0xff] %v505_v40  ;;  %v414_v40 = vpop.permute.xlu0 %413 }
  0xc1   :  { %703 = vst [vmem:[%s1564_s2 + $0x2b0] sm:$0xff] %v506_v43  ;;  %v518_v43 = vmax.f32 %v454_v31, 0.0  ;;  %v468_v50 = vmul.f32 %v665_v41, %v414_v40  ;;  %v523_v57 = vmax.f32 %v459_v45, 0.0  ;;  %v472_v61 = vmul.f32 %v669_v52, %v414_v40 }
  0xc2   :  { %704 = vst [vmem:[%s1564_s2 + $0x2b8] sm:$0xff] %v507_v46  ;;  %v519_v46 = vmax.f32 %v455_v34, 0.0  ;;  %v473_v63 = vmul.f32 %v670_v55, %v414_v40  ;;  %v474_v3 = vmul.f32 %v671_v58, %v414_v40  ;;  %v475_v6 = vmul.f32 %v672_v60, %v414_v40 }
  0xc3   :  { %721 = vst [vmem:[%s1564_s2 + $0x340] sm:$0xff] %v524_v51  ;;  %v521_v51 = vmax.f32 %v457_v38, 0.0  ;;  %v536_v9 = vmax.f32 %v472_v61, 0.0 }
  0xc4   :  { %722 = vst [vmem:[%s1564_s2 + $0x348] sm:$0xff] %v525_v53  ;;  %v469_v53 = vmul.f32 %v666_v44, %v414_v40  ;;  %v538_v15 = vmax.f32 %v474_v3, 0.0 }
  0xc5   :  { %723 = vst [vmem:[%s1564_s2 + $0x350] sm:$0xff] %v526_v56  ;;  %v470_v56 = vmul.f32 %v667_v47, %v414_v40 }
  0xc6   :  { %724 = vst [vmem:[%s1564_s2 + $0x358] sm:$0xff] %v527_v59  ;;  %v471_v59 = vmul.f32 %v668_v49, %v414_v40  ;;  %v533_v0 = vmax.f32 %v469_v53, 0.0 }
  0xc7   :  { %725 = vst [vmem:[%s1564_s2 + $0x360] sm:$0xff] %v528_v62  ;;  %v532_v62 = vmax.f32 %v468_v50, 0.0 }
  0xc8   :  { %726 = vst [vmem:[%s1564_s2 + $0x368] sm:$0xff] %v529_v1  ;;  %v418_v1 = vpop.permute.xlu1 %417 }
  0xc9   :  { %727 = vst [vmem:[%s1564_s2 + $0x370] sm:$0xff] %v530_v4  ;;  %v534_v4 = vmax.f32 %v470_v56, 0.0  ;;  %v476_v11 = vmul.f32 %v673_v2, %v418_v1  ;;  %v478_v17 = vmul.f32 %v675_v8, %v418_v1  ;;  %v479_v20 = vmul.f32 %v676_v10, %v418_v1 }
  0xca   :  { %728 = vst [vmem:[%s1564_s2 + $0x378] sm:$0xff] %v531_v7  ;;  %v535_v7 = vmax.f32 %v471_v59, 0.0  ;;  %v480_v22 = vmul.f32 %v677_v13, %v418_v1  ;;  %v481_v24 = vmul.f32 %v678_v16, %v418_v1 }
  0xcb   :  { %689 = vst [vmem:[%s1564_s2 + $0x240] sm:$0xff] %v492_v12  ;;  %v537_v12 = vmax.f32 %v473_v63, 0.0  ;;  %v542_v27 = vmax.f32 %v478_v17, 0.0 }
  0xcc   :  { %690 = vst [vmem:[%s1564_s2 + $0x248] sm:$0xff] %v493_v14  ;;  %v477_v14 = vmul.f32 %v674_v5, %v418_v1  ;;  %v544_v30 = vmax.f32 %v480_v22, 0.0  ;;  %v545_v31 = vmax.f32 %v481_v24, 0.0 }
  0xcd   :  { %691 = vst [vmem:[%s1564_s2 + $0x250] sm:$0xff] %v494_v18  ;;  %v539_v18 = vmax.f32 %v475_v6, 0.0 }
  0xce   :  { %692 = vst [vmem:[%s1564_s2 + $0x258] sm:$0xff] %v495_v21  ;;  %v680_v21 = vld [vmem:[%s1563_s0 + $0x3f8] sm:$0xff]  ;;  %v541_v25 = vmax.f32 %v477_v14, 0.0 }
  0xcf   :  { %693 = vst [vmem:[%s1564_s2 + $0x260] sm:$0xff] %v496_v23  ;;  %v540_v23 = vmax.f32 %v476_v11, 0.0  ;;  %v483_v28 = vmul.f32 %v680_v21, %v418_v1 }
  0xd0   :  { %694 = vst [vmem:[%s1564_s2 + $0x268] sm:$0xff] %v497_v26  ;;  %v482_v26 = vmul.f32 %v679_v19, %v418_v1 }
  0xd1   :  { %695 = vst [vmem:[%s1564_s2 + $0x270] sm:$0xff] %v498_v29  ;;  %v543_v29 = vmax.f32 %v479_v20, 0.0  ;;  %v547_v33 = vmax.f32 %v483_v28, 0.0 }
  0xd2   :  { %696 = vst [vmem:[%s1564_s2 + $0x278] sm:$0xff] %v499_v32  ;;  %v546_v32 = vmax.f32 %v482_v26, 0.0 }
  0xd3   :  { %713 = vst [vmem:[%s1564_s2 + $0x300] sm:$0xff] %v516_v37 }
  0xd4   :  { %714 = vst [vmem:[%s1564_s2 + $0x308] sm:$0xff] %v517_v39 }
  0xd5   :  { %715 = vst [vmem:[%s1564_s2 + $0x310] sm:$0xff] %v518_v43 }
  0xd6   :  { %716 = vst [vmem:[%s1564_s2 + $0x318] sm:$0xff] %v519_v46 }
  0xd7   :  { %717 = vst [vmem:[%s1564_s2 + $0x320] sm:$0xff] %v520_v48 }
  0xd8   :  { %718 = vst [vmem:[%s1564_s2 + $0x328] sm:$0xff] %v521_v51 }
  0xd9   :  { %719 = vst [vmem:[%s1564_s2 + $0x330] sm:$0xff] %v522_v54 }
  0xda   :  { %720 = vst [vmem:[%s1564_s2 + $0x338] sm:$0xff] %v523_v57 }
  0xdb   :  { %729 = vst [vmem:[%s1564_s2 + $0x380] sm:$0xff] %v532_v62 }
  0xdc   :  { %730 = vst [vmem:[%s1564_s2 + $0x388] sm:$0xff] %v533_v0 }
  0xdd   :  { %731 = vst [vmem:[%s1564_s2 + $0x390] sm:$0xff] %v534_v4 }
  0xde   :  { %732 = vst [vmem:[%s1564_s2 + $0x398] sm:$0xff] %v535_v7 }
  0xdf   :  { %733 = vst [vmem:[%s1564_s2 + $0x3a0] sm:$0xff] %v536_v9 }
  0xe0   :  { %734 = vst [vmem:[%s1564_s2 + $0x3a8] sm:$0xff] %v537_v12 }
  0xe1   :  { %735 = vst [vmem:[%s1564_s2 + $0x3b0] sm:$0xff] %v538_v15 }
  0xe2   :  { %736 = vst [vmem:[%s1564_s2 + $0x3b8] sm:$0xff] %v539_v18 }
  0xe3   :  { %737 = vst [vmem:[%s1564_s2 + $0x3c0] sm:$0xff] %v540_v23 }
  0xe4   :  { %738 = vst [vmem:[%s1564_s2 + $0x3c8] sm:$0xff] %v541_v25 }
  0xe5   :  { %739 = vst [vmem:[%s1564_s2 + $0x3d0] sm:$0xff] %v542_v27 }
  0xe6   :  { %740 = vst [vmem:[%s1564_s2 + $0x3d8] sm:$0xff] %v543_v29 }
  0xe7   :  { %741 = vst [vmem:[%s1564_s2 + $0x3e0] sm:$0xff] %v544_v30 }
  0xe8   :  { %742 = vst [vmem:[%s1564_s2 + $0x3e8] sm:$0xff] %v545_v31 }
  0xe9   :  { %743 = vst [vmem:[%s1564_s2 + $0x3f0] sm:$0xff] %v546_v32 }
  0xea   :  { %744 = vst [vmem:[%s1564_s2 + $0x3f8] sm:$0xff] %v547_v33 }

// kernel: enc_module_forward.2
= control target key start
LH: loop header
LB: loop body
LE: loop exit
PB: predicated region body
PF: predicated region fallthrough
CT: control target
= control target key end

     0   :  { %s6603_s0 = inlined_call_operand.vmem [shape: f32[2,64,1024], index: 0, kind: input, shape index: {}]   ;;  %s6604_s1 = inlined_call_operand.vmem [shape: bf16[64,64], index: 1, kind: input, shape index: {}]   ;;  %s6605_s2 = inlined_call_operand.vmem [shape: f32[64,1], index: 2, kind: input, shape index: {}]   ;;  %s6606_s3 = inlined_call_operand.vmem [shape: f32[64,1], index: 3, kind: input, shape index: {}]   ;;  %s6607_s4 = inlined_call_operand.vmem [shape: f32[32,64], index: 4, kind: input, shape index: {}]   ;;  %s6608_s5 = inlined_call_operand.vmem [shape: bf16[32,64], index: 5, kind: input, shape index: {}]   ;;  %s6609_s6 = inlined_call_operand.vmem [shape: f32[32,1], index: 6, kind: input, shape index: {}]   ;;  %s6610_s7 = inlined_call_operand.vmem [shape: f32[32,1], index: 7, kind: input, shape index: {}]   ;;  %s6611_s8 = inlined_call_operand.vmem [shape: f32[32,1], index: 8, kind: input, shape index: {}]   ;;  %s6612_s9 = inlined_call_operand.vmem [shape: f32[32,1], index: 9, kind: input, shape index: {}]   ;;  %s6613_s10 = inlined_call_operand.vmem [shape: f32[64,64], index: 10, kind: input, shape index: {}]   ;;  %s6614_s11 = inlined_call_operand.vmem [shape: f32[64,1], index: 11, kind: input, shape index: {}]   ;;  %s6615_s12 = inlined_call_operand.vmem [shape: f32[8,64], index: 12, kind: input, shape index: {}]   ;;  %s6616_s13 = inlined_call_operand.vmem [shape: f32[1,8], index: 13, kind: input, shape index: {}]   ;;  %s6617_s14 = inlined_call_operand.vmem [shape: f32[64,2], index: 14, kind: output, shape index: {0}]   ;;  %s6618_s15 = inlined_call_operand.hbm [shape: f32[2,8], index: 15, kind: output, shape index: {1}]  }
   0x1   :  { %6649 = sst [smem:[#allocation33_spill]] %s6607_s4 }
   0x2   :  { %6650 = sst [smem:[#allocation34_spill]] %s6613_s10 }
   0x3   :  { %6651 = sst [smem:[#allocation35_spill]] %s6614_s11 }
   0x4   :  { %6652 = sst [smem:[#allocation36_spill]] %s6615_s12 }
   0x5   :  { %6653 = sst [smem:[#allocation37_spill]] %s6616_s13 }
   0x6   :  { %6654 = sst [smem:[#allocation38_spill]] %s6617_s14 }
   0x7   :  { %6655 = sst [smem:[#allocation39_spill]] %s6618_s15 }
   0x8   :  { %21 = vsyncpa [#allocation9], 0  ;;  %s4564_s18 = smov 0   ;;  %s4566_s19 = smov 0  }
   0x9   :  { %s4568_s20 = smov 0   ;;  %s4570_s21 = smov 0  }
   0xa   :  { %s4572_s22 = smov 0   ;;  %s4574_s23 = smov 0  }
   0xb   :  { %s4576_s24 = smov 0  }
   0xc LB: > { %6656 = sst [smem:[#allocation11_spill]] %s4470_s22  ;;  %s36_s26 = sadd.s32 1, %s4470_s22  ;;  %s4478_s24 = sphi %s4576_s24, %s27_s24   ;;  %s4474_s23 = sphi %s4574_s23, %s6753_s23   ;;  %s4470_s22 = sphi %s4572_s22, %s6752_s22   ;;  %s4466_s21 = sphi %s4570_s21, %s6751_s21   ;;  %s4462_s20 = sphi %s4568_s20, %s6748_s20   ;;  %s4458_s19 = sphi %s4566_s19, %s6750_s19   ;;  %s4454_s18 = sphi %s4564_s18, %s6749_s18  }
   0xd   : > { %p37_p0 = scmp.ge.s32.totalorder %s36_s26, 2  ;;  %s39_s27 = sadd.s32 1, %s4474_s23 }
   0xe   : > { %s43_s28 = ssub.s32 1, %s4474_s23  ;;  %p59_p1 = scmp.ne.s32.totalorder %s4458_s19, %s4454_s18 }
   0xf   : > { %s6755_s26 = smov (%p37_p0, %s36_s26), 0  ;;  %s6757_s27 = smov (!%p37_p0, %s39_s27), %s4474_s23 }
  0x10   : > { %p41_p2 = scmp.ge.s32.totalorder %s6757_s27, 2  ;;  %p60_p3 = scmp.eq.s32.totalorder %s4478_s24, 0 }
  0x11   : > { %s44_s29 = smul.u32 %s4470_s22, %s43_s28  ;;  %s52_s14 = sadd.s32 1, %s4458_s19 }
  0x12   : > { %s6759_s27 = smov (%p41_p2, %s6757_s27), 0  ;;  %p61_p4 = por %p60_p3, %p59_p1 }
  0x13   : > { %s46_s30 = ssub.s32 1, %s6759_s27  ;;  %s45_s16 = sadd.s32 %s4474_s23, %s44_s29 }
  0x14   : > { %s47_s17 = smul.u32 %s46_s30, %s6755_s26  ;;  %p3939_p6 = scmp.ge.s32.totalorder %s4478_s24, 4 }
  0x16   : > { %s48_s25 = sadd.s32 %s47_s17, %s6759_s27  ;;  %439 = sbr.rel (%p3939_p6) target bundleno = 95 (0x5f), region = 68 }
  0x17   : > { %s49_s15 = ssub.s32 %s45_s16, %s48_s25 }
  0x18   : > { %p50_p5 = scmp.eq.s32.totalorder %s49_s15, 0 }
  0x1a   : > { %s4618_s13 = scalar_select %p50_p5, %s4458_s19, %s52_s14  }
  0x1b   : > { %442 = sbr.rel (!%p61_p4) target bundleno = 95 (0x5f), region = 72  ;;  %s444_s28 = sand.u32 (%p61_p4), 1, %s4458_s19  }
  0x1c   : > { %s4168_s22 = sshll.u32 (%p61_p4), %s45_s16, 5  ;;  %s3940_s10 = sshll.u32 (%p61_p4), %s444_s28, 9 }
  0x1d   : > { %s4625_s4 = scalar_lea.vmem (%p61_p4), %s6603_s0, %s4168_s22  ;;  %s4630_s14 = scalar_lea.vmem (%p61_p4), [#allocation7], %s3940_s10 }
  0x1e   : > { %v465_v0 = vld [vmem:[%s4625_s4] sm:$0xff] (%p61_p4)  ;;  %v467_v1 = vld [vmem:[%s4625_s4 + $0x8] sm:$0xff] (%p61_p4)  ;;  %v469_v2 = vld [vmem:[%s4625_s4 + $0x10] sm:$0xff] (%p61_p4) }
  0x1f   : > { %466 = vst [vmem:[%s4630_s14] sm:$0xff] (%p61_p4), %v465_v0  ;;  %v471_v3 = vld [vmem:[%s4625_s4 + $0x18] sm:$0xff] (%p61_p4)  ;;  %v473_v4 = vld [vmem:[%s4625_s4 + $0x40] sm:$0xff] (%p61_p4)  ;;  %v475_v5 = vld [vmem:[%s4625_s4 + $0x48] sm:$0xff] (%p61_p4) }
  0x20   : > { %468 = vst [vmem:[%s4630_s14 + $0x8] sm:$0xff] %v467_v1  ;;  %v477_v6 = vld [vmem:[%s4625_s4 + $0x50] sm:$0xff]  ;;  %v479_v7 = vld [vmem:[%s4625_s4 + $0x58] sm:$0xff]  ;;  %v481_v8 = vld [vmem:[%s4625_s4 + $0x80] sm:$0xff] }
  0x21   : > { %470 = vst [vmem:[%s4630_s14 + $0x10] sm:$0xff] %v469_v2  ;;  %v483_v9 = vld [vmem:[%s4625_s4 + $0x88] sm:$0xff]  ;;  %v485_v10 = vld [vmem:[%s4625_s4 + $0x90] sm:$0xff]  ;;  %v487_v11 = vld [vmem:[%s4625_s4 + $0x98] sm:$0xff] }
  0x22   : > { %472 = vst [vmem:[%s4630_s14 + $0x18] sm:$0xff] %v471_v3  ;;  %v489_v12 = vld [vmem:[%s4625_s4 + $0xc0] sm:$0xff]  ;;  %v491_v13 = vld [vmem:[%s4625_s4 + $0xc8] sm:$0xff]  ;;  %v493_v14 = vld [vmem:[%s4625_s4 + $0xd0] sm:$0xff] }
  0x23   : > { %474 = vst [vmem:[%s4630_s14 + $0x20] sm:$0xff] %v473_v4  ;;  %v495_v15 = vld [vmem:[%s4625_s4 + $0xd8] sm:$0xff]  ;;  %v497_v16 = vld [vmem:[%s4625_s4 + $0x100] sm:$0xff]  ;;  %v499_v17 = vld [vmem:[%s4625_s4 + $0x108] sm:$0xff] }
  0x24   : > { %476 = vst [vmem:[%s4630_s14 + $0x28] sm:$0xff] %v475_v5  ;;  %v501_v18 = vld [vmem:[%s4625_s4 + $0x110] sm:$0xff]  ;;  %v503_v19 = vld [vmem:[%s4625_s4 + $0x118] sm:$0xff]  ;;  %v505_v20 = vld [vmem:[%s4625_s4 + $0x140] sm:$0xff] }
  0x25   : > { %478 = vst [vmem:[%s4630_s14 + $0x30] sm:$0xff] %v477_v6  ;;  %v507_v21 = vld [vmem:[%s4625_s4 + $0x148] sm:$0xff]  ;;  %v509_v22 = vld [vmem:[%s4625_s4 + $0x150] sm:$0xff]  ;;  %v511_v23 = vld [vmem:[%s4625_s4 + $0x158] sm:$0xff] }
  0x26   : > { %480 = vst [vmem:[%s4630_s14 + $0x38] sm:$0xff] %v479_v7  ;;  %v513_v24 = vld [vmem:[%s4625_s4 + $0x180] sm:$0xff]  ;;  %v515_v25 = vld [vmem:[%s4625_s4 + $0x188] sm:$0xff]  ;;  %v517_v26 = vld [vmem:[%s4625_s4 + $0x190] sm:$0xff] }
  0x27   : > { %482 = vst [vmem:[%s4630_s14 + $0x40] sm:$0xff] %v481_v8  ;;  %v519_v27 = vld [vmem:[%s4625_s4 + $0x198] sm:$0xff]  ;;  %v521_v28 = vld [vmem:[%s4625_s4 + $0x1c0] sm:$0xff]  ;;  %v523_v29 = vld [vmem:[%s4625_s4 + $0x1c8] sm:$0xff] }
  0x28   : > { %484 = vst [vmem:[%s4630_s14 + $0x48] sm:$0xff] %v483_v9  ;;  %v525_v30 = vld [vmem:[%s4625_s4 + $0x1d0] sm:$0xff]  ;;  %v527_v31 = vld [vmem:[%s4625_s4 + $0x1d8] sm:$0xff]  ;;  %v529_v32 = vld [vmem:[%s4625_s4 + $0x200] sm:$0xff] }
  0x29   : > { %486 = vst [vmem:[%s4630_s14 + $0x50] sm:$0xff] %v485_v10  ;;  %v531_v33 = vld [vmem:[%s4625_s4 + $0x208] sm:$0xff]  ;;  %v533_v34 = vld [vmem:[%s4625_s4 + $0x210] sm:$0xff]  ;;  %v535_v35 = vld [vmem:[%s4625_s4 + $0x218] sm:$0xff] }
  0x2a   : > { %488 = vst [vmem:[%s4630_s14 + $0x58] sm:$0xff] %v487_v11  ;;  %v537_v36 = vld [vmem:[%s4625_s4 + $0x240] sm:$0xff]  ;;  %v539_v37 = vld [vmem:[%s4625_s4 + $0x248] sm:$0xff]  ;;  %v541_v38 = vld [vmem:[%s4625_s4 + $0x250] sm:$0xff] }
  0x2b   : > { %490 = vst [vmem:[%s4630_s14 + $0x60] sm:$0xff] %v489_v12  ;;  %v543_v39 = vld [vmem:[%s4625_s4 + $0x258] sm:$0xff]  ;;  %v545_v40 = vld [vmem:[%s4625_s4 + $0x280] sm:$0xff]  ;;  %v547_v41 = vld [vmem:[%s4625_s4 + $0x288] sm:$0xff] }
  0x2c   : > { %492 = vst [vmem:[%s4630_s14 + $0x68] sm:$0xff] %v491_v13  ;;  %v549_v42 = vld [vmem:[%s4625_s4 + $0x290] sm:$0xff]  ;;  %v551_v43 = vld [vmem:[%s4625_s4 + $0x298] sm:$0xff]  ;;  %v553_v44 = vld [vmem:[%s4625_s4 + $0x2c0] sm:$0xff] }
  0x2d   : > { %494 = vst [vmem:[%s4630_s14 + $0x70] sm:$0xff] %v493_v14  ;;  %v555_v45 = vld [vmem:[%s4625_s4 + $0x2c8] sm:$0xff]  ;;  %v557_v46 = vld [vmem:[%s4625_s4 + $0x2d0] sm:$0xff]  ;;  %v559_v47 = vld [vmem:[%s4625_s4 + $0x2d8] sm:$0xff] }
  0x2e   : > { %496 = vst [vmem:[%s4630_s14 + $0x78] sm:$0xff] %v495_v15  ;;  %v561_v48 = vld [vmem:[%s4625_s4 + $0x300] sm:$0xff]  ;;  %v563_v49 = vld [vmem:[%s4625_s4 + $0x308] sm:$0xff]  ;;  %v565_v50 = vld [vmem:[%s4625_s4 + $0x310] sm:$0xff] }
  0x2f   : > { %498 = vst [vmem:[%s4630_s14 + $0x80] sm:$0xff] %v497_v16  ;;  %v567_v51 = vld [vmem:[%s4625_s4 + $0x318] sm:$0xff]  ;;  %v569_v52 = vld [vmem:[%s4625_s4 + $0x340] sm:$0xff]  ;;  %v571_v53 = vld [vmem:[%s4625_s4 + $0x348] sm:$0xff] }
  0x30   : > { %500 = vst [vmem:[%s4630_s14 + $0x88] sm:$0xff] %v499_v17  ;;  %v573_v54 = vld [vmem:[%s4625_s4 + $0x350] sm:$0xff]  ;;  %v575_v55 = vld [vmem:[%s4625_s4 + $0x358] sm:$0xff]  ;;  %v577_v56 = vld [vmem:[%s4625_s4 + $0x380] sm:$0xff] }
  0x31   : > { %502 = vst [vmem:[%s4630_s14 + $0x90] sm:$0xff] %v501_v18  ;;  %v579_v57 = vld [vmem:[%s4625_s4 + $0x388] sm:$0xff]  ;;  %v581_v58 = vld [vmem:[%s4625_s4 + $0x390] sm:$0xff]  ;;  %v583_v59 = vld [vmem:[%s4625_s4 + $0x398] sm:$0xff] }
  0x32   : > { %504 = vst [vmem:[%s4630_s14 + $0x98] sm:$0xff] %v503_v19  ;;  %v585_v60 = vld [vmem:[%s4625_s4 + $0x3c0] sm:$0xff]  ;;  %v587_v61 = vld [vmem:[%s4625_s4 + $0x3c8] sm:$0xff]  ;;  %v589_v62 = vld [vmem:[%s4625_s4 + $0x3d0] sm:$0xff] }
  0x33   : > { %506 = vst [vmem:[%s4630_s14 + $0xa0] sm:$0xff] %v505_v20  ;;  %v591_v63 = vld [vmem:[%s4625_s4 + $0x3d8] sm:$0xff] }
  0x34   : > { %508 = vst [vmem:[%s4630_s14 + $0xa8] sm:$0xff] %v507_v21 }
  0x35   : > { %510 = vst [vmem:[%s4630_s14 + $0xb0] sm:$0xff] %v509_v22 }
  0x36   : > { %512 = vst [vmem:[%s4630_s14 + $0xb8] sm:$0xff] %v511_v23 }
  0x37   : > { %514 = vst [vmem:[%s4630_s14 + $0xc0] sm:$0xff] %v513_v24 }
  0x38   : > { %516 = vst [vmem:[%s4630_s14 + $0xc8] sm:$0xff] %v515_v25 }
  0x39   : > { %518 = vst [vmem:[%s4630_s14 + $0xd0] sm:$0xff] %v517_v26 }
  0x3a   : > { %520 = vst [vmem:[%s4630_s14 + $0xd8] sm:$0xff] %v519_v27 }
  0x3b   : > { %522 = vst [vmem:[%s4630_s14 + $0xe0] sm:$0xff] %v521_v28 }
  0x3c   : > { %524 = vst [vmem:[%s4630_s14 + $0xe8] sm:$0xff] %v523_v29 }
  0x3d   : > { %526 = vst [vmem:[%s4630_s14 + $0xf0] sm:$0xff] %v525_v30 }
  0x3e   : > { %528 = vst [vmem:[%s4630_s14 + $0xf8] sm:$0xff] %v527_v31 }
  0x3f   : > { %530 = vst [vmem:[%s4630_s14 + $0x100] sm:$0xff] %v529_v32 }
  0x40   : > { %532 = vst [vmem:[%s4630_s14 + $0x108] sm:$0xff] %v531_v33 }
  0x41   : > { %534 = vst [vmem:[%s4630_s14 + $0x110] sm:$0xff] %v533_v34 }
  0x42   : > { %536 = vst [vmem:[%s4630_s14 + $0x118] sm:$0xff] %v535_v35 }
  0x43   : > { %538 = vst [vmem:[%s4630_s14 + $0x120] sm:$0xff] %v537_v36 }
  0x44   : > { %540 = vst [vmem:[%s4630_s14 + $0x128] sm:$0xff] %v539_v37 }
  0x45   : > { %542 = vst [vmem:[%s4630_s14 + $0x130] sm:$0xff] %v541_v38 }
  0x46   : > { %544 = vst [vmem:[%s4630_s14 + $0x138] sm:$0xff] %v543_v39 }
  0x47   : > { %546 = vst [vmem:[%s4630_s14 + $0x140] sm:$0xff] %v545_v40 }
  0x48   : > { %548 = vst [vmem:[%s4630_s14 + $0x148] sm:$0xff] %v547_v41 }
  0x49   : > { %550 = vst [vmem:[%s4630_s14 + $0x150] sm:$0xff] %v549_v42 }
  0x4a   : > { %552 = vst [vmem:[%s4630_s14 + $0x158] sm:$0xff] %v551_v43 }
  0x4b   : > { %554 = vst [vmem:[%s4630_s14 + $0x160] sm:$0xff] %v553_v44 }
  0x4c   : > { %556 = vst [vmem:[%s4630_s14 + $0x168] sm:$0xff] %v555_v45 }
  0x4d   : > { %558 = vst [vmem:[%s4630_s14 + $0x170] sm:$0xff] %v557_v46 }
  0x4e   : > { %560 = vst [vmem:[%s4630_s14 + $0x178] sm:$0xff] %v559_v47 }
  0x4f   : > { %562 = vst [vmem:[%s4630_s14 + $0x180] sm:$0xff] %v561_v48 }
  0x50   : > { %564 = vst [vmem:[%s4630_s14 + $0x188] sm:$0xff] %v563_v49 }
  0x51   : > { %566 = vst [vmem:[%s4630_s14 + $0x190] sm:$0xff] %v565_v50 }
  0x52   : > { %568 = vst [vmem:[%s4630_s14 + $0x198] sm:$0xff] %v567_v51 }
  0x53   : > { %570 = vst [vmem:[%s4630_s14 + $0x1a0] sm:$0xff] %v569_v52 }
  0x54   : > { %572 = vst [vmem:[%s4630_s14 + $0x1a8] sm:$0xff] %v571_v53 }
  0x55   : > { %574 = vst [vmem:[%s4630_s14 + $0x1b0] sm:$0xff] %v573_v54 }
  0x56   : > { %576 = vst [vmem:[%s4630_s14 + $0x1b8] sm:$0xff] %v575_v55 }
  0x57   : > { %578 = vst [vmem:[%s4630_s14 + $0x1c0] sm:$0xff] %v577_v56 }
  0x58   : > { %580 = vst [vmem:[%s4630_s14 + $0x1c8] sm:$0xff] %v579_v57 }
  0x59   : > { %582 = vst [vmem:[%s4630_s14 + $0x1d0] sm:$0xff] %v581_v58 }
  0x5a   : > { %584 = vst [vmem:[%s4630_s14 + $0x1d8] sm:$0xff] %v583_v59 }
  0x5b   : > { %586 = vst [vmem:[%s4630_s14 + $0x1e0] sm:$0xff] %v585_v60 }
  0x5c   : > { %588 = vst [vmem:[%s4630_s14 + $0x1e8] sm:$0xff] %v587_v61 }
  0x5d   : > { %590 = vst [vmem:[%s4630_s14 + $0x1f0] sm:$0xff] %v589_v62 }
  0x5e   : > { %592 = vst [vmem:[%s4630_s14 + $0x1f8] sm:$0xff] %v591_v63 }
  0x5f PF: > { %p3943_p7 = scmp.ge.s32.totalorder %s4478_s24, 1  ;;  %p597_p8 = scmp.lt.s32.totalorder %s4478_s24, 5 }
  0x61   : > { %p598_p9 = pnand %p3943_p7, %p597_p8 }
  0x62   : > { %s604_s10 = sand.u32 (!%p598_p9), 1, %s4454_s18   ;;  %s3945_s11 = sshll.u32 (!%p598_p9), %s4462_s20, 9 }
  0x63   : > { %601 = sbr.rel (%p598_p9) target bundleno = 1951 (0x79f), region = 95  ;;  %s3944_s12 = sshll.u32 (!%p598_p9), %s604_s10, 9 }
  0x64   : > { %p652_p10 = scmp.eq.s32.totalorder (!%p598_p9), %s4466_s21, 0  ;;  %p653_p11 = scmp.eq.s32.totalorder (!%p598_p9), %s4462_s20, 0 }
  0x65   : > { %s4763_s4 = scalar_lea.vmem (!%p598_p9), [#allocation7], %s3944_s12 }
  0x66   : > { %p654_p12 = pnand (!%p598_p9), %p653_p11, %p652_p10 }
  0x68   : > { %657 = sbr.rel (%p654_p12) target bundleno = 142 (0x8e), region = 103 }
  0x6d   : > { %vm658_vm0 = vcmask 7168   ;;  %v4480_v0 = vmov 0.0   ;;  %vm675_vm1 = vcmask 523264  }
  0x6e   : > { %659 = vst.msk [vmem:[#allocation2] sm:$0xff] %vm658_vm0, %v4480_v0 }
  0x6f   : > { %660 = vst.msk [vmem:[#allocation2 + $0x8] sm:$0xff] %vm658_vm0, %v4480_v0 }
  0x70   : > { %661 = vst.msk [vmem:[#allocation2 + $0x10] sm:$0xff] %vm658_vm0, %v4480_v0 }
  0x71   : > { %662 = vst.msk [vmem:[#allocation2 + $0x18] sm:$0xff] %vm658_vm0, %v4480_v0 }
  0x72   : > { %663 = vst.msk [vmem:[#allocation2 + $0x20] sm:$0xff] %vm658_vm0, %v4480_v0 }
  0x73   : > { %664 = vst.msk [vmem:[#allocation2 + $0x28] sm:$0xff] %vm658_vm0, %v4480_v0 }
  0x74   : > { %665 = vst.msk [vmem:[#allocation2 + $0x30] sm:$0xff] %vm658_vm0, %v4480_v0 }
  0x75   : > { %666 = vst.msk [vmem:[#allocation2 + $0x38] sm:$0xff] %vm658_vm0, %v4480_v0 }
  0x76   : > { %667 = vst.msk [vmem:[#allocation3] sm:$0xff] %vm658_vm0, %v4480_v0 }
  0x77   : > { %668 = vst.msk [vmem:[#allocation3 + $0x8] sm:$0xff] %vm658_vm0, %v4480_v0 }
  0x78   : > { %669 = vst.msk [vmem:[#allocation3 + $0x10] sm:$0xff] %vm658_vm0, %v4480_v0 }
  0x79   : > { %670 = vst.msk [vmem:[#allocation3 + $0x18] sm:$0xff] %vm658_vm0, %v4480_v0 }
  0x7a   : > { %671 = vst.msk [vmem:[#allocation3 + $0x20] sm:$0xff] %vm658_vm0, %v4480_v0 }
  0x7b   : > { %672 = vst.msk [vmem:[#allocation3 + $0x28] sm:$0xff] %vm658_vm0, %v4480_v0 }
  0x7c   : > { %673 = vst.msk [vmem:[#allocation3 + $0x30] sm:$0xff] %vm658_vm0, %v4480_v0 }
  0x7d   : > { %674 = vst.msk [vmem:[#allocation3 + $0x38] sm:$0xff] %vm658_vm0, %v4480_v0 }
  0x7e   : > { %684 = vst.msk [vmem:[#allocation5] sm:$0xff] %vm658_vm0, %v4480_v0 }
  0x7f   : > { %685 = vst.msk [vmem:[#allocation5 + $0x8] sm:$0xff] %vm658_vm0, %v4480_v0 }
  0x80   : > { %686 = vst.msk [vmem:[#allocation5 + $0x10] sm:$0xff] %vm658_vm0, %v4480_v0 }
  0x81   : > { %687 = vst.msk [vmem:[#allocation5 + $0x18] sm:$0xff] %vm658_vm0, %v4480_v0 }
  0x82   : > { %688 = vst.msk [vmem:[#allocation5 + $0x20] sm:$0xff] %vm658_vm0, %v4480_v0 }
  0x83   : > { %689 = vst.msk [vmem:[#allocation5 + $0x28] sm:$0xff] %vm658_vm0, %v4480_v0 }
  0x84   : > { %690 = vst.msk [vmem:[#allocation5 + $0x30] sm:$0xff] %vm658_vm0, %v4480_v0 }
  0x85   : > { %691 = vst.msk [vmem:[#allocation5 + $0x38] sm:$0xff] %vm658_vm0, %v4480_v0 }
  0x86   : > { %676 = vst.msk [vmem:[#allocation4] sm:$0xff] %vm675_vm1, %v4480_v0 }
  0x87   : > { %677 = vst.msk [vmem:[#allocation4 + $0x8] sm:$0xff] %vm675_vm1, %v4480_v0 }
  0x88   : > { %678 = vst.msk [vmem:[#allocation4 + $0x10] sm:$0xff] %vm675_vm1, %v4480_v0 }
  0x89   : > { %679 = vst.msk [vmem:[#allocation4 + $0x18] sm:$0xff] %vm675_vm1, %v4480_v0 }
  0x8a   : > { %680 = vst.msk [vmem:[#allocation4 + $0x20] sm:$0xff] %vm675_vm1, %v4480_v0 }
  0x8b   : > { %681 = vst.msk [vmem:[#allocation4 + $0x28] sm:$0xff] %vm675_vm1, %v4480_v0 }
  0x8c   : > { %682 = vst.msk [vmem:[#allocation4 + $0x30] sm:$0xff] %vm675_vm1, %v4480_v0 }
  0x8d   : > { %683 = vst.msk [vmem:[#allocation4 + $0x38] sm:$0xff] %vm675_vm1, %v4480_v0 }
  0x8e PF: > { %p3946_p13 = scmp.ne.s32.totalorder %s4466_s21, 0 }
  0x8f   : > { %s1028_s25 = sshra.s32 (!%p3946_p13), %s3945_s11, 7 }
  0x90   : > { %694 = sbr.rel (%p3946_p13) target bundleno = 554 (0x22a), region = 107  ;;  %s3979_s29 = sshll.u32 (!%p3946_p13), %s1028_s25, 3 }
  0x91   : > { %s4912_s30 = scalar_lea.vmem (!%p3946_p13), [#allocation6], %s3979_s29 }
  0x95   : > { %v727_v1 = vld [vmem:[%s4763_s4 + $0xc0] sm:$0xff]  ;;  %v728_v3 = vld [vmem:[%s4763_s4 + $0xc8] sm:$0xff]  ;;  %v729_v6 = vld [vmem:[%s4763_s4 + $0xd0] sm:$0xff]  ;;  %vm771_vm2 = vcmask 523264   ;;  %vm1448_vm3 = vcmask 7168  }
  0x96   : > { %v731_v2 = vld [vmem:[%s4763_s4 + $0xe0] sm:$0xff]  ;;  %v732_v5 = vld [vmem:[%s4763_s4 + $0xe8] sm:$0xff]  ;;  %v733_v7 = vld [vmem:[%s4763_s4 + $0xf0] sm:$0xff] }
  0x97   : > { %v747_v4 = vpack.c.bf16 %v731_v2, %v727_v1  ;;  %v748_v8 = vpack.c.bf16 %v732_v5, %v728_v3  ;;  %v749_v9 = vpack.c.bf16 %v733_v7, %v729_v6  ;;  %v730_v10 = vld [vmem:[%s4763_s4 + $0xd8] sm:$0xff]  ;;  %v719_v12 = vld [vmem:[%s4763_s4 + $0x80] sm:$0xff]  ;;  %v720_v15 = vld [vmem:[%s4763_s4 + $0x88] sm:$0xff] }
  0x98   : > { %v734_v11 = vld [vmem:[%s4763_s4 + $0xf8] sm:$0xff]  ;;  %v723_v14 = vld [vmem:[%s4763_s4 + $0xa0] sm:$0xff]  ;;  %v724_v16 = vld [vmem:[%s4763_s4 + $0xa8] sm:$0xff] }
  0x99   : > { %788 = vmatpush.bf16.msra.mxu0 %v747_v4  ;;  %v750_v13 = vpack.c.bf16 %v734_v11, %v730_v10  ;;  %817 = vmatpush.bf16.msra.mxu1 %v748_v8  ;;  %v743_v17 = vpack.c.bf16 %v723_v14, %v719_v12  ;;  %v744_v18 = vpack.c.bf16 %v724_v16, %v720_v15  ;;  %v721_v19 = vld [vmem:[%s4763_s4 + $0x90] sm:$0xff]  ;;  %v722_v21 = vld [vmem:[%s4763_s4 + $0x98] sm:$0xff]  ;;  %v711_v24 = vld [vmem:[%s4763_s4 + $0x40] sm:$0xff] }
  0x9a   : > { %846 = vmatpush.bf16.msra.mxu2 %v749_v9  ;;  %v725_v20 = vld [vmem:[%s4763_s4 + $0xb0] sm:$0xff]  ;;  %v726_v23 = vld [vmem:[%s4763_s4 + $0xb8] sm:$0xff]  ;;  %v715_v25 = vld [vmem:[%s4763_s4 + $0x60] sm:$0xff] }
  0x9b   : > { %875 = vmatpush.bf16.msra.mxu3 %v750_v13  ;;  %v745_v22 = vpack.c.bf16 %v725_v20, %v721_v19  ;;  %v746_v26 = vpack.c.bf16 %v726_v23, %v722_v21  ;;  %v712_v27 = vld [vmem:[%s4763_s4 + $0x48] sm:$0xff]  ;;  %v713_v29 = vld [vmem:[%s4763_s4 + $0x50] sm:$0xff]  ;;  %v739_v30 = vpack.c.bf16 %v715_v25, %v711_v24  ;;  %v714_v32 = vld [vmem:[%s4763_s4 + $0x58] sm:$0xff] }
  0x9c   : > { %v716_v28 = vld [vmem:[%s4763_s4 + $0x68] sm:$0xff]  ;;  %v717_v31 = vld [vmem:[%s4763_s4 + $0x70] sm:$0xff]  ;;  %v718_v33 = vld [vmem:[%s4763_s4 + $0x78] sm:$0xff] }
  0x9d   : > { %789 = vmatpush.bf16.msra.mxu0 %v743_v17  ;;  %818 = vmatpush.bf16.msra.mxu1 %v744_v18  ;;  %v740_v34 = vpack.c.bf16 %v716_v28, %v712_v27  ;;  %v741_v35 = vpack.c.bf16 %v717_v31, %v713_v29  ;;  %v703_v36 = vld [vmem:[%s4763_s4] sm:$0xff]  ;;  %v704_v38 = vld [vmem:[%s4763_s4 + $0x8] sm:$0xff]  ;;  %v742_v39 = vpack.c.bf16 %v718_v33, %v714_v32  ;;  %v705_v41 = vld [vmem:[%s4763_s4 + $0x10] sm:$0xff] }
  0x9e   : > { %847 = vmatpush.bf16.msra.mxu2 %v745_v22  ;;  %v707_v37 = vld [vmem:[%s4763_s4 + $0x20] sm:$0xff]  ;;  %v708_v40 = vld [vmem:[%s4763_s4 + $0x28] sm:$0xff]  ;;  %v709_v42 = vld [vmem:[%s4763_s4 + $0x30] sm:$0xff] }
  0x9f   : > { %876 = vmatpush.bf16.msra.mxu3 %v746_v26  ;;  %v706_v43 = vld [vmem:[%s4763_s4 + $0x18] sm:$0xff]  ;;  %v735_v45 = vpack.c.bf16 %v707_v37, %v703_v36  ;;  %v4006_v46 = vld [vmem:[%s4763_s4 + $0x1d0] sm:$0xff]  ;;  %v736_v49 = vpack.c.bf16 %v708_v40, %v704_v38  ;;  %v737_v50 = vpack.c.bf16 %v709_v42, %v705_v41  ;;  %v4169_v51 = vld [vmem:[%s6604_s1] sm:$0xff] }
  0xa0   : > { %v710_v44 = vld [vmem:[%s4763_s4 + $0x38] sm:$0xff]  ;;  %v4010_v47 = vld [vmem:[%s4763_s4 + $0x1f0] sm:$0xff]  ;;  %v4004_v55 = vld [vmem:[%s4763_s4 + $0x1c0] sm:$0xff] }
  0xa1   : > { %790 = vmatpush.bf16.msra.mxu0 %v739_v30  ;;  %v4007_v48 = vld [vmem:[%s4763_s4 + $0x1d8] sm:$0xff]  ;;  %819 = vmatpush.bf16.msra.mxu1 %v740_v34  ;;  %v738_v53 = vpack.c.bf16 %v710_v44, %v706_v43  ;;  %v1119_v54 = vpack.c.bf16 %v4010_v47, %v4006_v46  ;;  %v4008_v56 = vld [vmem:[%s4763_s4 + $0x1e0] sm:$0xff]  ;;  %v4005_v57 = vld [vmem:[%s4763_s4 + $0x1c8] sm:$0xff] }
  0xa2   : > { %848 = vmatpush.bf16.msra.mxu2 %v741_v35  ;;  %v4011_v52 = vld [vmem:[%s4763_s4 + $0x1f8] sm:$0xff]  ;;  %v4009_v59 = vld [vmem:[%s4763_s4 + $0x1e8] sm:$0xff]  ;;  %v3998_v60 = vld [vmem:[%s4763_s4 + $0x190] sm:$0xff]  ;;  %v1117_v0 = vpack.c.bf16 %v4008_v56, %v4004_v55 }
  0xa3   : > { %877 = vmatpush.bf16.msra.mxu3 %v742_v39  ;;  %v1120_v58 = vpack.c.bf16 %v4011_v52, %v4007_v48  ;;  %v4002_v61 = vld [vmem:[%s4763_s4 + $0x1b0] sm:$0xff]  ;;  %v3999_v62 = vld [vmem:[%s4763_s4 + $0x198] sm:$0xff]  ;;  %v1118_v1 = vpack.c.bf16 %v4009_v59, %v4005_v57  ;;  %v3996_v3 = vld [vmem:[%s4763_s4 + $0x180] sm:$0xff] }
  0xa4   : > { %v4003_v63 = vld [vmem:[%s4763_s4 + $0x1b8] sm:$0xff]  ;;  %v1115_v2 = vpack.c.bf16 %v4002_v61, %v3998_v60  ;;  %v4000_v4 = vld [vmem:[%s4763_s4 + $0x1a0] sm:$0xff]  ;;  %v3997_v6 = vld [vmem:[%s4763_s4 + $0x188] sm:$0xff] }
  0xa5   : > { %791 = vmatpush.bf16.msra.mxu0 %v735_v45  ;;  %820 = vmatpush.bf16.msra.mxu1 %v736_v49  ;;  %v1116_v5 = vpack.c.bf16 %v4003_v63, %v3999_v62  ;;  %v4001_v7 = vld [vmem:[%s4763_s4 + $0x1a8] sm:$0xff]  ;;  %v1113_v8 = vpack.c.bf16 %v4000_v4, %v3996_v3  ;;  %v3990_v9 = vld [vmem:[%s4763_s4 + $0x150] sm:$0xff]  ;;  %v3991_v11 = vld [vmem:[%s4763_s4 + $0x158] sm:$0xff] }
  0xa6   : > { %849 = vmatpush.bf16.msra.mxu2 %v737_v50  ;;  %v3994_v10 = vld [vmem:[%s4763_s4 + $0x170] sm:$0xff]  ;;  %v1114_v12 = vpack.c.bf16 %v4001_v7, %v3997_v6  ;;  %v3995_v14 = vld [vmem:[%s4763_s4 + $0x178] sm:$0xff]  ;;  %v3988_v15 = vld [vmem:[%s4763_s4 + $0x140] sm:$0xff] }
  0xa7   : > { %878 = vmatpush.bf16.msra.mxu3 %v738_v53  ;;  %v1111_v13 = vpack.c.bf16 %v3994_v10, %v3990_v9  ;;  %v3992_v16 = vld [vmem:[%s4763_s4 + $0x160] sm:$0xff]  ;;  %v1112_v17 = vpack.c.bf16 %v3995_v14, %v3991_v11  ;;  %v3989_v18 = vld [vmem:[%s4763_s4 + $0x148] sm:$0xff]  ;;  %v3982_v23 = vld [vmem:[%s4763_s4 + $0x110] sm:$0xff] }
  0xa8   : > { %3963 = vmatmul.msk.bf16.vlgmr.msra.gmra.mxu0 %vm771_vm2, %v4169_v51  ;;  %3967 = vmatmul.msk.bf16.vlgmr.msra.gmra.mxu1 %vm771_vm2, %v4169_v51  ;;  %v3993_v19 = vld [vmem:[%s4763_s4 + $0x168] sm:$0xff]  ;;  %v1109_v20 = vpack.c.bf16 %v3992_v16, %v3988_v15  ;;  %v3986_v24 = vld [vmem:[%s4763_s4 + $0x130] sm:$0xff]  ;;  %v3983_v25 = vld [vmem:[%s4763_s4 + $0x118] sm:$0xff] }
  0xa9   : > { %3971 = vmatmul.msk.bf16.vlgmr.msra.gmra.mxu2 %vm771_vm2, %v4169_v51  ;;  %1157 = vmatpush.bf16.msrb.mxu0 %v1117_v0  ;;  %v1110_v21 = vpack.c.bf16 %v3993_v19, %v3989_v18  ;;  %v4170_v22 = vld [vmem:[%s6604_s1 + $0x8] sm:$0xff]  ;;  %v1107_v26 = vpack.c.bf16 %v3986_v24, %v3982_v23  ;;  %v3987_v27 = vld [vmem:[%s4763_s4 + $0x138] sm:$0xff]  ;;  %v3980_v28 = vld [vmem:[%s4763_s4 + $0x100] sm:$0xff] }
  0xaa   : > { %1215 = vmatpush.bf16.msrb.mxu2 %v1119_v54  ;;  %3975 = vmatmul.msk.bf16.vlgmr.msra.gmra.mxu3 %vm771_vm2, %v4169_v51  ;;  %v3984_v29 = vld [vmem:[%s4763_s4 + $0x120] sm:$0xff]  ;;  %v1108_v30 = vpack.c.bf16 %v3987_v27, %v3983_v25  ;;  %v3981_v32 = vld [vmem:[%s4763_s4 + $0x108] sm:$0xff]  ;;  %v4171_v35 = vld [vmem:[%s6604_s1 + $0x10] sm:$0xff] }
  0xab   : > { %1244 = vmatpush.bf16.msrb.mxu3 %v1120_v58  ;;  %1186 = vmatpush.bf16.msrb.mxu1 %v1118_v1  ;;  %v1105_v31 = vpack.c.bf16 %v3984_v29, %v3980_v28  ;;  %v3985_v33 = vld [vmem:[%s4763_s4 + $0x128] sm:$0xff]  ;;  %v4172_v36 = vld [vmem:[%s6604_s1 + $0x18] sm:$0xff]  ;;  %v4173_v37 = vld [vmem:[%s6604_s1] sm:$0xff] }
  0xac   : > { %v1106_v34 = vpack.c.bf16 %v3985_v33, %v3981_v32  ;;  %v4174_v38 = vld [vmem:[%s6604_s1 + $0x8] sm:$0xff]  ;;  %v4175_v39 = vld [vmem:[%s6604_s1 + $0x10] sm:$0xff]  ;;  %v4176_v40 = vld [vmem:[%s6604_s1 + $0x18] sm:$0xff] }
  0xad   : > { %1158 = vmatpush.bf16.msrb.mxu0 %v1113_v8 }
  0xae   : > { %1216 = vmatpush.bf16.msrb.mxu2 %v1115_v2 }
  0xaf   : > { %1245 = vmatpush.bf16.msrb.mxu3 %v1116_v5  ;;  %1187 = vmatpush.bf16.msrb.mxu1 %v1114_v12 }
  0xb1   : > { %1159 = vmatpush.bf16.msrb.mxu0 %v1109_v20 }
  0xb2   : > { %1217 = vmatpush.bf16.msrb.mxu2 %v1111_v13 }
  0xb3   : > { %1246 = vmatpush.bf16.msrb.mxu3 %v1112_v17  ;;  %1188 = vmatpush.bf16.msrb.mxu1 %v1110_v21 }
  0xb5   : > { %1160 = vmatpush.bf16.msrb.mxu0 %v1105_v31 }
  0xb6   : > { %1218 = vmatpush.bf16.msrb.mxu2 %v1107_v26 }
  0xb7   : > { %1247 = vmatpush.bf16.msrb.mxu3 %v1108_v30  ;;  %1189 = vmatpush.bf16.msrb.mxu1 %v1106_v34 }
  0xb8   : > { %3964 = vmatmul.msk.bf16.gmra.mxu0 %vm771_vm2, %v4170_v22  ;;  %3968 = vmatmul.msk.bf16.gmra.mxu1 %vm771_vm2, %v4170_v22 }
  0xb9   : > { %3972 = vmatmul.msk.bf16.gmra.mxu2 %vm771_vm2, %v4170_v22 }
  0xba   : > { %3976 = vmatmul.msk.bf16.gmra.mxu3 %vm771_vm2, %v4170_v22 }
  0xc8   : > { %3965 = vmatmul.msk.bf16.gmra.mxu0 %vm771_vm2, %v4171_v35  ;;  %3969 = vmatmul.msk.bf16.gmra.mxu1 %vm771_vm2, %v4171_v35 }
  0xc9   : > { %3973 = vmatmul.msk.bf16.gmra.mxu2 %vm771_vm2, %v4171_v35 }
  0xca   : > { %3977 = vmatmul.msk.bf16.gmra.mxu3 %vm771_vm2, %v4171_v35 }
  0xd8   : > { %3966 = vmatmul.msk.bf16.gmra.mxu0 %vm771_vm2, %v4172_v36  ;;  %3970 = vmatmul.msk.bf16.gmra.mxu1 %vm771_vm2, %v4172_v36 }
  0xd9   : > { %3974 = vmatmul.msk.bf16.gmra.mxu2 %vm771_vm2, %v4172_v36 }
  0xda   : > { %3978 = vmatmul.msk.bf16.gmra.mxu3 %vm771_vm2, %v4172_v36 }
  0xe8   : > { %4028 = vmatmul.msk.bf16.vlgmr.msrb.gmra.mxu0 %vm771_vm2, %v4173_v37  ;;  %4032 = vmatmul.msk.bf16.vlgmr.msrb.gmra.mxu1 %vm771_vm2, %v4173_v37 }
  0xe9   : > { %4036 = vmatmul.msk.bf16.vlgmr.msrb.gmra.mxu2 %vm771_vm2, %v4173_v37 }
  0xea   : > { %4040 = vmatmul.msk.bf16.vlgmr.msrb.gmra.mxu3 %vm771_vm2, %v4173_v37 }
  0xf8   : > { %4029 = vmatmul.msk.bf16.gmra.mxu0 %vm771_vm2, %v4174_v38  ;;  %4033 = vmatmul.msk.bf16.gmra.mxu1 %vm771_vm2, %v4174_v38 }
  0xf9   : > { %4037 = vmatmul.msk.bf16.gmra.mxu2 %vm771_vm2, %v4174_v38 }
  0xfa   : > { %4041 = vmatmul.msk.bf16.gmra.mxu3 %vm771_vm2, %v4174_v38 }
 0x108   : > { %4030 = vmatmul.msk.bf16.gmra.mxu0 %vm771_vm2, %v4175_v39  ;;  %4034 = vmatmul.msk.bf16.gmra.mxu1 %vm771_vm2, %v4175_v39 }
 0x109   : > { %4038 = vmatmul.msk.bf16.gmra.mxu2 %vm771_vm2, %v4175_v39 }
 0x10a   : > { %4042 = vmatmul.msk.bf16.gmra.mxu3 %vm771_vm2, %v4175_v39 }
 0x118   : > { %4031 = vmatmul.msk.bf16.gmra.mxu0 %vm771_vm2, %v4176_v40  ;;  %4035 = vmatmul.msk.bf16.gmra.mxu1 %vm771_vm2, %v4176_v40 }
 0x119   : > { %4039 = vmatmul.msk.bf16.gmra.mxu2 %vm771_vm2, %v4176_v40 }
 0x11a   : > { %4043 = vmatmul.msk.bf16.gmra.mxu3 %vm771_vm2, %v4176_v40 }
 0x125   : > { %v793_v41 = vpop.f32.mrf.mxu0  ;;  %v822_v42 = vpop.f32.mrf.mxu1 }
 0x126   : > { %1032 = vst [vmem:[%s4912_s30] sm:$0xff] %v793_v41  ;;  %v948_v43 = vmul.f32 %v793_v41, %v793_v41  ;;  %v949_v44 = vmul.f32 %v822_v42, %v822_v42  ;;  %v900_v45 = vadd.f32 %v822_v42, %v793_v41 }
 0x127   : > { %1033 = vst [vmem:[%s4912_s30 + $0x8] sm:$0xff] %v822_v42 }
 0x128   : > { %v980_v46 = vadd.f32 %v949_v44, %v948_v43 }
 0x12c   : > { %v851_v47 = vpop.f32.mrf.mxu2 }
 0x12d   : > { %v950_v48 = vmul.f32 %v851_v47, %v851_v47  ;;  %1034 = vst [vmem:[%s4912_s30 + $0x10] sm:$0xff] %v851_v47  ;;  %v880_v49 = vpop.f32.mrf.mxu3  ;;  %v795_v50 = vpop.f32.mrf.mxu0  ;;  %v901_v51 = vadd.f32 %v900_v45, %v851_v47 }
 0x12e   : > { %1035 = vst [vmem:[%s4912_s30 + $0x18] sm:$0xff] %v880_v49  ;;  %v824_v52 = vpop.f32.mrf.mxu1  ;;  %v951_v53 = vmul.f32 %v880_v49, %v880_v49  ;;  %v952_v59 = vmul.f32 %v795_v50, %v795_v50 }
 0x12f   : > { %1036 = vst [vmem:[%s4912_s30 + $0x40] sm:$0xff] %v795_v50  ;;  %v902_v54 = vadd.f32 %v901_v51, %v880_v49  ;;  %v981_v55 = vadd.f32 %v980_v46, %v950_v48  ;;  %v905_v57 = vadd.f32 %v824_v52, %v795_v50  ;;  %v953_v60 = vmul.f32 %v824_v52, %v824_v52 }
 0x130   : > { %1037 = vst [vmem:[%s4912_s30 + $0x48] sm:$0xff] %v824_v52 }
 0x131   : > { %903 = vadd.xlane.f32.xlu0 %v902_v54  ;;  %v982_v56 = vadd.f32 %v981_v55, %v951_v53  ;;  %v985_v4 = vadd.f32 %v953_v60, %v952_v59 }
 0x133   : > { %983 = vadd.xlane.f32.xlu2 %v982_v56 }
 0x134   : > { %v853_v58 = vpop.f32.mrf.mxu2 }
 0x135   : > { %1038 = vst [vmem:[%s4912_s30 + $0x50] sm:$0xff] %v853_v58  ;;  %v882_v61 = vpop.f32.mrf.mxu3  ;;  %v798_v62 = vpop.f32.mrf.mxu0  ;;  %v906_v63 = vadd.f32 %v905_v57, %v853_v58  ;;  %v954_v1 = vmul.f32 %v853_v58, %v853_v58 }
 0x136   : > { %1039 = vst [vmem:[%s4912_s30 + $0x58] sm:$0xff] %v882_v61  ;;  %v827_v0 = vpop.f32.mrf.mxu1  ;;  %v956_v5 = vmul.f32 %v798_v62, %v798_v62  ;;  %v955_v11 = vmul.f32 %v882_v61, %v882_v61 }
 0x137   : > { %1040 = vst [vmem:[%s4912_s30 + $0x80] sm:$0xff] %v798_v62  ;;  %v907_v2 = vadd.f32 %v906_v63, %v882_v61  ;;  %v910_v3 = vadd.f32 %v827_v0, %v798_v62  ;;  %v957_v6 = vmul.f32 %v827_v0, %v827_v0  ;;  %v986_v7 = vadd.f32 %v985_v4, %v954_v1 }
 0x138   : > { %1041 = vst [vmem:[%s4912_s30 + $0x88] sm:$0xff] %v827_v0 }
 0x139   : > { %908 = vadd.xlane.f32.xlu0 %v907_v2  ;;  %v990_v15 = vadd.f32 %v957_v6, %v956_v5  ;;  %v987_v16 = vadd.f32 %v986_v7, %v955_v11 }
 0x13c   : > { %v856_v8 = vpop.f32.mrf.mxu2 }
 0x13d   : > { %1042 = vst [vmem:[%s4912_s30 + $0x90] sm:$0xff] %v856_v8  ;;  %v885_v9 = vpop.f32.mrf.mxu3  ;;  %v800_v10 = vpop.f32.mrf.mxu0  ;;  %v911_v12 = vadd.f32 %v910_v3, %v856_v8  ;;  %v958_v13 = vmul.f32 %v856_v8, %v856_v8 }
 0x13e   : > { %1043 = vst [vmem:[%s4912_s30 + $0x98] sm:$0xff] %v885_v9  ;;  %v829_v14 = vpop.f32.mrf.mxu1  ;;  %v960_v18 = vmul.f32 %v800_v10, %v800_v10  ;;  %v959_v20 = vmul.f32 %v885_v9, %v885_v9 }
 0x13f   : > { %1044 = vst [vmem:[%s4912_s30 + $0xc0] sm:$0xff] %v800_v10  ;;  %v912_v17 = vadd.f32 %v911_v12, %v885_v9  ;;  %v961_v19 = vmul.f32 %v829_v14, %v829_v14  ;;  %v991_v21 = vadd.f32 %v990_v15, %v958_v13  ;;  %v915_v33 = vadd.f32 %v829_v14, %v800_v10 }
 0x140   : > { %1045 = vst [vmem:[%s4912_s30 + $0xc8] sm:$0xff] %v829_v14 }
 0x141   : > { %988 = vadd.xlane.f32.xlu0 %v987_v16  ;;  %913 = vadd.xlane.f32.xlu1 %v912_v17  ;;  %v995_v26 = vadd.f32 %v961_v19, %v960_v18  ;;  %v992_v28 = vadd.f32 %v991_v21, %v959_v20 }
 0x144   : > { %v858_v22 = vpop.f32.mrf.mxu2 }
 0x145   : > { %v962_v23 = vmul.f32 %v858_v22, %v858_v22  ;;  %1046 = vst [vmem:[%s4912_s30 + $0xd0] sm:$0xff] %v858_v22  ;;  %v887_v24 = vpop.f32.mrf.mxu3  ;;  %v803_v25 = vpop.f32.mrf.mxu0  ;;  %v916_v36 = vadd.f32 %v915_v33, %v858_v22 }
 0x146   : > { %1047 = vst [vmem:[%s4912_s30 + $0xd8] sm:$0xff] %v887_v24  ;;  %v832_v27 = vpop.f32.mrf.mxu1  ;;  %v964_v29 = vmul.f32 %v803_v25, %v803_v25  ;;  %v963_v31 = vmul.f32 %v887_v24, %v887_v24 }
 0x147   : > { %1048 = vst [vmem:[%s4912_s30 + $0x100] sm:$0xff] %v803_v25  ;;  %v965_v30 = vmul.f32 %v832_v27, %v832_v27  ;;  %v996_v32 = vadd.f32 %v995_v26, %v962_v23  ;;  %v920_v34 = vadd.f32 %v832_v27, %v803_v25  ;;  %v917_v45 = vadd.f32 %v916_v36, %v887_v24 }
 0x148   : > { %1049 = vst [vmem:[%s4912_s30 + $0x108] sm:$0xff] %v832_v27 }
 0x149   : > { %993 = vadd.xlane.f32.xlu1 %v992_v28  ;;  %v997_v35 = vadd.f32 %v996_v32, %v963_v31  ;;  %v1000_v37 = vadd.f32 %v965_v30, %v964_v29 }
 0x14b   : > { %998 = vadd.xlane.f32.xlu2 %v997_v35 }
 0x14c   : > { %v861_v38 = vpop.f32.mrf.mxu2 }
 0x14d   : > { %v966_v39 = vmul.f32 %v861_v38, %v861_v38  ;;  %1050 = vst [vmem:[%s4912_s30 + $0x110] sm:$0xff] %v861_v38  ;;  %v890_v40 = vpop.f32.mrf.mxu3  ;;  %v805_v41 = vpop.f32.mrf.mxu0  ;;  %v921_v42 = vadd.f32 %v920_v34, %v861_v38 }
 0x14e   : > { %1051 = vst [vmem:[%s4912_s30 + $0x118] sm:$0xff] %v890_v40  ;;  %v834_v43 = vpop.f32.mrf.mxu1  ;;  %v967_v44 = vmul.f32 %v890_v40, %v890_v40  ;;  %v968_v47 = vmul.f32 %v805_v41, %v805_v41 }
 0x14f   : > { %1052 = vst [vmem:[%s4912_s30 + $0x140] sm:$0xff] %v805_v41  ;;  %v1001_v46 = vadd.f32 %v1000_v37, %v966_v39  ;;  %v969_v48 = vmul.f32 %v834_v43, %v834_v43  ;;  %v922_v50 = vadd.f32 %v921_v42, %v890_v40  ;;  %v925_v51 = vadd.f32 %v834_v43, %v805_v41 }
 0x150   : > { %1053 = vst [vmem:[%s4912_s30 + $0x148] sm:$0xff] %v834_v43 }
 0x151   : > { %918 = vadd.xlane.f32.xlu1 %v917_v45  ;;  %v1002_v49 = vadd.f32 %v1001_v46, %v967_v44  ;;  %v1005_v56 = vadd.f32 %v969_v48, %v968_v47 }
 0x153   : > { %1003 = vadd.xlane.f32.xlu0 %v1002_v49  ;;  %923 = vadd.xlane.f32.xlu2 %v922_v50 }
 0x154   : > { %v863_v52 = vpop.f32.mrf.mxu2 }
 0x155   : > { %v970_v53 = vmul.f32 %v863_v52, %v863_v52  ;;  %1054 = vst [vmem:[%s4912_s30 + $0x150] sm:$0xff] %v863_v52  ;;  %v892_v54 = vpop.f32.mrf.mxu3  ;;  %v808_v55 = vpop.f32.mrf.mxu0  ;;  %v926_v57 = vadd.f32 %v925_v51, %v863_v52 }
 0x156   : > { %1055 = vst [vmem:[%s4912_s30 + $0x158] sm:$0xff] %v892_v54  ;;  %v837_v58 = vpop.f32.mrf.mxu1  ;;  %v972_v59 = vmul.f32 %v808_v55, %v808_v55  ;;  %v971_v61 = vmul.f32 %v892_v54, %v892_v54 }
 0x157   : > { %1056 = vst [vmem:[%s4912_s30 + $0x180] sm:$0xff] %v808_v55  ;;  %v973_v60 = vmul.f32 %v837_v58, %v837_v58  ;;  %v1006_v62 = vadd.f32 %v1005_v56, %v970_v53  ;;  %v930_v63 = vadd.f32 %v837_v58, %v808_v55  ;;  %v927_v1 = vadd.f32 %v926_v57, %v892_v54 }
 0x158   : > { %1057 = vst [vmem:[%s4912_s30 + $0x188] sm:$0xff] %v837_v58 }
 0x159   : > { %v1007_v0 = vadd.f32 %v1006_v62, %v971_v61  ;;  %v1010_v2 = vadd.f32 %v973_v60, %v972_v59 }
 0x15b   : > { %1008 = vadd.xlane.f32.xlu1 %v1007_v0  ;;  %928 = vadd.xlane.f32.xlu2 %v927_v1 }
 0x15c   : > { %v866_v3 = vpop.f32.mrf.mxu2 }
 0x15d   : > { %v974_v4 = vmul.f32 %v866_v3, %v866_v3  ;;  %1058 = vst [vmem:[%s4912_s30 + $0x190] sm:$0xff] %v866_v3  ;;  %v895_v5 = vpop.f32.mrf.mxu3  ;;  %v810_v6 = vpop.f32.mrf.mxu0  ;;  %v931_v7 = vadd.f32 %v930_v63, %v866_v3 }
 0x15e   : > { %1059 = vst [vmem:[%s4912_s30 + $0x198] sm:$0xff] %v895_v5  ;;  %v839_v8 = vpop.f32.mrf.mxu1  ;;  %v975_v9 = vmul.f32 %v895_v5, %v895_v5  ;;  %v976_v12 = vmul.f32 %v810_v6, %v810_v6 }
 0x15f   : > { %1060 = vst [vmem:[%s4912_s30 + $0x1c0] sm:$0xff] %v810_v6  ;;  %v932_v10 = vadd.f32 %v931_v7, %v895_v5  ;;  %v1011_v11 = vadd.f32 %v1010_v2, %v974_v4  ;;  %v977_v13 = vmul.f32 %v839_v8, %v839_v8  ;;  %v935_v15 = vadd.f32 %v839_v8, %v810_v6 }
 0x160   : > { %1061 = vst [vmem:[%s4912_s30 + $0x1c8] sm:$0xff] %v839_v8 }
 0x161   : > { %933 = vadd.xlane.f32.xlu0 %v932_v10  ;;  %v1012_v14 = vadd.f32 %v1011_v11, %v975_v9  ;;  %v1015_v21 = vadd.f32 %v977_v13, %v976_v12 }
 0x163   : > { %1013 = vadd.xlane.f32.xlu2 %v1012_v14 }
 0x164   : > { %v868_v16 = vpop.f32.mrf.mxu2 }
 0x165   : > { %v978_v17 = vmul.f32 %v868_v16, %v868_v16  ;;  %1062 = vst [vmem:[%s4912_s30 + $0x1d0] sm:$0xff] %v868_v16  ;;  %v897_v18 = vpop.f32.mrf.mxu3  ;;  %v1162_v19 = vpop.f32.mrf.mxu0  ;;  %v936_v20 = vadd.f32 %v935_v15, %v868_v16 }
 0x166   : > { %1063 = vst [vmem:[%s4912_s30 + $0x1d8] sm:$0xff] %v897_v18  ;;  %v1317_v22 = vmul.f32 %v1162_v19, %v1162_v19  ;;  %v1191_v23 = vpop.f32.mrf.mxu1  ;;  %v979_v26 = vmul.f32 %v897_v18, %v897_v18 }
 0x167   : > { %4045 = vst [vmem:[%s4912_s30 + $0x200] sm:$0xff] %v1162_v19  ;;  %v1318_v24 = vmul.f32 %v1191_v23, %v1191_v23  ;;  %v937_v25 = vadd.f32 %v936_v20, %v897_v18  ;;  %v1016_v27 = vadd.f32 %v1015_v21, %v978_v17  ;;  %v1269_v28 = vadd.f32 %v1191_v23, %v1162_v19 }
 0x168   : > { %4046 = vst [vmem:[%s4912_s30 + $0x208] sm:$0xff] %v1191_v23 }
 0x169   : > { %938 = vadd.xlane.f32.xlu1 %v937_v25  ;;  %v1017_v29 = vadd.f32 %v1016_v27, %v979_v26  ;;  %v1349_v30 = vadd.f32 %v1318_v24, %v1317_v22 }
 0x16b   : > { %1018 = vadd.xlane.f32.xlu0 %v1017_v29 }
 0x16c   : > { %v1220_v31 = vpop.f32.mrf.mxu2 }
 0x16d   : > { %v1319_v32 = vmul.f32 %v1220_v31, %v1220_v31  ;;  %4047 = vst [vmem:[%s4912_s30 + $0x210] sm:$0xff] %v1220_v31  ;;  %v1249_v33 = vpop.f32.mrf.mxu3  ;;  %v1164_v34 = vpop.f32.mrf.mxu0  ;;  %v1270_v35 = vadd.f32 %v1269_v28, %v1220_v31 }
 0x16e   : > { %4048 = vst [vmem:[%s4912_s30 + $0x218] sm:$0xff] %v1249_v33  ;;  %v1193_v36 = vpop.f32.mrf.mxu1  ;;  %v1320_v37 = vmul.f32 %v1249_v33, %v1249_v33  ;;  %v1321_v40 = vmul.f32 %v1164_v34, %v1164_v34 }
 0x16f   : > { %4049 = vst [vmem:[%s4912_s30 + $0x240] sm:$0xff] %v1164_v34  ;;  %v1271_v38 = vadd.f32 %v1270_v35, %v1249_v33  ;;  %v1350_v39 = vadd.f32 %v1349_v30, %v1319_v32  ;;  %v1322_v41 = vmul.f32 %v1193_v36, %v1193_v36  ;;  %v1274_v43 = vadd.f32 %v1193_v36, %v1164_v34 }
 0x170   : > { %4050 = vst [vmem:[%s4912_s30 + $0x248] sm:$0xff] %v1193_v36 }
 0x171   : > { %1272 = vadd.xlane.f32.xlu1 %v1271_v38  ;;  %v1351_v42 = vadd.f32 %v1350_v39, %v1320_v37  ;;  %v1354_v49 = vadd.f32 %v1322_v41, %v1321_v40 }
 0x173   : > { %1352 = vadd.xlane.f32.xlu0 %v1351_v42 }
 0x174   : > { %v1222_v44 = vpop.f32.mrf.mxu2 }
 0x175   : > { %v1323_v45 = vmul.f32 %v1222_v44, %v1222_v44  ;;  %4051 = vst [vmem:[%s4912_s30 + $0x250] sm:$0xff] %v1222_v44  ;;  %v1251_v46 = vpop.f32.mrf.mxu3  ;;  %v1167_v47 = vpop.f32.mrf.mxu0  ;;  %v1275_v48 = vadd.f32 %v1274_v43, %v1222_v44 }
 0x176   : > { %4052 = vst [vmem:[%s4912_s30 + $0x258] sm:$0xff] %v1251_v46  ;;  %v1325_v50 = vmul.f32 %v1167_v47, %v1167_v47  ;;  %v1196_v51 = vpop.f32.mrf.mxu1  ;;  %v1324_v54 = vmul.f32 %v1251_v46, %v1251_v46 }
 0x177   : > { %4053 = vst [vmem:[%s4912_s30 + $0x280] sm:$0xff] %v1167_v47  ;;  %v1326_v52 = vmul.f32 %v1196_v51, %v1196_v51  ;;  %v1276_v53 = vadd.f32 %v1275_v48, %v1251_v46  ;;  %v1355_v55 = vadd.f32 %v1354_v49, %v1323_v45  ;;  %v1279_v56 = vadd.f32 %v1196_v51, %v1167_v47 }
 0x178   : > { %4054 = vst [vmem:[%s4912_s30 + $0x288] sm:$0xff] %v1196_v51 }
 0x179   : > { %1277 = vadd.xlane.f32.xlu2 %v1276_v53  ;;  %v1356_v57 = vadd.f32 %v1355_v55, %v1324_v54  ;;  %v1359_v58 = vadd.f32 %v1326_v52, %v1325_v50 }
 0x17b   : > { %1357 = vadd.xlane.f32.xlu1 %v1356_v57 }
 0x17c   : > { %v1225_v59 = vpop.f32.mrf.mxu2 }
 0x17d   : > { %v1327_v60 = vmul.f32 %v1225_v59, %v1225_v59  ;;  %4055 = vst [vmem:[%s4912_s30 + $0x290] sm:$0xff] %v1225_v59  ;;  %v1254_v61 = vpop.f32.mrf.mxu3  ;;  %v1169_v62 = vpop.f32.mrf.mxu0  ;;  %v1280_v63 = vadd.f32 %v1279_v56, %v1225_v59 }
 0x17e   : > { %4056 = vst [vmem:[%s4912_s30 + $0x298] sm:$0xff] %v1254_v61  ;;  %v1198_v0 = vpop.f32.mrf.mxu1  ;;  %v1328_v1 = vmul.f32 %v1254_v61, %v1254_v61  ;;  %v1329_v4 = vmul.f32 %v1169_v62, %v1169_v62 }
 0x17f   : > { %4057 = vst [vmem:[%s4912_s30 + $0x2c0] sm:$0xff] %v1169_v62  ;;  %v1281_v2 = vadd.f32 %v1280_v63, %v1254_v61  ;;  %v1360_v3 = vadd.f32 %v1359_v58, %v1327_v60  ;;  %v1330_v5 = vmul.f32 %v1198_v0, %v1198_v0  ;;  %v1284_v7 = vadd.f32 %v1198_v0, %v1169_v62 }
 0x180   : > { %4058 = vst [vmem:[%s4912_s30 + $0x2c8] sm:$0xff] %v1198_v0 }
 0x181   : > { %1282 = vadd.xlane.f32.xlu0 %v1281_v2  ;;  %v1361_v6 = vadd.f32 %v1360_v3, %v1328_v1  ;;  %v1364_v13 = vadd.f32 %v1330_v5, %v1329_v4 }
 0x183   : > { %1362 = vadd.xlane.f32.xlu2 %v1361_v6 }
 0x184   : > { %v1227_v8 = vpop.f32.mrf.mxu2 }
 0x185   : > { %v1331_v9 = vmul.f32 %v1227_v8, %v1227_v8  ;;  %4059 = vst [vmem:[%s4912_s30 + $0x2d0] sm:$0xff] %v1227_v8  ;;  %v1256_v10 = vpop.f32.mrf.mxu3  ;;  %v1172_v11 = vpop.f32.mrf.mxu0  ;;  %v1285_v12 = vadd.f32 %v1284_v7, %v1227_v8 }
 0x186   : > { %4060 = vst [vmem:[%s4912_s30 + $0x2d8] sm:$0xff] %v1256_v10  ;;  %v1333_v14 = vmul.f32 %v1172_v11, %v1172_v11  ;;  %v1201_v15 = vpop.f32.mrf.mxu1  ;;  %v1332_v18 = vmul.f32 %v1256_v10, %v1256_v10 }
 0x187   : > { %4061 = vst [vmem:[%s4912_s30 + $0x300] sm:$0xff] %v1172_v11  ;;  %v1334_v16 = vmul.f32 %v1201_v15, %v1201_v15  ;;  %v1286_v17 = vadd.f32 %v1285_v12, %v1256_v10  ;;  %v1365_v19 = vadd.f32 %v1364_v13, %v1331_v9  ;;  %v1289_v20 = vadd.f32 %v1201_v15, %v1172_v11 }
 0x188   : > { %4062 = vst [vmem:[%s4912_s30 + $0x308] sm:$0xff] %v1201_v15 }
 0x189   : > { %1287 = vadd.xlane.f32.xlu1 %v1286_v17  ;;  %v1366_v21 = vadd.f32 %v1365_v19, %v1332_v18  ;;  %v1369_v22 = vadd.f32 %v1334_v16, %v1333_v14 }
 0x18b   : > { %1367 = vadd.xlane.f32.xlu0 %v1366_v21 }
 0x18c   : > { %v1230_v23 = vpop.f32.mrf.mxu2 }
 0x18d   : > { %v1335_v24 = vmul.f32 %v1230_v23, %v1230_v23  ;;  %4063 = vst [vmem:[%s4912_s30 + $0x310] sm:$0xff] %v1230_v23  ;;  %v1259_v25 = vpop.f32.mrf.mxu3  ;;  %v1174_v26 = vpop.f32.mrf.mxu0  ;;  %v1290_v27 = vadd.f32 %v1289_v20, %v1230_v23 }
 0x18e   : > { %4064 = vst [vmem:[%s4912_s30 + $0x318] sm:$0xff] %v1259_v25  ;;  %v1203_v28 = vpop.f32.mrf.mxu1  ;;  %v1336_v29 = vmul.f32 %v1259_v25, %v1259_v25  ;;  %v1337_v57 = vmul.f32 %v1174_v26, %v1174_v26 }
 0x18f   : > { %4065 = vst [vmem:[%s4912_s30 + $0x340] sm:$0xff] %v1174_v26  ;;  %v1291_v30 = vadd.f32 %v1290_v27, %v1259_v25  ;;  %v1370_v31 = vadd.f32 %v1369_v22, %v1335_v24  ;;  %v1294_v33 = vadd.f32 %v1203_v28, %v1174_v26  ;;  %v1338_v59 = vmul.f32 %v1203_v28, %v1203_v28  ;;  %v1432_v25 = vld [vmem:[#allocation2] sm:$0xff] }
 0x190   : > { %4066 = vst [vmem:[%s4912_s30 + $0x348] sm:$0xff] %v1203_v28  ;;  %v1457_v28 = vld [vmem:[#allocation3] sm:$0xff] }
 0x191   : > { %1292 = vadd.xlane.f32.xlu2 %v1291_v30  ;;  %v1371_v32 = vadd.f32 %v1370_v31, %v1336_v29  ;;  %v1374_v5 = vadd.f32 %v1338_v59, %v1337_v57  ;;  %v1436_v57 = vld [vmem:[#allocation2 + $0x20] sm:$0xff] }
 0x193   : > { %1372 = vadd.xlane.f32.xlu1 %v1371_v32 }
 0x194   : > { %v1232_v34 = vpop.f32.mrf.mxu2 }
 0x195   : > { %4067 = vst [vmem:[%s4912_s30 + $0x350] sm:$0xff] %v1232_v34  ;;  %v1261_v35 = vpop.f32.mrf.mxu3  ;;  %v1177_v36 = vpop.f32.mrf.mxu0  ;;  %v1295_v37 = vadd.f32 %v1294_v33, %v1232_v34  ;;  %v1339_v0 = vmul.f32 %v1232_v34, %v1232_v34  ;;  %v1433_v33 = vld [vmem:[#allocation2 + $0x8] sm:$0xff] }
 0x196   : > { %4068 = vst [vmem:[%s4912_s30 + $0x358] sm:$0xff] %v1261_v35  ;;  %v1206_v38 = vpop.f32.mrf.mxu1  ;;  %v1341_v39 = vmul.f32 %v1177_v36, %v1177_v36  ;;  %v1340_v7 = vmul.f32 %v1261_v35, %v1261_v35 }
 0x197   : > { %4069 = vst [vmem:[%s4912_s30 + $0x380] sm:$0xff] %v1177_v36  ;;  %v1342_v40 = vmul.f32 %v1206_v38, %v1206_v38  ;;  %v1296_v41 = vadd.f32 %v1295_v37, %v1261_v35  ;;  %v1299_v42 = vadd.f32 %v1206_v38, %v1177_v36  ;;  %v1375_v6 = vadd.f32 %v1374_v5, %v1339_v0  ;;  %v1458_v36 = vld [vmem:[#allocation3 + $0x8] sm:$0xff]  ;;  %v1438_v5 = vld [vmem:[#allocation2 + $0x30] sm:$0xff] }
 0x198   : > { %4070 = vst [vmem:[%s4912_s30 + $0x388] sm:$0xff] %v1206_v38 }
 0x199   : > { %1297 = vadd.xlane.f32.xlu0 %v1296_v41  ;;  %v1379_v43 = vadd.f32 %v1342_v40, %v1341_v39  ;;  %v1376_v8 = vadd.f32 %v1375_v6, %v1340_v7  ;;  %v1434_v41 = vld [vmem:[#allocation2 + $0x10] sm:$0xff] }
 0x19c   : > { %v1235_v44 = vpop.f32.mrf.mxu2 }
 0x19d   : > { %v1343_v45 = vmul.f32 %v1235_v44, %v1235_v44  ;;  %4071 = vst [vmem:[%s4912_s30 + $0x390] sm:$0xff] %v1235_v44  ;;  %v1264_v46 = vpop.f32.mrf.mxu3  ;;  %v1179_v47 = vpop.f32.mrf.mxu0  ;;  %v1300_v48 = vadd.f32 %v1299_v42, %v1235_v44  ;;  %v1459_v44 = vld [vmem:[#allocation3 + $0x10] sm:$0xff] }
 0x19e   : > { %4072 = vst [vmem:[%s4912_s30 + $0x398] sm:$0xff] %v1264_v46  ;;  %v1208_v49 = vpop.f32.mrf.mxu1  ;;  %v1344_v50 = vmul.f32 %v1264_v46, %v1264_v46  ;;  %v1345_v53 = vmul.f32 %v1179_v47, %v1179_v47 }
 0x19f   : > { %4073 = vst [vmem:[%s4912_s30 + $0x3c0] sm:$0xff] %v1179_v47  ;;  %v1301_v51 = vadd.f32 %v1300_v48, %v1264_v46  ;;  %v1380_v52 = vadd.f32 %v1379_v43, %v1343_v45  ;;  %v1346_v54 = vmul.f32 %v1208_v49, %v1208_v49  ;;  %v1304_v56 = vadd.f32 %v1208_v49, %v1179_v47 }
 0x1a0   : > { %4074 = vst [vmem:[%s4912_s30 + $0x3c8] sm:$0xff] %v1208_v49  ;;  %v1435_v49 = vld [vmem:[#allocation2 + $0x18] sm:$0xff] }
 0x1a1   : > { %1302 = vadd.xlane.f32.xlu1 %v1301_v51  ;;  %v1381_v55 = vadd.f32 %v1380_v52, %v1344_v50  ;;  %v1384_v60 = vadd.f32 %v1346_v54, %v1345_v53  ;;  %v1460_v52 = vld [vmem:[#allocation3 + $0x18] sm:$0xff] }
 0x1a3   : > { %1382 = vadd.xlane.f32.xlu0 %v1381_v55 }
 0x1a4   : > { %v1237_v58 = vpop.f32.mrf.mxu2  ;;  %v904_v9 = vpop.xlane.xlu0 %903 }
 0x1a5   : > { %v1305_v61 = vadd.f32 %v1304_v56, %v1237_v58  ;;  %v1347_v62 = vmul.f32 %v1237_v58, %v1237_v58  ;;  %4075 = vst [vmem:[%s4912_s30 + $0x3d0] sm:$0xff] %v1237_v58  ;;  %v1266_v63 = vpop.f32.mrf.mxu3 }
 0x1a6   : > { %4076 = vst [vmem:[%s4912_s30 + $0x3d8] sm:$0xff] %v1266_v63  ;;  %v1348_v1 = vmul.f32 %v1266_v63, %v1266_v63  ;;  %v984_v12 = vpop.xlane.xlu2 %983 }
 0x1a7   : > { %v1306_v2 = vadd.f32 %v1305_v61, %v1266_v63  ;;  %v1385_v3 = vadd.f32 %v1384_v60, %v1347_v62  ;;  %v1461_v60 = vld [vmem:[#allocation3 + $0x20] sm:$0xff] }
 0x1a9   : > { %1307 = vadd.xlane.f32.xlu2 %v1306_v2  ;;  %v1386_v4 = vadd.f32 %v1385_v3, %v1348_v1  ;;  %v1437_v1 = vld [vmem:[#allocation2 + $0x28] sm:$0xff] }
 0x1ab   : > { %1387 = vadd.xlane.f32.xlu1 %v1386_v4 }
 0x1ac   : > { %v909_v11 = vpop.xlane.xlu0 %908 }
 0x1b1   : > { %1377 = vadd.xlane.f32.xlu2 %v1376_v8  ;;  %v1463_v8 = vld [vmem:[#allocation3 + $0x30] sm:$0xff] }
 0x1b4   : > { %v914_v10 = vpop.xlane.xlu1 %913  ;;  %v989_v14 = vpop.xlane.xlu0 %988 }
 0x1bc   : > { %v994_v13 = vpop.xlane.xlu1 %993 }
 0x1be   : > { %v999_v15 = vpop.xlane.xlu2 %998 }
 0x1c4   : > { %v919_v16 = vpop.xlane.xlu1 %918 }
 0x1c6   : > { %v1004_v17 = vpop.xlane.xlu0 %1003  ;;  %v924_v18 = vpop.xlane.xlu2 %923 }
 0x1ce   : > { %v4978_v19 = vpop.xlane.xlu1 %1008  ;;  %v929_v21 = vpop.xlane.xlu2 %928 }
 0x1d4   : > { %v4980_v20 = vpop.xlane.xlu0 %933 }
 0x1d6   : > { %v4986_v24 = vpop.xlane.xlu2 %1013 }
 0x1dc   : > { %v4982_v22 = vpop.xlane.xlu1 %938 }
 0x1de   : > { %v4984_v23 = vpop.xlane.xlu0 %1018 }
 0x1e4   : > { %v1273_v26 = vpop.xlane.xlu1 %1272 }
 0x1e5   : > { %v1309_v27 = vadd.f32 %v1273_v26, %v904_v9 }
 0x1e6   : > { %v1353_v29 = vpop.xlane.xlu0 %1352 }
 0x1e7   : > { %v1440_v30 = vadd.f32 %v1432_v25, %v1309_v27  ;;  %v1389_v31 = vadd.f32 %v1353_v29, %v984_v12 }
 0x1e9   : > { %1449 = vst.msk [vmem:[#allocation2] sm:$0xff] %vm1448_vm3, %v1440_v30  ;;  %v1465_v32 = vadd.f32 %v1457_v28, %v1389_v31 }
 0x1eb   : > { %1473 = vst.msk [vmem:[#allocation3] sm:$0xff] %vm1448_vm3, %v1465_v32 }
 0x1ec   : > { %v1278_v34 = vpop.xlane.xlu2 %1277 }
 0x1ed   : > { %v1310_v35 = vadd.f32 %v1278_v34, %v909_v11 }
 0x1ee   : > { %v1358_v37 = vpop.xlane.xlu1 %1357 }
 0x1ef   : > { %v1441_v38 = vadd.f32 %v1433_v33, %v1310_v35  ;;  %v1390_v39 = vadd.f32 %v1358_v37, %v989_v14 }
 0x1f1   : > { %1450 = vst.msk [vmem:[#allocation2 + $0x8] sm:$0xff] %vm1448_vm3, %v1441_v38  ;;  %v1466_v40 = vadd.f32 %v1458_v36, %v1390_v39 }
 0x1f3   : > { %1474 = vst.msk [vmem:[#allocation3 + $0x8] sm:$0xff] %vm1448_vm3, %v1466_v40 }
 0x1f4   : > { %v1283_v42 = vpop.xlane.xlu0 %1282 }
 0x1f5   : > { %v1311_v43 = vadd.f32 %v1283_v42, %v914_v10 }
 0x1f6   : > { %v1363_v45 = vpop.xlane.xlu2 %1362 }
 0x1f7   : > { %v1442_v46 = vadd.f32 %v1434_v41, %v1311_v43  ;;  %v1391_v47 = vadd.f32 %v1363_v45, %v994_v13  ;;  %v1439_v13 = vld [vmem:[#allocation2 + $0x38] sm:$0xff] }
 0x1f9   : > { %1451 = vst.msk [vmem:[#allocation2 + $0x10] sm:$0xff] %vm1448_vm3, %v1442_v46  ;;  %v1467_v48 = vadd.f32 %v1459_v44, %v1391_v47 }
 0x1fb   : > { %1475 = vst.msk [vmem:[#allocation3 + $0x10] sm:$0xff] %vm1448_vm3, %v1467_v48 }
 0x1fc   : > { %v1288_v50 = vpop.xlane.xlu1 %1287 }
 0x1fd   : > { %v1312_v51 = vadd.f32 %v1288_v50, %v919_v16  ;;  %v1464_v16 = vld [vmem:[#allocation3 + $0x38] sm:$0xff] }
 0x1fe   : > { %v1368_v53 = vpop.xlane.xlu0 %1367 }
 0x1ff   : > { %v1443_v54 = vadd.f32 %v1435_v49, %v1312_v51  ;;  %v1392_v55 = vadd.f32 %v1368_v53, %v999_v15 }
 0x201   : > { %1452 = vst.msk [vmem:[#allocation2 + $0x18] sm:$0xff] %vm1448_vm3, %v1443_v54  ;;  %v1468_v56 = vadd.f32 %v1460_v52, %v1392_v55 }
 0x203   : > { %1476 = vst.msk [vmem:[#allocation3 + $0x18] sm:$0xff] %vm1448_vm3, %v1468_v56 }
 0x204   : > { %v1293_v58 = vpop.xlane.xlu2 %1292 }
 0x205   : > { %v1313_v59 = vadd.f32 %v1293_v58, %v924_v18 }
 0x206   : > { %v1373_v61 = vpop.xlane.xlu1 %1372 }
 0x207   : > { %v1444_v62 = vadd.f32 %v1436_v57, %v1313_v59  ;;  %v1393_v63 = vadd.f32 %v1373_v61, %v1004_v17 }
 0x209   : > { %1453 = vst.msk [vmem:[#allocation2 + $0x20] sm:$0xff] %vm1448_vm3, %v1444_v62  ;;  %v1469_v0 = vadd.f32 %v1461_v60, %v1393_v63 }
 0x20b   : > { %1477 = vst.msk [vmem:[#allocation3 + $0x20] sm:$0xff] %vm1448_vm3, %v1469_v0 }
 0x20c   : > { %v1298_v2 = vpop.xlane.xlu0 %1297 }
 0x20d   : > { %v1314_v3 = vadd.f32 %v1298_v2, %v929_v21 }
 0x20f   : > { %v1445_v4 = vadd.f32 %v1437_v1, %v1314_v3 }
 0x211   : > { %1454 = vst.msk [vmem:[#allocation2 + $0x28] sm:$0xff] %vm1448_vm3, %v1445_v4 }
 0x214   : > { %v1303_v6 = vpop.xlane.xlu1 %1302 }
 0x215   : > { %v1315_v7 = vadd.f32 %v1303_v6, %v4980_v20 }
 0x216   : > { %v1383_v9 = vpop.xlane.xlu0 %1382 }
 0x217   : > { %v1446_v10 = vadd.f32 %v1438_v5, %v1315_v7  ;;  %v1395_v11 = vadd.f32 %v1383_v9, %v4986_v24  ;;  %v1462_v24 = vld [vmem:[#allocation3 + $0x28] sm:$0xff] }
 0x219   : > { %1455 = vst.msk [vmem:[#allocation2 + $0x30] sm:$0xff] %vm1448_vm3, %v1446_v10  ;;  %v1471_v12 = vadd.f32 %v1463_v8, %v1395_v11 }
 0x21b   : > { %1479 = vst.msk [vmem:[#allocation3 + $0x30] sm:$0xff] %vm1448_vm3, %v1471_v12 }
 0x21c   : > { %v1308_v14 = vpop.xlane.xlu2 %1307 }
 0x21d   : > { %v1316_v15 = vadd.f32 %v1308_v14, %v4982_v22 }
 0x21e   : > { %v1388_v17 = vpop.xlane.xlu1 %1387 }
 0x21f   : > { %v1447_v18 = vadd.f32 %v1439_v13, %v1316_v15  ;;  %v1396_v21 = vadd.f32 %v1388_v17, %v4984_v23 }
 0x221   : > { %1456 = vst.msk [vmem:[#allocation2 + $0x38] sm:$0xff] %vm1448_vm3, %v1447_v18  ;;  %v1472_v20 = vadd.f32 %v1464_v16, %v1396_v21 }
 0x223   : > { %1480 = vst.msk [vmem:[#allocation3 + $0x38] sm:$0xff] %vm1448_vm3, %v1472_v20 }
 0x224   : > { %v1378_v25 = vpop.xlane.xlu2 %1377 }
 0x225   : > { %v1394_v26 = vadd.f32 %v1378_v25, %v4978_v19 }
 0x227   : > { %v1470_v27 = vadd.f32 %v1462_v24, %v1394_v26 }
 0x229   : > { %1478 = vst.msk [vmem:[#allocation3 + $0x28] sm:$0xff] %vm1448_vm3, %v1470_v27 }
 0x22a PF: > { %p4077_p0 = scmp.ne.s32.totalorder %s4466_s21, 1 }
 0x22c   : > { %1484 = sbr.rel (%p4077_p0) target bundleno = 1941 (0x795), region = 111 }
 0x231   : > { %v1491_v22 = vld [vmem:[#allocation2 + $0x30] sm:$0xff]  ;;  %v4481_v29 = vmov 0   ;;  %v1489_v31 = vld [vmem:[#allocation2 + $0x20] sm:$0xff]  ;;  %v1492_v34 = vld [vmem:[#allocation2 + $0x38] sm:$0xff]  ;;  %s1669_s12 = sshra.s32 %s3945_s11, 7  ;;  %p4144_p1 = scmp.ne.s32.totalorder %s4462_s20, 1 }
 0x232   : > { %v1507_v28 = vld [vmem:[#allocation3 + $0x30] sm:$0xff]  ;;  %4250 = vset.pattern.permute.xlu2 %v4481_v29  ;;  %4249 = vset.pattern.permute.xlu0 %v4481_v29  ;;  %v5010_v23 = vmul.f32 0.00048828125, %v1491_v22  ;;  %v1505_v32 = vld [vmem:[#allocation3 + $0x20] sm:$0xff]  ;;  %v5012_v33 = vmul.f32 0.00048828125, %v1489_v31  ;;  %v1508_v35 = vld [vmem:[#allocation3 + $0x38] sm:$0xff]  ;;  %v5016_v37 = vmul.f32 0.00048828125, %v1492_v34 }
 0x233   : > { %v1515_v30 = vmul.f32 0.00048828125, %v1507_v28  ;;  %v1513_v19 = vmul.f32 0.00048828125, %v1505_v32  ;;  %4251 = vset.pattern.permute.xlu1 %v4481_v29  ;;  %v1516_v38 = vmul.f32 0.00048828125, %v1508_v35  ;;  %v1490_v39 = vld [vmem:[#allocation2 + $0x28] sm:$0xff]  ;;  %v1488_v44 = vld [vmem:[#allocation2 + $0x18] sm:$0xff]  ;;  %v1487_v50 = vld [vmem:[#allocation2 + $0x10] sm:$0xff] }
 0x234   : > { %v1523_v36 = vmul.f32 %v5010_v23, %v5010_v23  ;;  %v1506_v40 = vld [vmem:[#allocation3 + $0x28] sm:$0xff]  ;;  %v1521_v41 = vmul.f32 %v5012_v33, %v5012_v33  ;;  %v5020_v42 = vmul.f32 0.00048828125, %v1490_v39  ;;  %v1504_v45 = vld [vmem:[#allocation3 + $0x18] sm:$0xff]  ;;  %v1524_v47 = vmul.f32 %v5016_v37, %v5016_v37  ;;  %v1503_v51 = vld [vmem:[#allocation3 + $0x10] sm:$0xff]  ;;  %s4078_s4 = sshll.u32 %s1669_s12, 3  ;;  %s6733_s29 = sld [smem:[#allocation33_spill]] (!%p4144_p1) }
 0x235   : > { %v1514_v43 = vmul.f32 0.00048828125, %v1506_v40  ;;  %v5024_v48 = vmul.f32 0.00048828125, %v1488_v44  ;;  %v1512_v49 = vmul.f32 0.00048828125, %v1504_v45  ;;  %v1485_v52 = vld [vmem:[#allocation2] sm:$0xff]  ;;  %v5028_v55 = vmul.f32 0.00048828125, %v1487_v50  ;;  %v1486_v4 = vld [vmem:[#allocation2 + $0x8] sm:$0xff] }
 0x236   : > { %v1531_v46 = vsub.f32 %v1515_v30, %v1523_v36  ;;  %v1529_v53 = vsub.f32 %v1513_v19, %v1521_v41  ;;  %v1522_v54 = vmul.f32 %v5020_v42, %v5020_v42  ;;  %v1511_v56 = vmul.f32 0.00048828125, %v1503_v51  ;;  %v1501_v57 = vld [vmem:[#allocation3] sm:$0xff]  ;;  %v1502_v7 = vld [vmem:[#allocation3 + $0x8] sm:$0xff]  ;;  %s5223_s15 = scalar_lea.vmem [#allocation6], %s4078_s4  ;;  %s6734_s25 = sld [smem:[#allocation35_spill]] (!%p4144_p1) }
 0x237   : > { %v1532_v59 = vsub.f32 %v1516_v38, %v1524_v47  ;;  %v1520_v60 = vmul.f32 %v5024_v48, %v5024_v48  ;;  %v5032_v61 = vmul.f32 0.00048828125, %v1485_v52  ;;  %v1519_v0 = vmul.f32 %v5028_v55, %v5028_v55  ;;  %s6735_s16 = sld [smem:[#allocation36_spill]] (!%p4144_p1) }
 0x238   : > { %v1547_v58 = vadd.f32 1e-05, %v1531_v46  ;;  %v1545_v62 = vadd.f32 1e-05, %v1529_v53  ;;  %v1530_v63 = vsub.f32 %v1514_v43, %v1522_v54  ;;  %v1509_v3 = vmul.f32 0.00048828125, %v1501_v57  ;;  %v1537_v53 = vld [vmem:[%s6605_s2 + $0x20] sm:$0xff] }
 0x239   : > { %v1548_v1 = vadd.f32 1e-05, %v1532_v59  ;;  %v1528_v2 = vsub.f32 %v1512_v49, %v1520_v60  ;;  %v1527_v6 = vsub.f32 %v1511_v56, %v1519_v0  ;;  %v1517_v9 = vmul.f32 %v5032_v61, %v5032_v61  ;;  %v1539_v49 = vld [vmem:[%s6605_s2 + $0x30] sm:$0xff]  ;;  %v1540_v59 = vld [vmem:[%s6605_s2 + $0x38] sm:$0xff]  ;;  %v1637_v56 = vld [vmem:[%s6606_s3] sm:$0xff]  ;;  %s6736_s28 = sld [smem:[#allocation34_spill]] (!%p4144_p1) }
 0x23a   : > { %4252 = vrsqrt.f32 %v1547_v58  ;;  %v5036_v5 = vadd.f32 1e-05, %v1530_v63  ;;  %v5045_v11 = vmul.f32 0.00048828125, %v1486_v4  ;;  %v1510_v13 = vmul.f32 0.00048828125, %v1502_v7  ;;  %s6737_s4 = sld [smem:[#allocation37_spill]] (!%p4144_p1) }
 0x23b   : > { %4254 = vrsqrt.f32 %v1545_v62  ;;  %v5038_v8 = vadd.f32 1e-05, %v1528_v2  ;;  %v5043_v10 = vadd.f32 1e-05, %v1527_v6  ;;  %v1525_v12 = vsub.f32 %v1509_v3, %v1517_v9  ;;  %v1643_v6 = vld [vmem:[%s6606_s3 + $0x30] sm:$0xff]  ;;  %s6740_s18 = sld [smem:[#allocation38_spill]] (!%p4144_p1) }
 0x23c   : > { %4256 = vrsqrt.f32 %v1548_v1  ;;  %v1518_v14 = vmul.f32 %v5045_v11, %v5045_v11  ;;  %vm1615_vm4 = vweird.f32 %v1547_v58  ;;  %vm1595_vm5 = vweird.f32 %v1545_v62 }
 0x23d   : > { %4258 = vrsqrt.f32 %v5036_v5  ;;  %v5051_v16 = vadd.f32 1e-05, %v1525_v12  ;;  %vm1625_vm7 = vweird.f32 %v1548_v1  ;;  %vm1605_vm12 = vweird.f32 %v5036_v5 }
 0x23e   : > { %4260 = vrsqrt.f32 %v5038_v8  ;;  %v1526_v24 = vsub.f32 %v1510_v13, %v1518_v14  ;;  %vm1585_vm0 = vweird.f32 %v5038_v8  ;;  %vm1575_vm2 = vweird.f32 %v5043_v10 }
 0x23f   : > { %4262 = vrsqrt.f32 %v5043_v10 }
 0x240   : > { %v4253_v15 = vpop.eup %4252  ;;  %4264 = vrsqrt.f32 %v5051_v16  ;;  %v5067_v38 = vadd.f32 1e-05, %v1526_v24 }
 0x241   : > { %v4255_v17 = vpop.eup %4254  ;;  %v1610_v18 = vmul.f32 %v4253_v15, %v1547_v58  ;;  %vm1616_vm6 = vweird.f32 %v4253_v15  ;;  %s6741_s30 = smov (!%p4144_p1), %s6740_s18 }
 0x242   : > { %v4257_v21 = vpop.eup %4256  ;;  %v1590_v20 = vmul.f32 %v4255_v17, %v1545_v62  ;;  %vm1596_vm8 = vweird.f32 %v4255_v17  ;;  %vm5074_vm10 = vmor %vm1615_vm4, %vm1616_vm6  ;;  %4266 = vrsqrt.f32 %v5067_v38  ;;  %vm1555_vm6 = vweird.f32 %v5051_v16 }
 0x243   : > { %v5054_v25 = vpop.eup %4258  ;;  %v1611_v26 = vmul.f32 %v4253_v15, %v1610_v18  ;;  %v1620_v27 = vmul.f32 %v4257_v21, %v1548_v1  ;;  %vm1626_vm9 = vweird.f32 %v4257_v21  ;;  %vm5084_vm11 = vmor %vm1595_vm5, %vm1596_vm8 }
 0x244   : > { %v5056_v22 = vpop.eup %4260  ;;  %v1591_v28 = vmul.f32 %v4255_v17, %v1590_v20  ;;  %v1600_v29 = vmul.f32 %v5054_v25, %v5036_v5  ;;  %vm5093_vm13 = vmor %vm1625_vm7, %vm1626_vm9  ;;  %vm1606_vm14 = vweird.f32 %v5054_v25  ;;  %v1538_v5 = vld [vmem:[%s6605_s2 + $0x28] sm:$0xff]  ;;  %vm1565_vm9 = vweird.f32 %v5067_v38 }
 0x245   : > { %v5060_v30 = vpop.eup %4262  ;;  %v1612_v31 = vmul.f32 0.5, %v1611_v26  ;;  %v1621_v32 = vmul.f32 %v4257_v21, %v1620_v27  ;;  %v1580_v19 = vmul.f32 %v5056_v22, %v5038_v8  ;;  %vm5118_vm15 = vmor %vm1605_vm12, %vm1606_vm14  ;;  %vm1586_vm1 = vweird.f32 %v5056_v22  ;;  %v1644_v26 = vld [vmem:[%s6606_s3 + $0x38] sm:$0xff] }
 0x246   : > { %v1592_v34 = vmul.f32 0.5, %v1591_v28  ;;  %v1601_v35 = vmul.f32 %v5054_v25, %v1600_v29  ;;  %v1570_v36 = vmul.f32 %v5060_v30, %v5043_v10  ;;  %v5070_v43 = vpop.eup %4264  ;;  %vm1576_vm3 = vweird.f32 %v5060_v30  ;;  %vm1587_vm4 = vmor %vm1585_vm0, %vm1586_vm1  ;;  %v1536_v10 = vld [vmem:[%s6605_s2 + $0x18] sm:$0xff] }
 0x247   : > { %v1613_v39 = vsub.f32 1.5, %v1612_v31  ;;  %v1622_v40 = vmul.f32 0.5, %v1621_v32  ;;  %v1581_v41 = vmul.f32 %v5056_v22, %v1580_v19  ;;  %v1550_v63 = vmul.f32 %v5070_v43, %v5051_v16  ;;  %vm1577_vm5 = vmor %vm1575_vm2, %vm1576_vm3  ;;  %v1535_v19 = vld [vmem:[%s6605_s2 + $0x10] sm:$0xff] }
 0x248   : > { %v1593_v45 = vsub.f32 1.5, %v1592_v34  ;;  %v1602_v46 = vmul.f32 0.5, %v1601_v35  ;;  %v1571_v47 = vmul.f32 %v5060_v30, %v1570_v36  ;;  %vm1556_vm7 = vweird.f32 %v5070_v43 }
 0x249   : > { %v1614_v50 = vmul.f32 %v4253_v15, %v1613_v39  ;;  %v1623_v52 = vsub.f32 1.5, %v1622_v40  ;;  %v1582_v62 = vmul.f32 0.5, %v1581_v41  ;;  %vm1557_vm8 = vmor %vm1555_vm6, %vm1556_vm7  ;;  %vm1995_vm12 = vcmask 523264  }
 0x24a   : > { %v1594_v54 = vmul.f32 %v4255_v17, %v1593_v45  ;;  %v1603_v57 = vsub.f32 1.5, %v1602_v46  ;;  %v1572_v3 = vmul.f32 0.5, %v1571_v47  ;;  %v1640_v46 = vld [vmem:[%s6606_s3 + $0x18] sm:$0xff] }
 0x24b   : > { %v1618_v58 = vsel %vm5074_vm10, %v4253_v15, %v1614_v50  ;;  %v1624_v60 = vmul.f32 %v4257_v21, %v1623_v52  ;;  %v1583_v14 = vsub.f32 1.5, %v1582_v62  ;;  %v1551_v15 = vmul.f32 %v5070_v43, %v1550_v63  ;;  %v1639_v50 = vld [vmem:[%s6606_s3 + $0x10] sm:$0xff]  ;;  %v1662_v62 = vld [vmem:[%s6609_s6 + $0x8] sm:$0xff]  ;;  %v1661_v63 = vld [vmem:[%s6609_s6] sm:$0xff] }
 0x24c   : > { %v1635_v0 = vmul.f32 %v1618_v58, %v1539_v49  ;;  %v1598_v1 = vsel %vm5084_vm11, %v4255_v17, %v1594_v54  ;;  %v1604_v2 = vmul.f32 %v5054_v25, %v1603_v57  ;;  %v5125_v17 = vpop.eup %4266  ;;  %v1573_v20 = vsub.f32 1.5, %v1572_v3  ;;  %v1668_v3 = vld [vmem:[%s6610_s7 + $0x18] sm:$0xff] }
 0x24d   : > { %v5109_v4 = vmul.f32 %v1598_v1, %v1537_v53  ;;  %v1628_v7 = vsel %vm5093_vm13, %v4257_v21, %v1624_v60  ;;  %v1584_v27 = vmul.f32 %v5056_v22, %v1583_v14  ;;  %v1560_v8 = vmul.f32 %v5125_v17, %v5067_v38  ;;  %v1641_v38 = vld [vmem:[%s6606_s3 + $0x20] sm:$0xff]  ;;  %v1534_v53 = vld [vmem:[%s6605_s2 + $0x8] sm:$0xff]  ;;  %v1664_v1 = vld [vmem:[%s6609_s6 + $0x18] sm:$0xff] }
 0x24e   : > { %1737 = vperm.xlu0 %4249, %v1635_v0   ;;  %v1651_v12 = vmul.f32 %v1635_v0, %v5010_v23  ;;  %v1636_v13 = vmul.f32 %v1628_v7, %v1540_v59  ;;  %v1608_v21 = vsel %vm5118_vm15, %v5054_v25, %v1604_v2  ;;  %v1552_v25 = vmul.f32 0.5, %v1551_v15  ;;  %v1665_v0 = vld [vmem:[%s6610_s7] sm:$0xff]  ;;  %v1666_v2 = vld [vmem:[%s6610_s7 + $0x8] sm:$0xff]  ;;  %v4123_v14 = vld [vmem:[%s5223_s15 + $0x398] sm:$0xff] }
 0x24f   : > { %1727 = vperm.xlu2 %4250, %v5109_v4   ;;  %v1634_v24 = vmul.f32 %v1608_v21, %v1538_v5  ;;  %v1574_v28 = vmul.f32 %v5060_v30, %v1573_v20  ;;  %v1588_v29 = vsel %vm1587_vm4, %v5056_v22, %v1584_v27  ;;  %v1561_v32 = vmul.f32 %v5125_v17, %v1560_v8  ;;  %v1642_v22 = vld [vmem:[%s6606_s3 + $0x28] sm:$0xff]  ;;  %v1689_v15 = vld [vmem:[%s5223_s15 + $0x100] sm:$0xff]  ;;  %v1699_v21 = vld [vmem:[%s5223_s15 + $0x190] sm:$0xff] }
 0x250   : > { %v1659_v18 = vsub.f32 %v1643_v6, %v1651_v12  ;;  %v1652_v23 = vmul.f32 %v1636_v13, %v5016_v37  ;;  %v1553_v31 = vsub.f32 1.5, %v1552_v25  ;;  %v1632_v35 = vmul.f32 %v1588_v29, %v1536_v10  ;;  %v1697_v12 = vld [vmem:[%s5223_s15 + $0x180] sm:$0xff]  ;;  %v1698_v5 = vld [vmem:[%s5223_s15 + $0x188] sm:$0xff]  ;;  %v1692_v27 = vld [vmem:[%s5223_s15 + $0x118] sm:$0xff] }
 0x251   : > { %v1578_v34 = vsel %vm1577_vm5, %v5060_v30, %v1574_v28  ;;  %v1650_v36 = vmul.f32 %v1634_v24, %v5020_v42  ;;  %v1562_v41 = vmul.f32 0.5, %v1561_v32  ;;  %v1533_v30 = vld [vmem:[%s6605_s2] sm:$0xff]  ;;  %vm1566_vm10 = vweird.f32 %v5125_v17  ;;  %v1700_v28 = vld [vmem:[%s5223_s15 + $0x198] sm:$0xff] }
 0x252   : > { %1809 = vperm.xlu1 %4251, %v1659_v18   ;;  %v1660_v37 = vsub.f32 %v1644_v26, %v1652_v23  ;;  %v1631_v39 = vmul.f32 %v1578_v34, %v1535_v19  ;;  %v1554_v40 = vmul.f32 %v5070_v43, %v1553_v31  ;;  %v1648_v16 = vmul.f32 %v1632_v35, %v5024_v48  ;;  %vm1567_vm11 = vmor %vm1565_vm9, %vm1566_vm10  ;;  %v1691_v18 = vld [vmem:[%s5223_s15 + $0x110] sm:$0xff]  ;;  %v1693_v20 = vld [vmem:[%s5223_s15 + $0x140] sm:$0xff] }
 0x253   : > { %v1658_v44 = vsub.f32 %v1642_v22, %v1650_v36  ;;  %v1563_v45 = vsub.f32 1.5, %v1562_v41  ;;  %v1649_v51 = vmul.f32 %v5109_v4, %v5012_v33  ;;  %v1667_v4 = vld [vmem:[%s6610_s7 + $0x10] sm:$0xff]  ;;  %v1696_v31 = vld [vmem:[%s5223_s15 + $0x158] sm:$0xff]  ;;  %v1681_v32 = vld [vmem:[%s5223_s15 + $0x80] sm:$0xff] }
 0x254   : > { %v1558_v42 = vsel %vm1557_vm8, %v5070_v43, %v1554_v40  ;;  %v1647_v49 = vmul.f32 %v1631_v39, %v5028_v55  ;;  %v1656_v48 = vsub.f32 %v1640_v46, %v1648_v16  ;;  %v1695_v26 = vld [vmem:[%s5223_s15 + $0x150] sm:$0xff]  ;;  %v1701_v41 = vld [vmem:[%s5223_s15 + $0x1c0] sm:$0xff]  ;;  %v4121_v46 = vld [vmem:[%s5223_s15 + $0x388] sm:$0xff] }
 0x255   : > { %v1629_v47 = vmul.f32 %v1558_v42, %v1533_v30  ;;  %v1564_v43 = vmul.f32 %v5125_v17, %v1563_v45  ;;  %v1657_v33 = vsub.f32 %v1641_v38, %v1649_v51  ;;  %v1683_v36 = vld [vmem:[%s5223_s15 + $0x90] sm:$0xff]  ;;  %v4120_v45 = vld [vmem:[%s5223_s15 + $0x380] sm:$0xff]  ;;  %v1704_v38 = vld [vmem:[%s5223_s15 + $0x1d8] sm:$0xff] }
 0x256   : > { %1742 = vperm.xlu0 %4249, %v1636_v13   ;;  %v1655_v52 = vsub.f32 %v1639_v50, %v1647_v49  ;;  %v4122_v13 = vld [vmem:[%s5223_s15 + $0x390] sm:$0xff]  ;;  %v1702_v50 = vld [vmem:[%s5223_s15 + $0x1c8] sm:$0xff] }
 0x257   : > { %1732 = vperm.xlu2 %4250, %v1634_v24   ;;  %v1645_v55 = vmul.f32 %v1629_v47, %v5032_v61  ;;  %v1568_v54 = vsel %vm1567_vm11, %v5125_v17, %v1564_v43  ;;  %v1638_v61 = vld [vmem:[%s6606_s3 + $0x8] sm:$0xff]  ;;  %v1703_v51 = vld [vmem:[%s5223_s15 + $0x1d0] sm:$0xff] }
 0x258   : > { %v1630_v57 = vmul.f32 %v1568_v54, %v1534_v53  ;;  %v1690_v17 = vld [vmem:[%s5223_s15 + $0x108] sm:$0xff] }
 0x259   : > { %v1653_v58 = vsub.f32 %v1637_v56, %v1645_v55  ;;  %v1694_v24 = vld [vmem:[%s5223_s15 + $0x148] sm:$0xff] }
 0x25a   : > { %1814 = vperm.xlu1 %4251, %v1660_v37   ;;  %v1646_v59 = vmul.f32 %v1630_v57, %v5045_v11  ;;  %v1663_v11 = vld [vmem:[%s6609_s6 + $0x10] sm:$0xff] }
 0x25c   : > { %v1654_v60 = vsub.f32 %v1638_v61, %v1646_v59 }
 0x25e   : > { %1722 = vperm.xlu0 %4249, %v1632_v35   ;;  %v1682_v35 = vld [vmem:[%s5223_s15 + $0x88] sm:$0xff] }
 0x25f   : > { %1717 = vperm.xlu2 %4250, %v1631_v39   ;;  %v1684_v39 = vld [vmem:[%s5223_s15 + $0x98] sm:$0xff] }
 0x262   : > { %1804 = vperm.xlu1 %4251, %v1658_v44  }
 0x266   : > { %1707 = vperm.xlu0 %4249, %v1629_v47  }
 0x267   : > { %1794 = vperm.xlu2 %4250, %v1656_v48  }
 0x26a   : > { %1789 = vperm.xlu1 %4251, %v1655_v52  }
 0x26e   : > { %1799 = vperm.xlu0 %4249, %v1657_v33  }
 0x26f   : > { %1779 = vperm.xlu2 %4250, %v1653_v58  }
 0x272   : > { %1712 = vperm.xlu1 %4251, %v1630_v57  }
 0x276   : > { %1784 = vperm.xlu0 %4249, %v1654_v60  }
 0x277   : > { %2085 = vperm.xlu2 %4250, %v1662_v62  }
 0x27a   : > { %2080 = vperm.xlu1 %4251, %v1661_v63  }
 0x27e   : > { %2090 = vperm.xlu0 %4249, %v1663_v11  }
 0x27f   : > { %2148 = vperm.xlu2 %4250, %v1665_v0   ;;  %v4112_v0 = vld [vmem:[%s5223_s15 + $0x300] sm:$0xff] }
 0x282   : > { %2095 = vperm.xlu1 %4251, %v1664_v1   ;;  %v4116_v1 = vld [vmem:[%s5223_s15 + $0x340] sm:$0xff] }
 0x286   : > { %2153 = vperm.xlu0 %4249, %v1666_v2   ;;  %v4113_v2 = vld [vmem:[%s5223_s15 + $0x308] sm:$0xff] }
 0x287   : > { %2163 = vperm.xlu2 %4250, %v1668_v3  }
 0x28a   : > { %2158 = vperm.xlu1 %4251, %v1667_v4  }
 0x2a9   : > { %v5217_v6 = vpop.permute.xlu2 %1727 }
 0x2aa   : > { %v5239_v37 = vmul.f32 %v5217_v6, %v1689_v15  ;;  %v5242_v10 = vmul.f32 %v5217_v6, %v1690_v17  ;;  %v5245_v29 = vmul.f32 %v5217_v6, %v1691_v18  ;;  %v5267_v42 = vmul.f32 %v5217_v6, %v1692_v27 }
 0x2b1   : > { %v5221_v7 = vpop.permute.xlu2 %1732 }
 0x2b2   : > { %v5258_v44 = vmul.f32 %v5221_v7, %v1693_v20  ;;  %v5261_v16 = vmul.f32 %v5221_v7, %v1694_v24  ;;  %v5264_v30 = vmul.f32 %v5221_v7, %v1695_v26  ;;  %v5279_v55 = vmul.f32 %v5221_v7, %v1696_v31  ;;  %v4124_v31 = vld [vmem:[%s5223_s15 + $0x3c0] sm:$0xff] }
 0x2b3   : > { %v5308_v20 = vmul.f32 %v4112_v0, %v5217_v6  ;;  %v5311_v24 = vmul.f32 %v4116_v1, %v5221_v7  ;;  %v5314_v26 = vmul.f32 %v4113_v2, %v5217_v6 }
 0x2b9   : > { %v5271_v47 = vpop.permute.xlu2 %1717 }
 0x2ba   : > { %v5282_v53 = vmul.f32 %v5271_v47, %v1681_v32  ;;  %v5285_v54 = vmul.f32 %v5271_v47, %v1682_v35  ;;  %v5288_v56 = vmul.f32 %v5271_v47, %v1683_v36  ;;  %v5291_v33 = vmul.f32 %v5271_v47, %v1684_v39  ;;  %v1685_v35 = vld [vmem:[%s5223_s15 + $0xc0] sm:$0xff]  ;;  %v1686_v36 = vld [vmem:[%s5223_s15 + $0xc8] sm:$0xff]  ;;  %v1687_v39 = vld [vmem:[%s5223_s15 + $0xd0] sm:$0xff] }
 0x2c0   : > { %v1738_v9 = vpop.permute.xlu0 %1737 }
 0x2c1   : > { %v2564_v25 = vmul.f32 %v4122_v13, %v1738_v9  ;;  %v2565_v8 = vmul.f32 %v4123_v14, %v1738_v9  ;;  %v1769_v19 = vmul.f32 %v1738_v9, %v1697_v12  ;;  %v1770_v34 = vmul.f32 %v1738_v9, %v1698_v5  ;;  %v4117_v5 = vld [vmem:[%s5223_s15 + $0x348] sm:$0xff] }
 0x2c2   : > { %v1771_v52 = vmul.f32 %v1738_v9, %v1699_v21  ;;  %v1772_v58 = vmul.f32 %v1738_v9, %v1700_v28  ;;  %v2562_v59 = vmul.f32 %v4120_v45, %v1738_v9  ;;  %v2563_v61 = vmul.f32 %v4121_v46, %v1738_v9 }
 0x2c3   : > { %v5332_v45 = vmul.f32 %v4117_v5, %v5221_v7 }
 0x2c4   : > { %v1810_v23 = vpop.permute.xlu1 %1809 }
 0x2c5   : > { %v5252_v22 = vadd.f32 %v2564_v25, %v1810_v23  ;;  %v5254_v40 = vadd.f32 %v2565_v8, %v1810_v23  ;;  %v1841_v48 = vadd.f32 %v1810_v23, %v1769_v19  ;;  %v1842_v43 = vadd.f32 %v1810_v23, %v1770_v34 }
 0x2c6   : > { %v1843_v57 = vadd.f32 %v1810_v23, %v1771_v52  ;;  %v1844_v13 = vadd.f32 %v1810_v23, %v1772_v58  ;;  %v2594_v9 = vadd.f32 %v2562_v59, %v1810_v23  ;;  %v2595_v21 = vadd.f32 %v2563_v61, %v1810_v23  ;;  %v4125_v23 = vld [vmem:[%s5223_s15 + $0x3c8] sm:$0xff]  ;;  %v4126_v52 = vld [vmem:[%s5223_s15 + $0x3d0] sm:$0xff] }
 0x2c7   : > { %v1873_v4 = vmax.f32 %v1841_v48, 0.0  ;;  %v1874_v12 = vmax.f32 %v1842_v43, 0.0 }
 0x2c8   : > { %v5273_v49 = vpop.permute.xlu0 %1742  ;;  %v1875_v19 = vmax.f32 %v1843_v57, 0.0  ;;  %v1876_v34 = vmax.f32 %v1844_v13, 0.0 }
 0x2c9   : > { %v1773_v60 = vmul.f32 %v5273_v49, %v1701_v41  ;;  %v1774_v62 = vmul.f32 %v5273_v49, %v1702_v50  ;;  %v1775_v63 = vmul.f32 %v5273_v49, %v1703_v51  ;;  %v1776_v11 = vmul.f32 %v5273_v49, %v1704_v38  ;;  %v1688_v51 = vld [vmem:[%s5223_s15 + $0xd8] sm:$0xff] }
 0x2ca   : > { %v5329_v41 = vmax.f32 %v2594_v9, 0.0  ;;  %v5336_v48 = vmul.f32 %v1873_v4, %v1873_v4  ;;  %v5341_v43 = vmul.f32 %v1874_v12, %v1874_v12  ;;  %v2566_v58 = vmul.f32 %v4124_v31, %v5273_v49 }
 0x2cb   : > { %v2567_v59 = vmul.f32 %v4125_v23, %v5273_v49  ;;  %v2568_v2 = vmul.f32 %v4126_v52, %v5273_v49  ;;  %v5383_v5 = vmul.f32 %v1876_v34, %v1876_v34 }
 0x2cc   : > { %v5300_v3 = vpop.permute.xlu1 %1814 }
 0x2cd   : > { %v1845_v14 = vadd.f32 %v5300_v3, %v1773_v60  ;;  %v1846_v15 = vadd.f32 %v5300_v3, %v1774_v62  ;;  %v1847_v17 = vadd.f32 %v5300_v3, %v1775_v63  ;;  %v1848_v18 = vadd.f32 %v5300_v3, %v1776_v11  ;;  %6667 = vst [vmem:[#allocation14_spill] sm:$0xff] %v5383_v5 }
 0x2ce   : > { %v5358_v63 = vmax.f32 %v2595_v21, 0.0  ;;  %v2598_v1 = vadd.f32 %v2566_v58, %v5300_v3 }
 0x2cf   : > { %v1877_v27 = vmax.f32 %v1845_v14, 0.0  ;;  %v5316_v25 = vmax.f32 %v1846_v15, 0.0  ;;  %v5318_v8 = vmax.f32 %v1847_v17, 0.0  ;;  %v5320_v28 = vmax.f32 %v1848_v18, 0.0  ;;  %v4127_v15 = vld [vmem:[%s5223_s15 + $0x3d8] sm:$0xff]  ;;  %v5379_v17 = vpop.permute.xlu2 %1794 }
 0x2d0   : > { %v5324_v32 = vpop.permute.xlu0 %1722  ;;  %6666 = vst [vmem:[#allocation13_spill] sm:$0xff] %v5379_v17  ;;  %v5381_v18 = vmul.f32 %v1875_v19, %v1875_v19  ;;  %v5393_v23 = vmax.f32 %v2598_v1, 0.0 }
 0x2d1   : > { %v5334_v46 = vpack.c.bf16 %v1877_v27, %v1873_v4  ;;  %v5339_v50 = vpack.c.bf16 %v5316_v25, %v1874_v12  ;;  %v5346_v38 = vpack.c.bf16 %v5318_v8, %v1875_v19  ;;  %v5349_v57 = vpack.c.bf16 %v5320_v28, %v1876_v34 }
 0x2d2   : > { %v1757_v61 = vmul.f32 %v5324_v32, %v1685_v35  ;;  %v1758_v60 = vmul.f32 %v5324_v32, %v1686_v36  ;;  %v1759_v62 = vmul.f32 %v5324_v32, %v1687_v39  ;;  %v1760_v0 = vmul.f32 %v5324_v32, %v1688_v51  ;;  %6669 = vst [vmem:[#allocation16_spill] sm:$0xff] %v5393_v23 }
 0x2d3   : > { %2006 = vmatpush.bf16.msra.mxu0 %v5334_v46  ;;  %2025 = vmatpush.bf16.msra.mxu1 %v5339_v50  ;;  %v5368_v4 = vmax.f32 %v5252_v22, 0.0  ;;  %v2599_v22 = vadd.f32 %v2567_v59, %v5300_v3  ;;  %v5397_v19 = vmul.f32 %v5329_v41, %v5329_v41  ;;  %v5401_v34 = vmul.f32 %v5358_v63, %v5358_v63  ;;  %v1673_v59 = vld [vmem:[%s5223_s15] sm:$0xff] }
 0x2d4   : > { %2044 = vmatpush.bf16.msra.mxu2 %v5346_v38  ;;  %2063 = vmatpush.bf16.msra.mxu3 %v5349_v57  ;;  %v5362_v11 = vpop.permute.xlu1 %1804  ;;  %v1830_v21 = vadd.f32 %v5379_v17, %v1758_v60  ;;  %v2569_v35 = vmul.f32 %v4127_v15, %v5273_v49  ;;  %v5404_v58 = vmul.f32 %v1877_v27, %v1877_v27 }
 0x2d5   : > { %6665 = vst [vmem:[#allocation12_spill] sm:$0xff] %v5368_v4  ;;  %v1837_v12 = vadd.f32 %v5362_v11, %v5258_v44  ;;  %v1838_v13 = vadd.f32 %v5362_v11, %v5261_v16  ;;  %v1839_v9 = vadd.f32 %v5362_v11, %v5264_v30  ;;  %v1840_v14 = vadd.f32 %v5362_v11, %v5279_v55 }
 0x2d6   : > { %v2600_v44 = vadd.f32 %v2568_v2, %v5300_v3  ;;  %v1829_v16 = vadd.f32 %v5379_v17, %v1757_v61  ;;  %v1831_v30 = vadd.f32 %v5379_v17, %v1759_v62  ;;  %v1832_v55 = vadd.f32 %v5379_v17, %v1760_v0  ;;  %6670 = vst [vmem:[#allocation17_spill] sm:$0xff] %v5397_v19 }
 0x2d7   : > { %6671 = vst [vmem:[#allocation18_spill] sm:$0xff] %v5401_v34  ;;  %v1869_v36 = vmax.f32 %v1837_v12, 0.0  ;;  %v1870_v39 = vmax.f32 %v1838_v13, 0.0  ;;  %v1871_v51 = vmax.f32 %v1839_v9, 0.0  ;;  %v1872_v52 = vmax.f32 %v1840_v14, 0.0  ;;  %v1674_v12 = vld [vmem:[%s5223_s15 + $0x8] sm:$0xff] }
 0x2d8   : > { %v5391_v31 = vpop.permute.xlu0 %1707  ;;  %6672 = vst [vmem:[#allocation19_spill] sm:$0xff] %v5404_v58  ;;  %v5407_v61 = vmax.f32 %v2599_v22, 0.0  ;;  %v5409_v60 = vmax.f32 %v2600_v44, 0.0  ;;  %v5412_v62 = vadd.f32 %v2569_v35, %v5300_v3  ;;  %v1861_v0 = vmax.f32 %v1829_v16, 0.0  ;;  %v1675_v13 = vld [vmem:[%s5223_s15 + $0x10] sm:$0xff] }
 0x2d9   : > { %6668 = vst [vmem:[#allocation15_spill] sm:$0xff] %v5391_v31  ;;  %v5414_v1 = vmax.f32 %v1830_v21, 0.0  ;;  %v5416_v2 = vmax.f32 %v1831_v30, 0.0  ;;  %v5418_v49 = vmax.f32 %v1832_v55, 0.0  ;;  %v5424_v27 = vmul.f32 %v5316_v25, %v5316_v25 }
 0x2da   : > { %6673 = vst [vmem:[#allocation20_spill] sm:$0xff] %v5407_v61  ;;  %v5428_v9 = vmul.f32 %v5318_v8, %v5318_v8  ;;  %v5432_v3 = vmul.f32 %v5320_v28, %v5320_v28  ;;  %v5438_v15 = vpack.c.bf16 %v5393_v23, %v5329_v41  ;;  %v5440_v22 = vmul.f32 %v1869_v36, %v1869_v36  ;;  %v1676_v8 = vld [vmem:[%s5223_s15 + $0x18] sm:$0xff] }
 0x2db   : > { %6674 = vst [vmem:[#allocation21_spill] sm:$0xff] %v5409_v60  ;;  %v5442_v44 = vmul.f32 %v1870_v39, %v1870_v39  ;;  %v5444_v25 = vmul.f32 %v1871_v51, %v1871_v51  ;;  %v5446_v16 = vmul.f32 %v1872_v52, %v1872_v52  ;;  %v1745_v28 = vmul.f32 %v5391_v31, %v1673_v59 }
 0x2dc   : > { %6675 = vst [vmem:[#allocation22_spill] sm:$0xff] %v5424_v27  ;;  %v5434_v14 = vpop.permute.xlu1 %1789  ;;  %v1746_v30 = vmul.f32 %v5391_v31, %v1674_v12  ;;  %v1747_v55 = vmul.f32 %v5391_v31, %v1675_v13  ;;  %v5454_v41 = vmul.f32 %v1861_v0, %v1861_v0  ;;  %v5458_v35 = vmul.f32 %v5414_v1, %v5414_v1 }
 0x2dd   : > { %6676 = vst [vmem:[#allocation23_spill] sm:$0xff] %v5428_v9  ;;  %v1825_v21 = vadd.f32 %v5434_v14, %v5282_v53  ;;  %v5462_v34 = vmul.f32 %v5416_v2, %v5416_v2  ;;  %v5466_v19 = vmul.f32 %v5418_v49, %v5418_v49  ;;  %v1826_v59 = vadd.f32 %v5434_v14, %v5285_v54 }
 0x2de   : > { %6677 = vst [vmem:[#allocation24_spill] sm:$0xff] %v5432_v3  ;;  %v1827_v12 = vadd.f32 %v5434_v14, %v5288_v56  ;;  %v1828_v13 = vadd.f32 %v5434_v14, %v5291_v33  ;;  %v1748_v23 = vmul.f32 %v5391_v31, %v1676_v8  ;;  %v5477_v3 = vpop.permute.xlu2 %1779 }
 0x2df   : > { %6678 = vst [vmem:[#allocation25_spill] sm:$0xff] %v5434_v14  ;;  %v1857_v58 = vmax.f32 %v1825_v21, 0.0  ;;  %v1817_v33 = vadd.f32 %v5477_v3, %v1745_v28  ;;  %v1818_v8 = vadd.f32 %v5477_v3, %v1746_v30  ;;  %v1678_v21 = vld [vmem:[%s5223_s15 + $0x48] sm:$0xff]  ;;  %v5503_v30 = vpack.c.bf16 %v5407_v61, %v5358_v63 }
 0x2e0   : > { %6679 = vst [vmem:[#allocation26_spill] sm:$0xff] %v5438_v15  ;;  %v5468_v53 = vpop.permute.xlu0 %1799  ;;  %v1819_v15 = vadd.f32 %v5477_v3, %v1747_v55  ;;  %v1820_v28 = vadd.f32 %v5477_v3, %v1748_v23 }
 0x2e1   : > { %6680 = vst [vmem:[#allocation27_spill] sm:$0xff] %v5477_v3  ;;  %v1833_v9 = vadd.f32 %v5468_v53, %v5239_v37  ;;  %v1834_v27 = vadd.f32 %v5468_v53, %v5242_v10  ;;  %v1835_v54 = vadd.f32 %v5468_v53, %v5245_v29  ;;  %v1836_v56 = vadd.f32 %v5468_v53, %v5267_v42  ;;  %v1677_v42 = vld [vmem:[%s5223_s15 + $0x40] sm:$0xff] }
 0x2e2   : > { %v1858_v29 = vmax.f32 %v1826_v59, 0.0  ;;  %6682 = vst [vmem:[#allocation29_spill] sm:$0xff] %v5503_v30  ;;  %v1679_v59 = vld [vmem:[%s5223_s15 + $0x50] sm:$0xff]  ;;  %v1849_v63 = vmax.f32 %v1817_v33, 0.0  ;;  %v1850_v61 = vmax.f32 %v1818_v8, 0.0  ;;  %v1680_v30 = vld [vmem:[%s5223_s15 + $0x58] sm:$0xff] }
 0x2e3   : > { %v1865_v31 = vmax.f32 %v1833_v9, 0.0  ;;  %v5490_v17 = vmax.f32 %v1834_v27, 0.0  ;;  %v5492_v37 = vmax.f32 %v1835_v54, 0.0  ;;  %v5494_v10 = vmax.f32 %v1836_v56, 0.0 }
 0x2e4   : > { %v5496_v14 = vpop.permute.xlu1 %1712  ;;  %v5507_v27 = vpack.c.bf16 %v5409_v60, %v5368_v4  ;;  %v1859_v54 = vmax.f32 %v1827_v12, 0.0  ;;  %v1860_v56 = vmax.f32 %v1828_v13, 0.0  ;;  %v1851_v13 = vmax.f32 %v1819_v15, 0.0 }
 0x2e5   : > { %6681 = vst [vmem:[#allocation28_spill] sm:$0xff] %v5496_v14  ;;  %v5509_v9 = vpack.c.bf16 %v1869_v36, %v1865_v31  ;;  %v5512_v55 = vpack.c.bf16 %v1870_v39, %v5490_v17  ;;  %v5516_v5 = vpack.c.bf16 %v1871_v51, %v5492_v37  ;;  %v5519_v23 = vpack.c.bf16 %v1872_v52, %v5494_v10 }
 0x2e6   : > { %6683 = vst [vmem:[#allocation30_spill] sm:$0xff] %v5507_v27  ;;  %v5524_v36 = vpack.c.bf16 %v1861_v0, %v1857_v58  ;;  %v1749_v39 = vmul.f32 %v5496_v14, %v1677_v42  ;;  %v1750_v12 = vmul.f32 %v5496_v14, %v1678_v21  ;;  %v1905_v52 = vmul.f32 %v1857_v58, %v1857_v58 }
 0x2e7   : > { %2007 = vmatpush.bf16.msra.mxu0 %v5509_v9  ;;  %2026 = vmatpush.bf16.msra.mxu1 %v5512_v55  ;;  %v5533_v33 = vpack.c.bf16 %v5414_v1, %v1858_v29  ;;  %v1751_v8 = vmul.f32 %v5496_v14, %v1679_v59  ;;  %v1852_v60 = vmax.f32 %v1820_v28, 0.0  ;;  %v1906_v0 = vmul.f32 %v1858_v29, %v1858_v29 }
 0x2e8   : > { %2045 = vmatpush.bf16.msra.mxu2 %v5516_v5  ;;  %2064 = vmatpush.bf16.msra.mxu3 %v5519_v23  ;;  %v5530_v51 = vpop.permute.xlu0 %1784  ;;  %v1752_v15 = vmul.f32 %v5496_v14, %v1680_v30  ;;  %v5540_v21 = vpack.c.bf16 %v5416_v2, %v1859_v54  ;;  %v1907_v27 = vmul.f32 %v1859_v54, %v1859_v54 }
 0x2e9   : > { %6684 = vst [vmem:[#allocation31_spill] sm:$0xff] %v5530_v51  ;;  %v1821_v4 = vadd.f32 %v5530_v51, %v1749_v39  ;;  %v1822_v42 = vadd.f32 %v5530_v51, %v1750_v12  ;;  %v5543_v3 = vpack.c.bf16 %v5418_v49, %v1860_v56  ;;  %v1823_v58 = vadd.f32 %v5530_v51, %v1751_v8 }
 0x2ea   : > { %6685 = vst [vmem:[#allocation32_spill] sm:$0xff] %v5533_v33  ;;  %v1908_v1 = vmul.f32 %v1860_v56, %v1860_v56  ;;  %v1824_v59 = vadd.f32 %v5530_v51, %v1752_v15  ;;  %v1913_v39 = vmul.f32 %v1865_v31, %v1865_v31  ;;  %v1897_v2 = vmul.f32 %v1849_v63, %v1849_v63  ;;  %v4177_v31 = vld [vmem:[%s6608_s5] sm:$0xff] }
 0x2eb   : > { %2008 = vmatpush.bf16.msra.mxu0 %v5524_v36  ;;  %2027 = vmatpush.bf16.msra.mxu1 %v5533_v33  ;;  %v1853_v29 = vmax.f32 %v1821_v4, 0.0  ;;  %v1854_v28 = vmax.f32 %v1822_v42, 0.0  ;;  %v1898_v30 = vmul.f32 %v1850_v61, %v1850_v61  ;;  %v1855_v49 = vmax.f32 %v1823_v58, 0.0 }
 0x2ec   : > { %2046 = vmatpush.bf16.msra.mxu2 %v5540_v21  ;;  %2065 = vmatpush.bf16.msra.mxu3 %v5543_v3  ;;  %v1899_v4 = vmul.f32 %v1851_v13, %v1851_v13  ;;  %v1856_v42 = vmax.f32 %v1824_v59, 0.0 }
 0x2ed   : > { %v5551_v54 = vpack.c.bf16 %v1853_v29, %v1849_v63  ;;  %v1901_v12 = vmul.f32 %v1853_v29, %v1853_v29  ;;  %v5553_v8 = vpack.c.bf16 %v1854_v28, %v1850_v61  ;;  %v1902_v14 = vmul.f32 %v1854_v28, %v1854_v28 }
 0x2ee   : > { %v5555_v33 = vpack.c.bf16 %v1855_v49, %v1851_v13  ;;  %v1903_v56 = vmul.f32 %v1855_v49, %v1855_v49  ;;  %v1900_v63 = vmul.f32 %v1852_v60, %v1852_v60  ;;  %v5563_v58 = vpack.c.bf16 %v1856_v42, %v1852_v60 }
 0x2ef   : > { %v1929_v15 = vadd.f32 %v1901_v12, %v1897_v2  ;;  %2009 = vmatpush.bf16.msra.mxu0 %v5551_v54  ;;  %v1942_v51 = vadd.f32 %v1902_v14, %v1898_v30  ;;  %2028 = vmatpush.bf16.msra.mxu1 %v5553_v8  ;;  %v1904_v13 = vmul.f32 %v1856_v42, %v1856_v42  ;;  %v5571_v14 = vmax.f32 %v5412_v62, 0.0 }
 0x2f0   : > { %v1955_v61 = vadd.f32 %v1903_v56, %v1899_v4  ;;  %2047 = vmatpush.bf16.msra.mxu2 %v5555_v33  ;;  %v1914_v29 = vmul.f32 %v5490_v17, %v5490_v17  ;;  %2066 = vmatpush.bf16.msra.mxu3 %v5563_v58  ;;  %v1915_v62 = vmul.f32 %v5492_v37, %v5492_v37  ;;  %v4118_v37 = vld [vmem:[%s5223_s15 + $0x350] sm:$0xff] }
 0x2f1   : > { %v1930_v28 = vadd.f32 %v1929_v15, %v1905_v52  ;;  %v1943_v59 = vadd.f32 %v1942_v51, %v1906_v0  ;;  %v1968_v30 = vadd.f32 %v1904_v13, %v1900_v63  ;;  %v2560_v42 = vmul.f32 %v4118_v37, %v5221_v7  ;;  %v4108_v15 = vld [vmem:[%s5223_s15 + $0x2c0] sm:$0xff] }
 0x2f2   : > { %v1956_v2 = vadd.f32 %v1955_v61, %v1907_v27  ;;  %4087 = vmatmul.msk.bf16.vlgmr.msra.gmra.mxu0 %vm1995_vm12, %v4177_v31  ;;  %4089 = vmatmul.msk.bf16.vlgmr.msra.gmra.mxu1 %vm1995_vm12, %v4177_v31  ;;  %v2550_v13 = vmul.f32 %v4108_v15, %v5324_v32 }
 0x2f3   : > { %2386 = vmatpush.bf16.xpose.msrb.mxu0 %v5334_v46  ;;  %2405 = vmatpush.bf16.xpose.msrb.mxu1 %v5339_v50  ;;  %v2586_v46 = vadd.f32 %v5308_v20, %v5468_v53  ;;  %v1931_v17 = vadd.f32 %v1930_v28, %v5454_v41  ;;  %v1944_v60 = vadd.f32 %v1943_v59, %v5458_v35  ;;  %v5582_v50 = vmax.f32 %v5254_v40, 0.0  ;;  %v4109_v28 = vld [vmem:[%s5223_s15 + $0x2c8] sm:$0xff]  ;;  %v6686_v59 = vld [vmem:[#allocation14_spill] sm:$0xff] }
 0x2f4   : > { %2424 = vmatpush.bf16.xpose.msrb.mxu2 %v5346_v38  ;;  %2443 = vmatpush.bf16.xpose.msrb.mxu3 %v5349_v57  ;;  %v2590_v38 = vadd.f32 %v5311_v24, %v5362_v11  ;;  %v1916_v20 = vmul.f32 %v5494_v10, %v5494_v10  ;;  %v1957_v41 = vadd.f32 %v1956_v2, %v5462_v34  ;;  %v4114_v57 = vld [vmem:[%s5223_s15 + $0x310] sm:$0xff]  ;;  %v4115_v10 = vld [vmem:[%s5223_s15 + $0x318] sm:$0xff] }
 0x2f5   : > { %v1969_v35 = vadd.f32 %v1968_v30, %v1908_v1  ;;  %4091 = vmatmul.msk.bf16.vlgmr.msra.gmra.mxu2 %vm1995_vm12, %v4177_v31  ;;  %v1932_v27 = vadd.f32 %v1931_v17, %v1913_v39  ;;  %v1945_v51 = vadd.f32 %v1944_v60, %v1914_v29  ;;  %4093 = vmatmul.msk.bf16.vlgmr.msra.gmra.mxu3 %vm1995_vm12, %v4177_v31  ;;  %v2618_v0 = vmax.f32 %v2586_v46, 0.0  ;;  %v4104_v31 = vld [vmem:[%s5223_s15 + $0x280] sm:$0xff]  ;;  %v4105_v29 = vld [vmem:[%s5223_s15 + $0x288] sm:$0xff]  ;;  %v4106_v46 = vld [vmem:[%s5223_s15 + $0x290] sm:$0xff] }
 0x2f6   : > { %v5596_v40 = vpack.c.bf16 %v5571_v14, %v5582_v50  ;;  %v2587_v24 = vadd.f32 %v5314_v26, %v5468_v53  ;;  %v1958_v34 = vadd.f32 %v1957_v41, %v1915_v62  ;;  %v2591_v1 = vadd.f32 %v5332_v45, %v5362_v11  ;;  %v6687_v60 = vld [vmem:[#allocation25_spill] sm:$0xff] }
 0x2f7   : > { %v1970_v52 = vadd.f32 %v1969_v35, %v5466_v19  ;;  %v1933_v39 = vadd.f32 %v1932_v27, %v5440_v22  ;;  %v1946_v49 = vadd.f32 %v1945_v51, %v5442_v44  ;;  %v2622_v12 = vmax.f32 %v2590_v38, 0.0  ;;  %v6688_v62 = vld [vmem:[#allocation13_spill] sm:$0xff]  ;;  %v4111_v51 = vld [vmem:[%s5223_s15 + $0x2d8] sm:$0xff] }
 0x2f8   : > { %v2556_v4 = vmul.f32 %v4114_v57, %v5217_v6  ;;  %v1959_v26 = vadd.f32 %v1958_v34, %v5444_v25  ;;  %v2557_v19 = vmul.f32 %v4115_v10, %v5217_v6  ;;  %v2619_v44 = vmax.f32 %v2587_v24, 0.0  ;;  %v4178_v41 = vld [vmem:[%s6608_s5 + $0x8] sm:$0xff] }
 0x2f9   : > { %v1971_v56 = vadd.f32 %v1970_v52, %v1916_v20  ;;  %v5615_v45 = vadd.f32 %v1933_v39, %v5336_v48  ;;  %v5618_v22 = vadd.f32 %v1946_v49, %v5341_v43  ;;  %v5628_v63 = vpack.c.bf16 %v2622_v12, %v2618_v0  ;;  %v4107_v39 = vld [vmem:[%s5223_s15 + $0x298] sm:$0xff]  ;;  %v4096_v49 = vld [vmem:[%s5223_s15 + $0x200] sm:$0xff] }
 0x2fa   : > { %v2588_v25 = vadd.f32 %v2556_v4, %v5468_v53  ;;  %v5625_v6 = vadd.f32 %v1959_v26, %v5381_v18  ;;  %v2623_v43 = vmax.f32 %v2591_v1, 0.0  ;;  %v2589_v61 = vadd.f32 %v2557_v19, %v5468_v53  ;;  %v4110_v18 = vld [vmem:[%s5223_s15 + $0x2d0] sm:$0xff] }
 0x2fb   : > { %2387 = vmatpush.bf16.xpose.msrb.mxu0 %v5509_v9  ;;  %2406 = vmatpush.bf16.xpose.msrb.mxu1 %v5512_v55  ;;  %v4119_v9 = vld [vmem:[%s5223_s15 + $0x358] sm:$0xff]  ;;  %v1972_v48 = vadd.f32 %v1971_v56, %v5446_v16  ;;  %v2592_v55 = vadd.f32 %v2560_v42, %v5362_v11  ;;  %v5641_v16 = vmul.f32 %v2618_v0, %v2618_v0 }
 0x2fc   : > { %2425 = vmatpush.bf16.xpose.msrb.mxu2 %v5516_v5  ;;  %2444 = vmatpush.bf16.xpose.msrb.mxu3 %v5519_v23  ;;  %v2546_v5 = vmul.f32 %v4104_v31, %v5271_v47  ;;  %v5643_v30 = vmul.f32 %v2622_v12, %v2622_v12  ;;  %v2561_v23 = vmul.f32 %v4119_v9, %v5221_v7  ;;  %v2620_v53 = vmax.f32 %v2588_v25, 0.0  ;;  %v6689_v12 = vld [vmem:[#allocation32_spill] sm:$0xff]  ;;  %v6690_v25 = vld [vmem:[#allocation15_spill] sm:$0xff] }
 0x2fd   : > { %v5639_v2 = vadd.f32 %v1972_v48, %v6686_v59  ;;  %v5647_v17 = vpack.c.bf16 %v2623_v43, %v2619_v44  ;;  %v2582_v20 = vadd.f32 %v2550_v13, %v6688_v62  ;;  %v2547_v57 = vmul.f32 %v4105_v29, %v5271_v47  ;;  %v4097_v48 = vld [vmem:[%s5223_s15 + $0x208] sm:$0xff] }
 0x2fe   : > { %v2578_v38 = vadd.f32 %v2546_v5, %v6687_v60  ;;  %v2593_v35 = vadd.f32 %v2561_v23, %v5362_v11  ;;  %v2551_v7 = vmul.f32 %v4109_v28, %v5324_v32  ;;  %v2552_v27 = vmul.f32 %v4110_v18, %v5324_v32  ;;  %v6691_v59 = vld [vmem:[#allocation28_spill] sm:$0xff] }
 0x2ff   : > { %v5659_v24 = vmul.f32 %v2619_v44, %v2619_v44  ;;  %v5661_v37 = vmax.f32 %v2592_v55, 0.0  ;;  %v5663_v10 = vmax.f32 %v2589_v61, 0.0  ;;  %v2548_v34 = vmul.f32 %v4106_v46, %v5271_v47  ;;  %v4100_v44 = vld [vmem:[%s5223_s15 + $0x240] sm:$0xff] }
 0x300   : > { %v2610_v52 = vmax.f32 %v2578_v38, 0.0  ;;  %v2614_v0 = vmax.f32 %v2582_v20, 0.0  ;;  %v2579_v11 = vadd.f32 %v2547_v57, %v6687_v60  ;;  %v2583_v1 = vadd.f32 %v2551_v7, %v6688_v62  ;;  %v6692_v46 = vld [vmem:[#allocation27_spill] sm:$0xff] }
 0x301   : > { %v2580_v4 = vadd.f32 %v2548_v34, %v6687_v60  ;;  %v2584_v26 = vadd.f32 %v2552_v27, %v6688_v62  ;;  %v5677_v56 = vmul.f32 %v2623_v43, %v2623_v43  ;;  %v5680_v42 = vpack.c.bf16 %v5661_v37, %v2620_v53  ;;  %v4101_v43 = vld [vmem:[%s5223_s15 + $0x248] sm:$0xff]  ;;  %v4099_v57 = vld [vmem:[%s5223_s15 + $0x218] sm:$0xff] }
 0x302   : > { %4088 = vmatmul.msk.bf16.gmra.mxu0 %vm1995_vm12, %v4178_v41  ;;  %v5682_v19 = vmul.f32 %v2620_v53, %v2620_v53  ;;  %v5684_v31 = vmax.f32 %v2593_v35, 0.0  ;;  %4090 = vmatmul.msk.bf16.gmra.mxu1 %vm1995_vm12, %v4178_v41  ;;  %v2615_v15 = vmax.f32 %v2583_v1, 0.0  ;;  %v2538_v9 = vmul.f32 %v4096_v49, %v6690_v25  ;;  %v4102_v35 = vld [vmem:[%s5223_s15 + $0x250] sm:$0xff] }
 0x303   : > { %2388 = vmatpush.bf16.xpose.msrb.mxu0 %v5524_v36  ;;  %2407 = vmatpush.bf16.xpose.msrb.mxu1 %v6689_v12  ;;  %v2553_v36 = vmul.f32 %v4111_v51, %v5324_v32  ;;  %v2549_v32 = vmul.f32 %v4107_v39, %v5271_v47  ;;  %v5700_v61 = vmul.f32 %v2610_v52, %v2610_v52  ;;  %v4098_v47 = vld [vmem:[%s5223_s15 + $0x210] sm:$0xff]  ;;  %v2612_v13 = vmax.f32 %v2580_v4, 0.0 }
 0x304   : > { %2426 = vmatpush.bf16.xpose.msrb.mxu2 %v5540_v21  ;;  %2445 = vmatpush.bf16.xpose.msrb.mxu3 %v5543_v3  ;;  %v2611_v21 = vmax.f32 %v2579_v11, 0.0  ;;  %v5696_v55 = vpack.c.bf16 %v5684_v31, %v5663_v10  ;;  %v5698_v3 = vpack.c.bf16 %v2614_v0, %v2610_v52  ;;  %v5702_v5 = vmul.f32 %v2614_v0, %v2614_v0  ;;  %v4103_v11 = vld [vmem:[%s5223_s15 + $0x258] sm:$0xff] }
 0x305   : > { %4092 = vmatmul.msk.bf16.gmra.mxu2 %vm1995_vm12, %v4178_v41  ;;  %4094 = vmatmul.msk.bf16.gmra.mxu3 %vm1995_vm12, %v4178_v41  ;;  %v2616_v29 = vmax.f32 %v2584_v26, 0.0  ;;  %v2581_v28 = vadd.f32 %v2549_v32, %v6687_v60  ;;  %v2585_v18 = vadd.f32 %v2553_v36, %v6688_v62  ;;  %v2542_v23 = vmul.f32 %v4100_v44, %v6691_v59  ;;  %v6693_v60 = vld [vmem:[#allocation31_spill] sm:$0xff]  ;;  %v6694_v12 = vld [vmem:[#allocation26_spill] sm:$0xff] }
 0x306   : > { %v2570_v53 = vadd.f32 %v2538_v9, %v6692_v46  ;;  %v2539_v38 = vmul.f32 %v4097_v48, %v6690_v25  ;;  %v2543_v20 = vmul.f32 %v4101_v43, %v6691_v59  ;;  %v5714_v7 = vpack.c.bf16 %v2615_v15, %v2611_v21 }
 0x307   : > { %v2659_v41 = vmul.f32 %v2611_v21, %v2611_v21  ;;  %v2663_v27 = vmul.f32 %v2615_v15, %v2615_v15  ;;  %v2540_v51 = vmul.f32 %v4098_v47, %v6690_v25  ;;  %v2574_v62 = vadd.f32 %v2542_v23, %v6693_v60 }
 0x308   : > { %v2602_v34 = vmax.f32 %v2570_v53, 0.0  ;;  %v2571_v52 = vadd.f32 %v2539_v38, %v6692_v46  ;;  %v2575_v0 = vadd.f32 %v2543_v20, %v6693_v60  ;;  %v2544_v1 = vmul.f32 %v4102_v35, %v6691_v59  ;;  %v6697_v35 = vld [vmem:[#allocation19_spill] sm:$0xff] }
 0x309   : > { %v2572_v39 = vadd.f32 %v2540_v51, %v6692_v46  ;;  %v2541_v49 = vmul.f32 %v4099_v57, %v6690_v25  ;;  %v5729_v4 = vpack.c.bf16 %v2616_v29, %v2612_v13  ;;  %v2606_v26 = vmax.f32 %v2574_v62, 0.0 }
 0x30a   : > { %v2603_v36 = vmax.f32 %v2571_v52, 0.0  ;;  %v2607_v21 = vmax.f32 %v2575_v0, 0.0  ;;  %v2545_v32 = vmul.f32 %v4103_v11, %v6691_v59  ;;  %v2660_v25 = vmul.f32 %v2612_v13, %v2612_v13 }
 0x30b   : > { %2389 = vmatpush.bf16.xpose.msrb.mxu0 %v5551_v54  ;;  %2408 = vmatpush.bf16.xpose.msrb.mxu1 %v5553_v8  ;;  %v6695_v54 = vld [vmem:[#allocation29_spill] sm:$0xff]  ;;  %v6696_v8 = vld [vmem:[#allocation30_spill] sm:$0xff]  ;;  %v2604_v15 = vmax.f32 %v2572_v39, 0.0  ;;  %v2573_v44 = vadd.f32 %v2541_v49, %v6692_v46  ;;  %v2613_v9 = vmax.f32 %v2581_v28, 0.0  ;;  %v2650_v48 = vmul.f32 %v2602_v34, %v2602_v34 }
 0x30c   : > { %2427 = vmatpush.bf16.xpose.msrb.mxu2 %v5555_v33  ;;  %2446 = vmatpush.bf16.xpose.msrb.mxu3 %v5563_v58  ;;  %v2576_v33 = vadd.f32 %v2544_v1, %v6693_v60  ;;  %v2654_v43 = vmul.f32 %v2606_v26, %v2606_v26  ;;  %v2651_v47 = vmul.f32 %v2603_v36, %v2603_v36  ;;  %v2617_v38 = vmax.f32 %v2585_v18, 0.0 }
 0x30d   : > { %v2655_v23 = vmul.f32 %v2607_v21, %v2607_v21  ;;  %v2577_v58 = vadd.f32 %v2545_v32, %v6693_v60  ;;  %v2605_v59 = vmax.f32 %v2573_v44, 0.0  ;;  %v5742_v46 = vadd.f32 %v5615_v45, %v6697_v35 }
 0x30e   : > { %v2608_v53 = vmax.f32 %v2576_v33, 0.0  ;;  %v2682_v20 = vadd.f32 %v2654_v43, %v2650_v48  ;;  %v2652_v28 = vmul.f32 %v2604_v15, %v2604_v15  ;;  %v2664_v60 = vmul.f32 %v2616_v29, %v2616_v29  ;;  %v6698_v33 = vld [vmem:[#allocation22_spill] sm:$0xff] }
 0x30f   : > { %v2695_v13 = vadd.f32 %v2655_v23, %v2651_v47  ;;  %v2609_v51 = vmax.f32 %v2577_v58, 0.0  ;;  %v5746_v62 = vpack.c.bf16 %v2617_v38, %v2613_v9  ;;  %v2661_v52 = vmul.f32 %v2613_v9, %v2613_v9  ;;  %v6700_v47 = vld [vmem:[#allocation24_spill] sm:$0xff] }
 0x310   : > { %v2656_v57 = vmul.f32 %v2608_v53, %v2608_v53  ;;  %v2683_v18 = vadd.f32 %v2682_v20, %v5700_v61  ;;  %v2653_v1 = vmul.f32 %v2605_v59, %v2605_v59  ;;  %v2665_v45 = vmul.f32 %v2617_v38, %v2617_v38  ;;  %v6704_v20 = vld [vmem:[#allocation17_spill] sm:$0xff] }
 0x311   : > { %v2696_v0 = vadd.f32 %v2695_v13, %v2659_v41  ;;  %v2657_v39 = vmul.f32 %v2609_v51, %v2609_v51  ;;  %v5754_v32 = vadd.f32 %v5618_v22, %v6698_v33  ;;  %v6699_v41 = vld [vmem:[#allocation23_spill] sm:$0xff]  ;;  %v5762_v48 = vpack.c.bf16 %v2606_v26, %v2602_v34 }
 0x312   : > { %v2708_v11 = vadd.f32 %v2656_v57, %v2652_v28  ;;  %v2684_v49 = vadd.f32 %v2683_v18, %v5702_v5  ;;  %v5759_v9 = vadd.f32 %v5625_v6, %v6699_v41  ;;  %v5765_v5 = vpack.c.bf16 %v2607_v21, %v2603_v36  ;;  %v6701_v21 = vld [vmem:[#allocation16_spill] sm:$0xff] }
 0x313   : > { %2758 = vmatpush.bf16.msra.mxu0 %v6694_v12  ;;  %2777 = vmatpush.bf16.msra.mxu1 %v6695_v54  ;;  %v2697_v29 = vadd.f32 %v2696_v0, %v2663_v27  ;;  %v2721_v61 = vadd.f32 %v2657_v39, %v2653_v1  ;;  %v5769_v22 = vadd.f32 %v5639_v2, %v6700_v47 }
 0x314   : > { %2796 = vmatpush.bf16.msra.mxu2 %v6696_v8  ;;  %2815 = vmatpush.bf16.msra.mxu3 %v5596_v40  ;;  %v2709_v44 = vadd.f32 %v2708_v11, %v2660_v25  ;;  %v2685_v43 = vadd.f32 %v2684_v49, %v5641_v16  ;;  %v5772_v25 = vpack.c.bf16 %v2608_v53, %v2604_v15  ;;  %v6703_v53 = vld [vmem:[#allocation12_spill] sm:$0xff] }
 0x315   : > { %v2698_v27 = vadd.f32 %v2697_v29, %v5659_v24  ;;  %v2722_v58 = vadd.f32 %v2721_v61, %v2661_v52  ;;  %v2672_v6 = vmul.f32 %v5661_v37, %v5661_v37  ;;  %v5779_v16 = vpack.c.bf16 %v2609_v51, %v2605_v59  ;;  %v6706_v51 = vld [vmem:[#allocation21_spill] sm:$0xff] }
 0x316   : > { %v2710_v23 = vadd.f32 %v2709_v44, %v2664_v60  ;;  %v2686_v34 = vadd.f32 %v2685_v43, %v5643_v30  ;;  %v2669_v2 = vmul.f32 %v5663_v10, %v5663_v10  ;;  %v2678_v37 = vmul.f32 %v6701_v21, %v6701_v21  ;;  %v6702_v30 = vld [vmem:[#allocation20_spill] sm:$0xff] }
 0x317   : > { %2759 = vmatpush.bf16.msra.mxu0 %v5628_v63  ;;  %2778 = vmatpush.bf16.msra.mxu1 %v5647_v17  ;;  %v2699_v24 = vadd.f32 %v2698_v27, %v5677_v56  ;;  %v2723_v36 = vadd.f32 %v2722_v58, %v2665_v45  ;;  %v2679_v15 = vmul.f32 %v6702_v30, %v6702_v30  ;;  %v6705_v56 = vld [vmem:[#allocation18_spill] sm:$0xff] }
 0x318   : > { %2797 = vmatpush.bf16.msra.mxu2 %v5680_v42  ;;  %2816 = vmatpush.bf16.msra.mxu3 %v5696_v55  ;;  %v2711_v26 = vadd.f32 %v2710_v23, %v5682_v19  ;;  %v2676_v38 = vmul.f32 %v6703_v53, %v6703_v53  ;;  %v2687_v59 = vadd.f32 %v2686_v34, %v6704_v20 }
 0x319   : > { %v2673_v10 = vmul.f32 %v5684_v31, %v5684_v31  ;;  %v2700_v19 = vadd.f32 %v2699_v24, %v6705_v56  ;;  %v2724_v13 = vadd.f32 %v2723_v36, %v2669_v2  ;;  %v2677_v28 = vmul.f32 %v5582_v50, %v5582_v50  ;;  %v5801_v31 = vpop.permute.xlu1 %2080 }
 0x31a   : > { %v2712_v35 = vadd.f32 %v2711_v26, %v2672_v6  ;;  %v2688_v57 = vadd.f32 %v2687_v59, %v2678_v37  ;;  %v2680_v60 = vmul.f32 %v6706_v51, %v6706_v51  ;;  %v2681_v33 = vmul.f32 %v5571_v14, %v5571_v14  ;;  %v5807_v26 = vpop.permute.xlu0 %2090 }
 0x31b   : > { %2760 = vmatpush.bf16.msra.mxu0 %v5698_v3  ;;  %2779 = vmatpush.bf16.msra.mxu1 %v5714_v7  ;;  %v2725_v18 = vadd.f32 %v2724_v13, %v2673_v10  ;;  %v2701_v0 = vadd.f32 %v2700_v19, %v2679_v15 }
 0x31c   : > { %2798 = vmatpush.bf16.msra.mxu2 %v5729_v4  ;;  %2817 = vmatpush.bf16.msra.mxu3 %v5746_v62  ;;  %v2713_v52 = vadd.f32 %v2712_v35, %v2676_v38  ;;  %v2689_v11 = vrot.slane %v2688_v57, 4 }
 0x31d   : > { %v2726_v1 = vadd.f32 %v2725_v18, %v2677_v28  ;;  %v2702_v49 = vrot.slane %v2701_v0, 4 }
 0x31e   : > { %v2714_v39 = vadd.f32 %v2713_v52, %v2680_v60  ;;  %v2690_v45 = vadd.f32 %v2689_v11, %v2688_v57  ;;  %v1949_v11 = vrot.slane %v5754_v32, 4 }
 0x31f   : > { %2761 = vmatpush.bf16.msra.mxu0 %v5762_v48  ;;  %2780 = vmatpush.bf16.msra.mxu1 %v5765_v5  ;;  %v2703_v44 = vadd.f32 %v2702_v49, %v2701_v0  ;;  %v2727_v61 = vadd.f32 %v2726_v1, %v2681_v33  ;;  %v1936_v0 = vrot.slane %v5742_v46, 4 }
 0x320   : > { %2799 = vmatpush.bf16.msra.mxu2 %v5772_v25  ;;  %2818 = vmatpush.bf16.msra.mxu3 %v5779_v16  ;;  %v2691_v29 = vrot.slane %v2690_v45, 2  ;;  %v2715_v50 = vrot.slane %v2714_v39, 4  ;;  %v1950_v49 = vadd.f32 %v1949_v11, %v5754_v32 }
 0x321   : > { %v2704_v43 = vrot.slane %v2703_v44, 2  ;;  %v2728_v27 = vrot.slane %v2727_v61, 4  ;;  %v5809_v14 = vpop.permute.xlu1 %2095  ;;  %v1937_v1 = vadd.f32 %v1936_v0, %v5742_v46 }
 0x322   : > { %v2692_v41 = vadd.f32 %v2691_v29, %v2690_v45  ;;  %v2716_v47 = vadd.f32 %v2715_v50, %v2714_v39  ;;  %v1962_v39 = vrot.slane %v5759_v9, 4 }
 0x323   : > { %v2705_v58 = vadd.f32 %v2704_v43, %v2703_v44  ;;  %v2729_v34 = vadd.f32 %v2728_v27, %v2727_v61  ;;  %v1938_v33 = vrot.slane %v1937_v1, 2  ;;  %v1975_v44 = vrot.slane %v5769_v22, 4 }
 0x324   : > { %v2693_v23 = vrot.slane %v2692_v41, 1  ;;  %v2717_v6 = vrot.slane %v2716_v47, 2  ;;  %v1963_v50 = vadd.f32 %v1962_v39, %v5759_v9  ;;  %v1951_v61 = vrot.slane %v1950_v49, 2 }
 0x325   : > { %v2706_v24 = vrot.slane %v2705_v58, 1  ;;  %v2730_v21 = vrot.slane %v2729_v34, 2  ;;  %v1976_v43 = vadd.f32 %v1975_v44, %v5769_v22 }
 0x326   : > { %v5805_v2 = vadd.f32 %v2693_v23, %v2692_v41  ;;  %v2718_v36 = vadd.f32 %v2717_v6, %v2716_v47  ;;  %v1939_v41 = vadd.f32 %v1938_v33, %v1937_v1  ;;  %v5873_v47 = vpop.permute.xlu2 %2085  ;;  %v1964_v27 = vrot.slane %v1963_v50, 2 }
 0x327   : > { %v5815_v30 = vadd.f32 %v2706_v24, %v2705_v58  ;;  %v2731_v38 = vadd.f32 %v2730_v21, %v2729_v34  ;;  %v1952_v23 = vadd.f32 %v1951_v61, %v1950_v49  ;;  %v1977_v24 = vrot.slane %v1976_v43, 2 }
 0x328   : > { %v5813_v37 = vadd.f32 %v5805_v2, %v5801_v31  ;;  %v5819_v15 = vadd.f32 %v5805_v2, %v5807_v26  ;;  %v2719_v53 = vrot.slane %v2718_v36, 1  ;;  %v5823_v20 = vadd.f32 %v5805_v2, %v5809_v14 }
 0x329   : > { %6707 = vst [vmem:[#allocation14_spill] sm:$0xff] %v5815_v30  ;;  %v5827_v59 = vadd.f32 %v5815_v30, %v5801_v31  ;;  %v5831_v10 = vadd.f32 %v5815_v30, %v5807_v26  ;;  %v5835_v56 = vadd.f32 %v5815_v30, %v5809_v14  ;;  %v2732_v35 = vrot.slane %v2731_v38, 1 }
 0x32a   : > { %v5837_v19 = vadd.f32 %v2719_v53, %v2718_v36  ;;  %v1940_v6 = vrot.slane %v1939_v41, 1  ;;  %v1965_v36 = vadd.f32 %v1964_v27, %v1963_v50  ;;  %v1953_v21 = vrot.slane %v1952_v23, 1 }
 0x32b   : > { %6708 = vst [vmem:[#allocation25_spill] sm:$0xff] %v5827_v59  ;;  %v5843_v28 = vadd.f32 %v2732_v35, %v2731_v38  ;;  %v1978_v38 = vadd.f32 %v1977_v24, %v1976_v43 }
 0x32c   : > { %6709 = vst [vmem:[#allocation13_spill] sm:$0xff] %v5831_v10  ;;  %v5841_v13 = vadd.f32 %v5837_v19, %v5801_v31  ;;  %v5847_v57 = vadd.f32 %v5837_v19, %v5807_v26  ;;  %v5851_v51 = vadd.f32 %v5837_v19, %v5809_v14  ;;  %v1941_v53 = vadd.f32 %v1940_v6, %v1939_v41 }
 0x32d   : > { %6710 = vst [vmem:[#allocation32_spill] sm:$0xff] %v5835_v56  ;;  %v5855_v60 = vadd.f32 %v5843_v28, %v5801_v31  ;;  %v5859_v52 = vadd.f32 %v5843_v28, %v5807_v26  ;;  %v5863_v18 = vadd.f32 %v5843_v28, %v5809_v14  ;;  %v1966_v9 = vrot.slane %v1965_v36, 1 }
 0x32e   : > { %6711 = vst [vmem:[#allocation15_spill] sm:$0xff] %v5837_v19  ;;  %v1954_v0 = vadd.f32 %v1953_v21, %v1952_v23  ;;  %v2102_v39 = vadd.f32 %v5873_v47, %v1941_v53  ;;  %v5878_v61 = vpop.permute.xlu2 %2148  ;;  %v2098_v50 = vadd.f32 %v5801_v31, %v1941_v53  ;;  %v2106_v43 = vadd.f32 %v5807_v26, %v1941_v53  ;;  %v5883_v21 = vpop.permute.xlu0 %2153 }
 0x32f   : > { %6712 = vst [vmem:[#allocation28_spill] sm:$0xff] %v5841_v13  ;;  %v1967_v27 = vadd.f32 %v1966_v9, %v1965_v36 }
 0x330   : > { %6713 = vst [vmem:[#allocation27_spill] sm:$0xff] %v5843_v28  ;;  %v2103_v23 = vadd.f32 %v5873_v47, %v1954_v0 }
 0x331   : > { %6714 = vst [vmem:[#allocation31_spill] sm:$0xff] %v5847_v57  ;;  %v2107_v57 = vadd.f32 %v5807_v26, %v1954_v0 }
 0x332   : > { %6715 = vst [vmem:[#allocation26_spill] sm:$0xff] %v5851_v51 }
 0x333   : > { %6716 = vst [vmem:[#allocation29_spill] sm:$0xff] %v5855_v60 }
 0x334   : > { %6717 = vst [vmem:[#allocation30_spill] sm:$0xff] %v5859_v52 }
 0x335   : > { %6718 = vst [vmem:[#allocation19_spill] sm:$0xff] %v5863_v18  ;;  %v1979_v18 = vrot.slane %v1978_v38, 1 }
 0x337   : > { %v1980_v56 = vadd.f32 %v1979_v18, %v1978_v38 }
 0x36f   : > { %v2011_v45 = vpop.f32.mrf.mxu0  ;;  %v2030_v29 = vpop.f32.mrf.mxu1 }
 0x370   : > { %v2114_v1 = vmul.f32 2.0, %v2011_v45 }
 0x372   : > { %v2130_v45 = vsub.f32 %v2098_v50, %v2114_v1 }
 0x374   : > { %v5895_v50 = vmul.f32 %v5878_v61, %v2130_v45  ;;  %v2108_v45 = vadd.f32 %v5807_v26, %v1967_v27 }
 0x377   : > { %v2013_v58 = vpop.f32.mrf.mxu0  ;;  %v2032_v32 = vpop.f32.mrf.mxu1 }
 0x378   : > { %v2049_v46 = vpop.f32.mrf.mxu2  ;;  %v5875_v34 = vpop.f32.mrf.mxu3  ;;  %v2118_v35 = vmul.f32 2.0, %v2013_v58  ;;  %v2119_v51 = vmul.f32 2.0, %v2032_v32  ;;  %v2115_v58 = vmul.f32 2.0, %v2030_v29  ;;  %v2104_v29 = vadd.f32 %v5873_v47, %v1967_v27 }
 0x379   : > { %v5887_v32 = vpop.permute.xlu1 %2158 }
 0x37a   : > { %v2134_v41 = vsub.f32 %v2102_v39, %v2118_v35  ;;  %v2135_v52 = vsub.f32 %v2103_v23, %v2119_v51  ;;  %v2116_v23 = vmul.f32 2.0, %v2049_v46 }
 0x37c   : > { %v5890_v36 = vmul.f32 %v5883_v21, %v2134_v41  ;;  %v2111_v41 = vadd.f32 %v5809_v14, %v1954_v0 }
 0x37f   : > { %v2016_v22 = vpop.f32.mrf.mxu0  ;;  %v2035_v44 = vpop.f32.mrf.mxu1 }
 0x380   : > { %v2051_v11 = vpop.f32.mrf.mxu2  ;;  %v2070_v49 = vpop.f32.mrf.mxu3  ;;  %v2122_v33 = vmul.f32 2.0, %v2016_v22  ;;  %v2123_v6 = vmul.f32 2.0, %v2035_v44  ;;  %v2099_v22 = vadd.f32 %v5801_v31, %v1954_v0  ;;  %v2110_v44 = vadd.f32 %v5809_v14, %v1941_v53 }
 0x381   : > { %v2120_v35 = vmul.f32 2.0, %v2051_v11  ;;  %v2182_v53 = vmax.f32 %v5895_v50, %v5890_v36 }
 0x382   : > { %v2138_v24 = vsub.f32 %v2106_v43, %v2122_v33  ;;  %v2131_v9 = vsub.f32 %v2099_v22, %v2115_v58  ;;  %v2139_v39 = vsub.f32 %v2107_v57, %v2123_v6  ;;  %v5902_v58 = vmul.f32 %v5883_v21, %v2135_v52  ;;  %v5908_v22 = vpop.permute.xlu2 %2163 }
 0x383   : > { %v2100_v6 = vadd.f32 %v5801_v31, %v1967_v27  ;;  %6719 = vst [vmem:[#allocation22_spill] sm:$0xff] %v5908_v22  ;;  %v2136_v0 = vsub.f32 %v2104_v29, %v2120_v35  ;;  %v2117_v29 = vmul.f32 2.0, %v5875_v34  ;;  %v2105_v35 = vadd.f32 %v5873_v47, %v1980_v56 }
 0x384   : > { %v5898_v51 = vmul.f32 %v5887_v32, %v2138_v24  ;;  %v5914_v46 = vmul.f32 %v5887_v32, %v2139_v39  ;;  %v2113_v34 = vadd.f32 %v5809_v14, %v1980_v56 }
 0x385   : > { %v2132_v13 = vsub.f32 %v2100_v6, %v2116_v23  ;;  %v2109_v23 = vadd.f32 %v5807_v26, %v1980_v56  ;;  %v2112_v6 = vadd.f32 %v5809_v14, %v1967_v27 }
 0x386   : > { %v2183_v28 = vmax.f32 %v2182_v53, %v5898_v51 }
 0x387   : > { %v2018_v33 = vpop.f32.mrf.mxu0  ;;  %v2037_v38 = vpop.f32.mrf.mxu1 }
 0x388   : > { %v2054_v1 = vpop.f32.mrf.mxu2  ;;  %v2073_v43 = vpop.f32.mrf.mxu3  ;;  %v2126_v18 = vmul.f32 2.0, %v2018_v33  ;;  %v2127_v11 = vmul.f32 2.0, %v2037_v38  ;;  %v5911_v33 = vmul.f32 %v5878_v61, %v2131_v9  ;;  %v2121_v38 = vmul.f32 2.0, %v2070_v49 }
 0x389   : > { %v2124_v57 = vmul.f32 2.0, %v2054_v1  ;;  %v2101_v1 = vadd.f32 %v5801_v31, %v1980_v56  ;;  %v2125_v39 = vmul.f32 2.0, %v2073_v43  ;;  %v5927_v31 = vmul.f32 %v5883_v21, %v2136_v0 }
 0x38a   : > { %v2142_v24 = vsub.f32 %v2110_v44, %v2126_v18  ;;  %v2143_v52 = vsub.f32 %v2111_v41, %v2127_v11  ;;  %v2191_v44 = vmax.f32 %v5911_v33, %v5902_v58 }
 0x38b   : > { %v2140_v18 = vsub.f32 %v2108_v45, %v2124_v57  ;;  %v2137_v57 = vsub.f32 %v2105_v35, %v2121_v38  ;;  %v2141_v26 = vsub.f32 %v2109_v23, %v2125_v39 }
 0x38c   : > { %v2178_v60 = vmul.f32 %v5908_v22, %v2142_v24  ;;  %v5922_v9 = vmul.f32 %v5908_v22, %v2143_v52  ;;  %v2192_v49 = vmax.f32 %v2191_v44, %v5914_v46  ;;  %v5934_v52 = vmul.f32 %v5878_v61, %v2132_v13 }
 0x38d   : > { %v2133_v44 = vsub.f32 %v2101_v1, %v2117_v29  ;;  %v5943_v38 = vmul.f32 %v5883_v21, %v2137_v57  ;;  %v5953_v1 = vmul.f32 %v5887_v32, %v2141_v26 }
 0x38e   : > { %v2184_v41 = vmax.f32 %v2183_v28, %v2178_v60  ;;  %v5937_v28 = vmul.f32 %v5887_v32, %v2140_v18  ;;  %v2193_v43 = vmax.f32 %v2192_v49, %v5922_v9  ;;  %v2200_v27 = vmax.f32 %v5934_v52, %v5927_v31 }
 0x38f   : > { %v5950_v49 = vmul.f32 %v5878_v61, %v2133_v44 }
 0x390   : > { %v2056_v11 = vpop.f32.mrf.mxu2  ;;  %v2185_v53 = vrot.slane %v2184_v41, 4  ;;  %v2075_v24 = vpop.f32.mrf.mxu3  ;;  %v2201_v18 = vmax.f32 %v2200_v27, %v5937_v28  ;;  %v2194_v35 = vrot.slane %v2193_v43, 4 }
 0x391   : > { %v2128_v45 = vmul.f32 2.0, %v2056_v11  ;;  %v2129_v0 = vmul.f32 2.0, %v2075_v24 }
 0x392   : > { %v2186_v19 = vmax.f32 %v2184_v41, %v2185_v53  ;;  %v2209_v41 = vmax.f32 %v5950_v49, %v5943_v38  ;;  %v2195_v11 = vmax.f32 %v2193_v43, %v2194_v35 }
 0x393   : > { %v2144_v10 = vsub.f32 %v2112_v6, %v2128_v45  ;;  %v2145_v13 = vsub.f32 %v2113_v34, %v2129_v0 }
 0x394   : > { %v2187_v14 = vrot.slane %v2186_v19, 2  ;;  %v2210_v6 = vmax.f32 %v2209_v41, %v5953_v1  ;;  %v2196_v34 = vrot.slane %v2195_v11, 2 }
 0x395   : > { %v5946_v56 = vmul.f32 %v5908_v22, %v2144_v10  ;;  %v5959_v10 = vmul.f32 %v5908_v22, %v2145_v13 }
 0x396   : > { %v2188_v29 = vmax.f32 %v2186_v19, %v2187_v14  ;;  %v2197_v13 = vmax.f32 %v2195_v11, %v2196_v34 }
 0x397   : > { %v2202_v39 = vmax.f32 %v2201_v18, %v5946_v56  ;;  %v2211_v45 = vmax.f32 %v2210_v6, %v5959_v10 }
 0x398   : > { %v2189_v23 = vrot.slane %v2188_v29, 1 }
 0x399   : > { %v2203_v53 = vrot.slane %v2202_v39, 4  ;;  %v2212_v26 = vrot.slane %v2211_v45, 4 }
 0x39a   : > { %v2190_v57 = vmax.f32 %v2188_v29, %v2189_v23  ;;  %v2198_v23 = vrot.slane %v2197_v13, 1 }
 0x39b   : > { %v2204_v44 = vmax.f32 %v2202_v39, %v2203_v53  ;;  %v2213_v41 = vmax.f32 %v2211_v45, %v2212_v26 }
 0x39c   : > { %v2218_v24 = vsub.f32 %v5895_v50, %v2190_v57  ;;  %v2222_v19 = vsub.f32 %v5890_v36, %v2190_v57  ;;  %v2226_v0 = vsub.f32 %v5898_v51, %v2190_v57  ;;  %v2230_v14 = vsub.f32 %v2178_v60, %v2190_v57 }
 0x39d   : > { %v2205_v35 = vrot.slane %v2204_v44, 2  ;;  %v2214_v6 = vrot.slane %v2213_v41, 2  ;;  %v2199_v36 = vmax.f32 %v2197_v13, %v2198_v23 }
 0x39e   : > { %v2234_v27 = vmul.f32 1.442695, %v2218_v24  ;;  %v2242_v18 = vmul.f32 1.442695, %v2222_v19  ;;  %v2250_v43 = vmul.f32 1.442695, %v2226_v0 }
 0x39f   : > { %v2258_v29 = vmul.f32 1.442695, %v2230_v14  ;;  %v2206_v50 = vmax.f32 %v2204_v44, %v2205_v35  ;;  %v2215_v60 = vmax.f32 %v2213_v41, %v2214_v6  ;;  %v2227_v53 = vsub.f32 %v5914_v46, %v2199_v36 }
 0x3a0   : > { %4268 = vpow2.f32 %v2234_v27  ;;  %v2231_v44 = vsub.f32 %v5922_v9, %v2199_v36  ;;  %v2219_v14 = vsub.f32 %v5911_v33, %v2199_v36  ;;  %v2223_v13 = vsub.f32 %v5902_v58, %v2199_v36 }
 0x3a1   : > { %4270 = vpow2.f32 %v2242_v18  ;;  %v2207_v39 = vrot.slane %v2206_v50, 1  ;;  %v2216_v19 = vrot.slane %v2215_v60, 1  ;;  %v2252_v26 = vmul.f32 1.442695, %v2227_v53 }
 0x3a2   : > { %4272 = vpow2.f32 %v2250_v43  ;;  %v2236_v35 = vmul.f32 1.442695, %v2219_v14  ;;  %v2244_v41 = vmul.f32 1.442695, %v2223_v13 }
 0x3a3   : > { %4274 = vpow2.f32 %v2258_v29  ;;  %v2208_v34 = vmax.f32 %v2206_v50, %v2207_v39  ;;  %v2217_v43 = vmax.f32 %v2215_v60, %v2216_v19  ;;  %v2260_v29 = vmul.f32 1.442695, %v2231_v44 }
 0x3a4   : > { %4276 = vpow2.f32 %v2252_v26 }
 0x3a5   : > { %v2228_v18 = vsub.f32 %v5937_v28, %v2208_v34  ;;  %4278 = vpow2.f32 %v2236_v35  ;;  %v2220_v9 = vsub.f32 %v5934_v52, %v2208_v34  ;;  %v2224_v39 = vsub.f32 %v5927_v31, %v2208_v34 }
 0x3a6   : > { %v5966_v22 = vpop.eup %4268  ;;  %4280 = vpow2.f32 %v2244_v41  ;;  %v2221_v33 = vsub.f32 %v5950_v49, %v2217_v43  ;;  %v2232_v58 = vsub.f32 %v5946_v56, %v2208_v34  ;;  %v2225_v28 = vsub.f32 %v5943_v38, %v2217_v43 }
 0x3a7   : > { %v5968_v51 = vpop.eup %4270  ;;  %v2254_v50 = vmul.f32 1.442695, %v2228_v18  ;;  %4282 = vpow2.f32 %v2260_v29  ;;  %v2229_v36 = vsub.f32 %v5953_v1, %v2217_v43  ;;  %v2246_v53 = vmul.f32 1.442695, %v2224_v39 }
 0x3a8   : > { %v2266_v11 = vadd.f32 %v5968_v51, %v5966_v22  ;;  %v5972_v57 = vpop.eup %4272  ;;  %v2240_v19 = vmul.f32 1.442695, %v2221_v33  ;;  %v2233_v31 = vsub.f32 %v5959_v10, %v2217_v43  ;;  %v2248_v49 = vmul.f32 1.442695, %v2225_v28 }
 0x3a9   : > { %v5976_v24 = vpop.eup %4274  ;;  %4284 = vpow2.f32 %v2254_v50  ;;  %v2262_v56 = vmul.f32 1.442695, %v2232_v58  ;;  %v2256_v38 = vmul.f32 1.442695, %v2229_v36 }
 0x3aa   : > { %v2267_v45 = vadd.f32 %v5972_v57, %v2266_v11  ;;  %v2238_v11 = vmul.f32 1.442695, %v2220_v9  ;;  %v2264_v26 = vmul.f32 1.442695, %v2233_v31 }
 0x3ac   : > { %v2268_v0 = vadd.f32 %v5976_v24, %v2267_v45  ;;  %v5989_v45 = vpop.eup %4276  ;;  %4286 = vpow2.f32 %v2238_v11 }
 0x3ad   : > { %4288 = vpow2.f32 %v2246_v53 }
 0x3ae   : > { %v2269_v27 = vrot.slane %v2268_v0, 4 }
 0x3b0   : > { %v2270_v46 = vadd.f32 %v2269_v27, %v2268_v0  ;;  %v5991_v0 = vpop.eup %4278 }
 0x3b1   : > { %v5994_v44 = vpop.eup %4280 }
 0x3b2   : > { %v2271_v23 = vrot.slane %v2270_v46, 2  ;;  %v5996_v1 = vpop.eup %4282  ;;  %v2275_v34 = vadd.f32 %v5994_v44, %v5991_v0 }
 0x3b3   : > { %v6000_v27 = vpop.eup %4284 }
 0x3b4   : > { %v2272_v6 = vadd.f32 %v2271_v23, %v2270_v46  ;;  %v2276_v10 = vadd.f32 %v5989_v45, %v2275_v34  ;;  %v6003_v14 = vpop.eup %4286 }
 0x3b5   : > { %v6005_v13 = vpop.eup %4288 }
 0x3b6   : > { %v2273_v60 = vrot.slane %v2272_v6, 1  ;;  %v2277_v18 = vadd.f32 %v5996_v1, %v2276_v10  ;;  %v2284_v46 = vadd.f32 %v6005_v13, %v6003_v14 }
 0x3b8   : > { %v2274_v52 = vadd.f32 %v2273_v60, %v2272_v6  ;;  %v2278_v29 = vrot.slane %v2277_v18, 4  ;;  %v2285_v50 = vadd.f32 %v6000_v27, %v2284_v46 }
 0x3ba   : > { %4290 = vrcp.f32 %v2274_v52  ;;  %v2279_v39 = vadd.f32 %v2278_v29, %v2277_v18  ;;  %v2311_v28 = vand.u32 2147483647, %v2274_v52  ;;  %v2313_v36 = vand.u32 2147483648, %v2274_v52 }
 0x3bb   : > { %4292 = vpow2.f32 %v2240_v19  ;;  %vm2307_vm14 = vweird.f32 %v2274_v52 }
 0x3bc   : > { %4294 = vpow2.f32 %v2248_v49  ;;  %v2280_v53 = vrot.slane %v2279_v39, 2  ;;  %vm2312_vm0 = vcmp.eq.f32.partialorder %v2311_v28, 8.507059e+37 }
 0x3bd   : > { %4296 = vpow2.f32 %v2262_v56 }
 0x3be   : > { %4298 = vpow2.f32 %v2256_v38  ;;  %v2281_v38 = vadd.f32 %v2280_v53, %v2279_v39 }
 0x3bf   : > { %4300 = vpow2.f32 %v2264_v26  ;;  %v2314_v26 = vor.u32 1.1754944e-38, %v2313_v36 }
 0x3c0   : > { %v4291_v43 = vpop.eup %4290  ;;  %v2282_v46 = vrot.slane %v2281_v38, 1 }
 0x3c1   : > { %v6010_v35 = vpop.eup %4292  ;;  %v2303_v41 = vmul.f32 %v4291_v43, %v2274_v52  ;;  %vm2308_vm13 = vweird.f32 %v4291_v43 }
 0x3c2   : > { %v6012_v23 = vpop.eup %4294  ;;  %vm2309_vm15 = vmor %vm2307_vm14, %vm2308_vm13  ;;  %v2283_v30 = vadd.f32 %v2282_v46, %v2281_v38  ;;  %vm2498_vm14 = vcmask 7168  }
 0x3c3   : > { %v6015_v6 = vpop.eup %4296  ;;  %v2304_v9 = vsub.f32 1.0, %v2303_v41  ;;  %v2293_v33 = vadd.f32 %v6012_v23, %v6010_v35 }
 0x3c4   : > { %v6019_v58 = vpop.eup %4298  ;;  %v2286_v60 = vadd.f32 %v6015_v6, %v2285_v50  ;;  %4302 = vrcp.f32 %v2283_v30  ;;  %vm2322_vm2 = vweird.f32 %v2283_v30 }
 0x3c5   : > { %v2305_v11 = vmul.f32 %v4291_v43, %v2304_v9  ;;  %v2294_v19 = vadd.f32 %v6019_v58, %v2293_v33  ;;  %v6023_v31 = vpop.eup %4300 }
 0x3c6   : > { %v2287_v49 = vrot.slane %v2286_v60, 4 }
 0x3c7   : > { %v2306_v56 = vadd.f32 %v4291_v43, %v2305_v11  ;;  %v2295_v34 = vadd.f32 %v6023_v31, %v2294_v19 }
 0x3c8   : > { %v2288_v10 = vadd.f32 %v2287_v49, %v2286_v60 }
 0x3c9   : > { %v2310_v18 = vsel %vm2309_vm15, %v4291_v43, %v2306_v56  ;;  %v2296_v41 = vrot.slane %v2295_v34, 4 }
 0x3ca   : > { %v2315_v29 = vsel %vm2312_vm0, %v2314_v26, %v2310_v18  ;;  %v2289_v50 = vrot.slane %v2288_v10, 2  ;;  %v4303_v36 = vpop.eup %4302 }
 0x3cb   : > { %v2316_v9 = vmul.f32 %v5966_v22, %v2315_v29  ;;  %v2362_v33 = vmul.f32 %v5968_v51, %v2315_v29  ;;  %v2297_v59 = vadd.f32 %v2296_v41, %v2295_v34  ;;  %v2318_v19 = vmul.f32 %v4303_v36, %v2283_v30 }
 0x3cc   : > { %v2290_v11 = vadd.f32 %v2289_v50, %v2288_v10  ;;  %v2328_v51 = vand.u32 2147483648, %v2283_v30  ;;  %vm2323_vm1 = vweird.f32 %v4303_v36  ;;  %v2326_v34 = vand.u32 2147483647, %v2283_v30 }
 0x3cd   : > { %v2374_v52 = vpack.c.bf16 %v2362_v33, %v2316_v9  ;;  %v2298_v53 = vrot.slane %v2297_v59, 2  ;;  %v2319_v22 = vsub.f32 1.0, %v2318_v19  ;;  %vm2324_vm3 = vmor %vm2322_vm2, %vm2323_vm1 }
 0x3ce   : > { %v2291_v39 = vrot.slane %v2290_v11, 1  ;;  %v2329_v46 = vor.u32 1.1754944e-38, %v2328_v51  ;;  %vm2327_vm4 = vcmp.eq.f32.partialorder %v2326_v34, 8.507059e+37 }
 0x3cf   : > { %2390 = vmatmul.bf16.vlgmr.msrb.gmra.mxu0 %v2374_v52  ;;  %v2299_v28 = vadd.f32 %v2298_v53, %v2297_v59  ;;  %v2320_v38 = vmul.f32 %v4303_v36, %v2319_v22  ;;  %v2370_v59 = vmul.f32 %v5976_v24, %v2315_v29 }
 0x3d0   : > { %3098 = vmatpush.bf16.xpose.msrb.mxu0 %v6694_v12  ;;  %v2292_v43 = vadd.f32 %v2291_v39, %v2290_v11  ;;  %v2366_v12 = vmul.f32 %v5972_v57, %v2315_v29 }
 0x3d1   : > { %v2300_v60 = vrot.slane %v2299_v28, 1  ;;  %v2321_v10 = vadd.f32 %v4303_v36, %v2320_v38 }
 0x3d2   : > { %4304 = vrcp.f32 %v2292_v43  ;;  %v2343_v18 = vand.u32 2147483648, %v2292_v43  ;;  %vm2337_vm5 = vweird.f32 %v2292_v43  ;;  %v2341_v11 = vand.u32 2147483647, %v2292_v43 }
 0x3d3   : > { %v6029_v49 = vadd.f32 %v2300_v60, %v2299_v28  ;;  %v2325_v50 = vsel %vm2324_vm3, %v4303_v36, %v2321_v10 }
 0x3d4   : > { %v2330_v39 = vsel %vm2327_vm4, %v2329_v46, %v2325_v50  ;;  %v2344_v24 = vor.u32 1.1754944e-38, %v2343_v18  ;;  %vm2342_vm8 = vcmp.eq.f32.partialorder %v2341_v11, 8.507059e+37 }
 0x3d5   : > { %4306 = vrcp.f32 %v6029_v49  ;;  %v2331_v28 = vmul.f32 %v5991_v0, %v2330_v39  ;;  %v2363_v57 = vmul.f32 %v5994_v44, %v2330_v39  ;;  %v2358_v60 = vand.u32 2147483648, %v6029_v49 }
 0x3d6   : > { %v2367_v36 = vmul.f32 %v5989_v45, %v2330_v39  ;;  %v2371_v19 = vmul.f32 %v5996_v1, %v2330_v39  ;;  %v2356_v45 = vand.u32 2147483647, %v6029_v49  ;;  %vm2352_vm10 = vweird.f32 %v6029_v49 }
 0x3d7   : > { %v2375_v22 = vpack.c.bf16 %v2363_v57, %v2331_v28  ;;  %v2479_v38 = vadd.f32 %v2363_v57, %v2362_v33  ;;  %v2474_v34 = vadd.f32 %v2331_v28, %v2316_v9 }
 0x3d8   : > { %v4305_v56 = vpop.eup %4304  ;;  %3099 = vmatpush.bf16.xpose.msrb.mxu0 %v5628_v63  ;;  %v2378_v63 = vpack.c.bf16 %v2370_v59, %v2366_v12  ;;  %v2484_v44 = vadd.f32 %v2367_v36, %v2366_v12  ;;  %vm2357_vm13 = vcmp.eq.f32.partialorder %v2356_v45, 8.507059e+37 }
 0x3d9   : > { %v2333_v26 = vmul.f32 %v4305_v56, %v2292_v43  ;;  %vm2338_vm6 = vweird.f32 %v4305_v56  ;;  %2409 = vmatmul.bf16.vlgmr.msrb.gmra.mxu1 %v2375_v22 }
 0x3da   : > { %vm2339_vm7 = vmor %vm2337_vm5, %vm2338_vm6  ;;  %3117 = vmatpush.bf16.xpose.msrb.mxu1 %v6695_v54 }
 0x3db   : > { %v2334_v41 = vsub.f32 1.0, %v2333_v26  ;;  %v4307_v52 = vpop.eup %4306  ;;  %v2489_v26 = vadd.f32 %v2371_v19, %v2370_v59 }
 0x3dc   : > { %v2348_v30 = vmul.f32 %v4307_v52, %v6029_v49  ;;  %vm2353_vm9 = vweird.f32 %v4307_v52 }
 0x3dd   : > { %v2335_v53 = vmul.f32 %v4305_v56, %v2334_v41  ;;  %vm2354_vm11 = vmor %vm2352_vm10, %vm2353_vm9 }
 0x3de   : > { %v2349_v51 = vsub.f32 1.0, %v2348_v30  ;;  %v2473_v30 = vld [vmem:[#allocation5 + $0x18] sm:$0xff] }
 0x3df   : > { %v2336_v29 = vadd.f32 %v4305_v56, %v2335_v53  ;;  %2395 = vmatmul.bf16.gmra.mxu0 %v2378_v63 }
 0x3e0   : > { %3100 = vmatpush.bf16.xpose.msrb.mxu0 %v5698_v3  ;;  %v2350_v18 = vmul.f32 %v4307_v52, %v2349_v51 }
 0x3e1   : > { %v2340_v0 = vsel %vm2339_vm7, %v4305_v56, %v2336_v29  ;;  %v2359_v56 = vor.u32 1.1754944e-38, %v2358_v60 }
 0x3e2   : > { %v2345_v10 = vsel %vm2342_vm8, %v2344_v24, %v2340_v0  ;;  %v2351_v33 = vadd.f32 %v4307_v52, %v2350_v18  ;;  %3118 = vmatpush.bf16.xpose.msrb.mxu1 %v5647_v17  ;;  %v2458_v0 = vld [vmem:[#allocation4] sm:$0xff] }
 0x3e3   : > { %v2346_v1 = vmul.f32 %v6003_v14, %v2345_v10  ;;  %v2364_v43 = vmul.f32 %v6005_v13, %v2345_v10  ;;  %v2368_v9 = vmul.f32 %v6000_v27, %v2345_v10  ;;  %v2372_v3 = vmul.f32 %v6015_v6, %v2345_v10 }
 0x3e4   : > { %v2355_v50 = vsel %vm2354_vm11, %v4307_v52, %v2351_v33  ;;  %v2834_v33 = vadd.f32 %v5805_v2, %v5873_v47 }
 0x3e5   : > { %v2376_v12 = vpack.c.bf16 %v2364_v43, %v2346_v1  ;;  %v2485_v59 = vadd.f32 %v2484_v44, %v2368_v9  ;;  %v2480_v46 = vadd.f32 %v2479_v38, %v2364_v43  ;;  %v2475_v41 = vadd.f32 %v2474_v34, %v2346_v1 }
 0x3e6   : > { %v2490_v54 = vadd.f32 %v2489_v26, %v2372_v3  ;;  %v2360_v14 = vsel %vm2357_vm13, %v2359_v56, %v2355_v50  ;;  %v2380_v17 = vpack.c.bf16 %v2372_v3, %v2368_v9 }
 0x3e7   : > { %2428 = vmatmul.bf16.vlgmr.msrb.gmra.mxu2 %v2376_v12  ;;  %v2361_v13 = vmul.f32 %v6010_v35, %v2360_v14  ;;  %v2365_v27 = vmul.f32 %v6012_v23, %v2360_v14  ;;  %v2369_v6 = vmul.f32 %v6019_v58, %v2360_v14  ;;  %v2373_v49 = vmul.f32 %v6023_v31, %v2360_v14  ;;  %v4179_v35 = vld [vmem:[%s6608_s5] sm:$0xff] }
 0x3e8   : > { %3136 = vmatpush.bf16.xpose.msrb.mxu2 %v6696_v8  ;;  %3101 = vmatpush.bf16.xpose.msrb.mxu0 %v5762_v48  ;;  %v2379_v8 = vpack.c.bf16 %v2371_v19, %v2367_v36 }
 0x3e9   : > { %v2377_v11 = vpack.c.bf16 %v2365_v27, %v2361_v13  ;;  %v2486_v39 = vadd.f32 %v2485_v59, %v2369_v6  ;;  %v2481_v53 = vadd.f32 %v2480_v46, %v2365_v27  ;;  %v2476_v52 = vadd.f32 %v2475_v41, %v2361_v13  ;;  %v2459_v59 = vld [vmem:[#allocation4 + $0x8] sm:$0xff] }
 0x3ea   : > { %v2491_v63 = vadd.f32 %v2490_v54, %v2373_v49  ;;  %2414 = vmatmul.bf16.gmra.mxu1 %v2379_v8  ;;  %v2381_v48 = vpack.c.bf16 %v2373_v49, %v2369_v6 }
 0x3eb   : > { %2447 = vmatmul.bf16.vlgmr.msrb.gmra.mxu3 %v2377_v11  ;;  %2487 = vadd.xlane.f32.xlu2 %v2486_v39 }
 0x3ec   : > { %3155 = vmatpush.bf16.xpose.msrb.mxu3 %v5596_v40  ;;  %2482 = vadd.xlane.f32.xlu1 %v2481_v53  ;;  %v4180_v40 = vld [vmem:[%s6608_s5 + $0x8] sm:$0xff]  ;;  %v2460_v53 = vld [vmem:[#allocation4 + $0x10] sm:$0xff] }
 0x3ed   : > { %2477 = vadd.xlane.f32.xlu0 %v2476_v52  ;;  %3119 = vmatpush.bf16.xpose.msrb.mxu1 %v5714_v7 }
 0x3ef   : > { %4136 = vmatmul.msk.bf16.vlgmr.msra.gmra.mxu0 %vm1995_vm12, %v4179_v35 }
 0x3f0   : > { %3137 = vmatpush.bf16.xpose.msrb.mxu2 %v5680_v42 }
 0x3f3   : > { %2492 = vadd.xlane.f32.xlu2 %v2491_v63 }
 0x3f4   : > { %3156 = vmatpush.bf16.xpose.msrb.mxu3 %v5696_v55 }
 0x3f5   : > { %3120 = vmatpush.bf16.xpose.msrb.mxu1 %v5765_v5 }
 0x3f7   : > { %2433 = vmatmul.bf16.gmra.mxu2 %v2380_v17 }
 0x3f8   : > { %3138 = vmatpush.bf16.xpose.msrb.mxu2 %v5729_v4  ;;  %v2472_v4 = vld [vmem:[#allocation5 + $0x10] sm:$0xff] }
 0x3fa   : > { %4138 = vmatmul.msk.bf16.vlgmr.msra.gmra.mxu1 %vm1995_vm12, %v4179_v35 }
 0x3fb   : > { %2452 = vmatmul.bf16.gmra.mxu3 %v2381_v48 }
 0x3fc   : > { %3157 = vmatpush.bf16.xpose.msrb.mxu3 %v5746_v62  ;;  %v2471_v62 = vld [vmem:[#allocation5 + $0x8] sm:$0xff] }
 0x3ff   : > { %4137 = vmatmul.msk.bf16.gmra.mxu0 %vm1995_vm12, %v4180_v40 }
 0x400   : > { %3139 = vmatpush.bf16.xpose.msrb.mxu2 %v5772_v25  ;;  %v2470_v25 = vld [vmem:[#allocation5] sm:$0xff] }
 0x404   : > { %3158 = vmatpush.bf16.xpose.msrb.mxu3 %v5779_v16 }
 0x407   : > { %4140 = vmatmul.msk.bf16.vlgmr.msra.gmra.mxu2 %vm1995_vm12, %v4179_v35 }
 0x40a   : > { %4139 = vmatmul.msk.bf16.gmra.mxu1 %vm1995_vm12, %v4180_v40 }
 0x40b   : > { %4142 = vmatmul.msk.bf16.vlgmr.msra.gmra.mxu3 %vm1995_vm12, %v4179_v35 }
 0x417   : > { %4141 = vmatmul.msk.bf16.gmra.mxu2 %vm1995_vm12, %v4180_v40 }
 0x41b   : > { %4143 = vmatmul.msk.bf16.gmra.mxu3 %vm1995_vm12, %v4180_v40 }
 0x44c   : > { %v2391_v42 = vpop.f32.mrf.mxu0 }
 0x454   : > { %v2393_v55 = vpop.f32.mrf.mxu0 }
 0x456   : > { %v2410_v23 = vpop.f32.mrf.mxu1 }
 0x457   : > { %v2411_v19 = vadd.f32 %v2410_v23, %v2391_v42 }
 0x45c   : > { %v2396_v7 = vpop.f32.mrf.mxu0 }
 0x45e   : > { %v2488_v5 = vpop.xlane.xlu2 %2487  ;;  %v2412_v60 = vpop.f32.mrf.mxu1 }
 0x45f   : > { %v2496_v16 = vadd.f32 %v2488_v5, %v2472_v4  ;;  %v2483_v58 = vpop.xlane.xlu1 %2482  ;;  %v2413_v18 = vadd.f32 %v2412_v60, %v2393_v55 }
 0x460   : > { %v2495_v31 = vadd.f32 %v2483_v58, %v2471_v62  ;;  %v2478_v28 = vpop.xlane.xlu0 %2477 }
 0x461   : > { %2501 = vst.msk [vmem:[#allocation5 + $0x10] sm:$0xff] %vm2498_vm14, %v2496_v16  ;;  %v2494_v57 = vadd.f32 %v2478_v28, %v2470_v25  ;;  %v2461_v25 = vld [vmem:[#allocation4 + $0x18] sm:$0xff]  ;;  %v6720_v16 = vld [vmem:[#allocation25_spill] sm:$0xff] }
 0x462   : > { %2500 = vst.msk [vmem:[#allocation5 + $0x8] sm:$0xff] %vm2498_vm14, %v2495_v31  ;;  %v6721_v28 = vld [vmem:[#allocation14_spill] sm:$0xff] }
 0x463   : > { %2499 = vst.msk [vmem:[#allocation5] sm:$0xff] %vm2498_vm14, %v2494_v57  ;;  %v2835_v57 = vadd.f32 %v6721_v28, %v5873_v47 }
 0x464   : > { %v2398_v24 = vpop.f32.mrf.mxu0 }
 0x466   : > { %v2493_v29 = vpop.xlane.xlu2 %2492 }
 0x467   : > { %v2497_v36 = vadd.f32 %v2493_v29, %v2473_v30  ;;  %v2415_v44 = vpop.f32.mrf.mxu1  ;;  %v6722_v30 = vld [vmem:[#allocation22_spill] sm:$0xff] }
 0x468   : > { %v2416_v13 = vadd.f32 %v2415_v44, %v2396_v7 }
 0x469   : > { %2502 = vst.msk [vmem:[#allocation5 + $0x18] sm:$0xff] %vm2498_vm14, %v2497_v36 }
 0x46a   : > { %v2429_v22 = vpop.f32.mrf.mxu2 }
 0x46b   : > { %v2430_v51 = vadd.f32 %v2429_v22, %v2411_v19 }
 0x46c   : > { %v2763_v38 = vpop.f32.mrf.mxu0 }
 0x46d   : > { %v2846_v10 = vmul.f32 2.0, %v2763_v38 }
 0x46e   : > { %v2448_v34 = vpop.f32.mrf.mxu3 }
 0x46f   : > { %v2449_v26 = vadd.f32 %v2448_v34, %v2430_v51  ;;  %v2862_v3 = vsub.f32 %v5813_v37, %v2846_v10  ;;  %v2417_v46 = vpop.f32.mrf.mxu1 }
 0x470   : > { %v2418_v17 = vadd.f32 %v2417_v46, %v2398_v24 }
 0x471   : > { %v2462_v45 = vadd.f32 %v2458_v0, %v2449_v26  ;;  %v6089_v54 = vmul.f32 %v2862_v3, %v5878_v61  ;;  %v6724_v3 = vld [vmem:[#allocation15_spill] sm:$0xff] }
 0x472   : > { %v2431_v1 = vpop.f32.mrf.mxu2 }
 0x473   : > { %2466 = vst.msk [vmem:[#allocation4] sm:$0xff] %vm1995_vm12, %v2462_v45  ;;  %v2432_v43 = vadd.f32 %v2431_v1, %v2413_v18  ;;  %v6723_v1 = vld [vmem:[#allocation13_spill] sm:$0xff] }
 0x474   : > { %v2765_v9 = vpop.f32.mrf.mxu0 }
 0x475   : > { %v2850_v56 = vmul.f32 2.0, %v2765_v9 }
 0x476   : > { %v2450_v12 = vpop.f32.mrf.mxu3 }
 0x477   : > { %v2866_v41 = vsub.f32 %v2834_v33, %v2850_v56  ;;  %v2451_v50 = vadd.f32 %v2450_v12, %v2432_v43  ;;  %v2782_v52 = vpop.f32.mrf.mxu1  ;;  %v2836_v33 = vadd.f32 %v6724_v3, %v5873_v47  ;;  %v6725_v56 = vld [vmem:[#allocation28_spill] sm:$0xff] }
 0x478   : > { %v2847_v55 = vmul.f32 2.0, %v2782_v52 }
 0x479   : > { %v6092_v14 = vmul.f32 %v2866_v41, %v5883_v21  ;;  %v2463_v27 = vadd.f32 %v2459_v59, %v2451_v50 }
 0x47a   : > { %v2434_v6 = vpop.f32.mrf.mxu2  ;;  %v2863_v58 = vsub.f32 %v6720_v16, %v2847_v55 }
 0x47b   : > { %v2894_v37 = vmax.f32 %v6089_v54, %v6092_v14  ;;  %2467 = vst.msk [vmem:[#allocation4 + $0x8] sm:$0xff] %vm1995_vm12, %v2463_v27  ;;  %v2435_v2 = vadd.f32 %v2434_v6, %v2416_v13 }
 0x47c   : > { %v2768_v49 = vpop.f32.mrf.mxu0  ;;  %v6109_v51 = vmul.f32 %v2863_v58, %v5878_v61 }
 0x47d   : > { %v2854_v11 = vmul.f32 2.0, %v2768_v49 }
 0x47e   : > { %v2453_v39 = vpop.f32.mrf.mxu3 }
 0x47f   : > { %v2870_v63 = vsub.f32 %v5819_v15, %v2854_v11  ;;  %v2454_v35 = vadd.f32 %v2453_v39, %v2435_v2  ;;  %v2784_v23 = vpop.f32.mrf.mxu1  ;;  %v6726_v2 = vld [vmem:[#allocation29_spill] sm:$0xff] }
 0x480   : > { %v2851_v24 = vmul.f32 2.0, %v2784_v23 }
 0x481   : > { %v6099_v8 = vmul.f32 %v2870_v63, %v5887_v32  ;;  %v2464_v48 = vadd.f32 %v2460_v53, %v2454_v35  ;;  %v6727_v63 = vld [vmem:[#allocation27_spill] sm:$0xff] }
 0x482   : > { %v2436_v40 = vpop.f32.mrf.mxu2  ;;  %v2867_v36 = vsub.f32 %v2835_v57, %v2851_v24  ;;  %v2837_v35 = vadd.f32 %v6727_v63, %v5873_v47  ;;  %v6729_v24 = vld [vmem:[#allocation31_spill] sm:$0xff] }
 0x483   : > { %v2895_v42 = vmax.f32 %v2894_v37, %v6099_v8  ;;  %2468 = vst.msk [vmem:[#allocation4 + $0x10] sm:$0xff] %vm1995_vm12, %v2464_v48  ;;  %v2437_v7 = vadd.f32 %v2436_v40, %v2418_v17 }
 0x484   : > { %v2770_v4 = vpop.f32.mrf.mxu0 }
 0x485   : > { %v2858_v62 = vmul.f32 2.0, %v2770_v4 }
 0x486   : > { %v2455_v5 = vpop.f32.mrf.mxu3 }
 0x487   : > { %v2874_v15 = vsub.f32 %v5823_v20, %v2858_v62  ;;  %v2456_v31 = vadd.f32 %v2455_v5, %v2437_v7  ;;  %v6113_v20 = vmul.f32 %v2867_v36, %v5883_v21  ;;  %v2787_v26 = vpop.f32.mrf.mxu1  ;;  %v6728_v5 = vld [vmem:[#allocation32_spill] sm:$0xff] }
 0x488   : > { %v2855_v18 = vmul.f32 2.0, %v2787_v26 }
 0x489   : > { %v2890_v29 = vmul.f32 %v2874_v15, %v6722_v30  ;;  %v2465_v60 = vadd.f32 %v2461_v25, %v2456_v31  ;;  %v2903_v34 = vmax.f32 %v6109_v51, %v6113_v20 }
 0x48a   : > { %v2801_v19 = vpop.f32.mrf.mxu2  ;;  %v2871_v43 = vsub.f32 %v6723_v1, %v2855_v18 }
 0x48b   : > { %v2896_v22 = vmax.f32 %v2895_v42, %v2890_v29  ;;  %2469 = vst.msk [vmem:[#allocation4 + $0x18] sm:$0xff] %vm1995_vm12, %v2465_v60  ;;  %v2848_v0 = vmul.f32 2.0, %v2801_v19 }
 0x48c   : > { %v6122_v50 = vmul.f32 %v2871_v43, %v5887_v32  ;;  %v6731_v43 = vld [vmem:[#allocation26_spill] sm:$0xff] }
 0x48d   : > { %v2897_v38 = vrot.slane %v2896_v22, 4  ;;  %v2864_v12 = vsub.f32 %v6725_v56, %v2848_v0 }
 0x48e   : > { %v2820_v44 = vpop.f32.mrf.mxu3  ;;  %v2904_v6 = vmax.f32 %v2903_v34, %v6122_v50 }
 0x48f   : > { %v2898_v10 = vmax.f32 %v2896_v22, %v2897_v38  ;;  %v2849_v59 = vmul.f32 2.0, %v2820_v44  ;;  %v6126_v37 = vmul.f32 %v2864_v12, %v5878_v61  ;;  %v2789_v52 = vpop.f32.mrf.mxu1  ;;  %v6730_v38 = vld [vmem:[#allocation30_spill] sm:$0xff] }
 0x490   : > { %v2859_v48 = vmul.f32 2.0, %v2789_v52 }
 0x491   : > { %v2899_v45 = vrot.slane %v2898_v10, 2  ;;  %v2865_v49 = vsub.f32 %v6726_v2, %v2849_v59 }
 0x492   : > { %v2803_v9 = vpop.f32.mrf.mxu2  ;;  %v2875_v25 = vsub.f32 %v6728_v5, %v2859_v48 }
 0x493   : > { %v2852_v46 = vmul.f32 2.0, %v2803_v9  ;;  %v2900_v41 = vmax.f32 %v2898_v10, %v2899_v45  ;;  %v6141_v15 = vmul.f32 %v2865_v49, %v5878_v61  ;;  %v6732_v49 = vld [vmem:[#allocation19_spill] sm:$0xff] }
 0x495   : > { %v2868_v13 = vsub.f32 %v2836_v33, %v2852_v46  ;;  %v2901_v27 = vrot.slane %v2900_v41, 1 }
 0x496   : > { %v2822_v39 = vpop.f32.mrf.mxu3 }
 0x497   : > { %v6130_v11 = vmul.f32 %v2868_v13, %v5883_v21  ;;  %v2902_v53 = vmax.f32 %v2900_v41, %v2901_v27  ;;  %v2853_v17 = vmul.f32 2.0, %v2822_v39 }
 0x499   : > { %v2912_v40 = vmax.f32 %v6126_v37, %v6130_v11  ;;  %v2930_v42 = vsub.f32 %v6089_v54, %v2902_v53  ;;  %v2934_v55 = vsub.f32 %v6092_v14, %v2902_v53  ;;  %v2938_v7 = vsub.f32 %v6099_v8, %v2902_v53 }
 0x49a   : > { %v2869_v4 = vsub.f32 %v2837_v35, %v2853_v17  ;;  %v2942_v62 = vsub.f32 %v2890_v29, %v2902_v53  ;;  %v2806_v23 = vpop.f32.mrf.mxu2  ;;  %v2891_v54 = vmul.f32 %v2875_v25, %v6722_v30 }
 0x49b   : > { %v2946_v47 = vmul.f32 1.442695, %v2930_v42  ;;  %v2954_v16 = vmul.f32 1.442695, %v2934_v55  ;;  %v2962_v31 = vmul.f32 1.442695, %v2938_v7 }
 0x49c   : > { %v6144_v58 = vmul.f32 %v2869_v4, %v5883_v21  ;;  %v2856_v28 = vmul.f32 2.0, %v2806_v23  ;;  %v2970_v14 = vmul.f32 1.442695, %v2942_v62  ;;  %v2905_v57 = vmax.f32 %v2904_v6, %v2891_v54 }
 0x49d   : > { %4308 = vpow2.f32 %v2946_v47 }
 0x49e   : > { %v2921_v8 = vmax.f32 %v6141_v15, %v6144_v58  ;;  %4310 = vpow2.f32 %v2954_v16  ;;  %v2872_v29 = vsub.f32 %v6729_v24, %v2856_v28  ;;  %v2825_v61 = vpop.f32.mrf.mxu3  ;;  %v2906_v60 = vrot.slane %v2905_v57, 4 }
 0x49f   : > { %4312 = vpow2.f32 %v2962_v31  ;;  %v2857_v21 = vmul.f32 2.0, %v2825_v61 }
 0x4a0   : > { %v6151_v36 = vmul.f32 %v2872_v29, %v5887_v32  ;;  %4314 = vpow2.f32 %v2970_v14  ;;  %v2907_v19 = vmax.f32 %v2905_v57, %v2906_v60 }
 0x4a1   : > { %v2873_v34 = vsub.f32 %v6730_v38, %v2857_v21 }
 0x4a2   : > { %v2913_v22 = vmax.f32 %v2912_v40, %v6151_v36  ;;  %v2808_v0 = vpop.f32.mrf.mxu2  ;;  %v2908_v18 = vrot.slane %v2907_v19, 2 }
 0x4a3   : > { %v6155_v44 = vpop.eup %4308  ;;  %v2860_v26 = vmul.f32 2.0, %v2808_v0  ;;  %v6160_v45 = vmul.f32 %v2873_v34, %v5887_v32 }
 0x4a4   : > { %v6157_v10 = vpop.eup %4310  ;;  %v2909_v33 = vmax.f32 %v2907_v19, %v2908_v18 }
 0x4a5   : > { %v2978_v1 = vadd.f32 %v6157_v10, %v6155_v44  ;;  %v2876_v9 = vsub.f32 %v6731_v43, %v2860_v26  ;;  %v6165_v3 = vpop.eup %4312  ;;  %v2922_v56 = vmax.f32 %v2921_v8, %v6160_v45 }
 0x4a6   : > { %v2827_v46 = vpop.f32.mrf.mxu3  ;;  %v6170_v41 = vpop.eup %4314  ;;  %v2910_v13 = vrot.slane %v2909_v33, 1 }
 0x4a7   : > { %v2979_v12 = vadd.f32 %v6165_v3, %v2978_v1  ;;  %v2892_v59 = vmul.f32 %v2876_v9, %v6722_v30  ;;  %v2861_v32 = vmul.f32 2.0, %v2827_v46 }
 0x4a8   : > { %v2911_v2 = vmax.f32 %v2909_v33, %v2910_v13 }
 0x4a9   : > { %v2980_v27 = vadd.f32 %v6170_v41, %v2979_v12  ;;  %v2914_v6 = vmax.f32 %v2913_v22, %v2892_v59  ;;  %v2877_v39 = vsub.f32 %v6732_v49, %v2861_v32 }
 0x4aa   : > { %v2931_v63 = vsub.f32 %v6109_v51, %v2911_v2  ;;  %v2935_v35 = vsub.f32 %v6113_v20, %v2911_v2  ;;  %v2939_v17 = vsub.f32 %v6122_v50, %v2911_v2  ;;  %v2943_v48 = vsub.f32 %v2891_v54, %v2911_v2 }
 0x4ab   : > { %v2981_v53 = vrot.slane %v2980_v27, 4  ;;  %v2915_v52 = vrot.slane %v2914_v6, 4  ;;  %v6178_v55 = vmul.f32 %v2877_v39, %v6722_v30 }
 0x4ac   : > { %v2948_v7 = vmul.f32 1.442695, %v2931_v63  ;;  %v2956_v4 = vmul.f32 1.442695, %v2935_v35  ;;  %v2964_v5 = vmul.f32 1.442695, %v2939_v17 }
 0x4ad   : > { %v2982_v40 = vadd.f32 %v2981_v53, %v2980_v27  ;;  %v2916_v42 = vmax.f32 %v2914_v6, %v2915_v52  ;;  %v2923_v23 = vmax.f32 %v2922_v56, %v6178_v55  ;;  %v2972_v47 = vmul.f32 1.442695, %v2943_v48 }
 0x4ae   : > { %4316 = vpow2.f32 %v2948_v7 }
 0x4af   : > { %v2983_v62 = vrot.slane %v2982_v40, 2  ;;  %v2917_v25 = vrot.slane %v2916_v42, 2  ;;  %4318 = vpow2.f32 %v2956_v4  ;;  %v2924_v16 = vrot.slane %v2923_v23, 4 }
 0x4b0   : > { %4320 = vpow2.f32 %v2964_v5 }
 0x4b1   : > { %v2984_v51 = vadd.f32 %v2983_v62, %v2982_v40  ;;  %v2918_v20 = vmax.f32 %v2916_v42, %v2917_v25  ;;  %v2925_v54 = vmax.f32 %v2923_v23, %v2924_v16  ;;  %4322 = vpow2.f32 %v2972_v47 }
 0x4b3   : > { %v2985_v50 = vrot.slane %v2984_v51, 1  ;;  %v2919_v31 = vrot.slane %v2918_v20, 1  ;;  %v2926_v14 = vrot.slane %v2925_v54, 2 }
 0x4b4   : > { %v6183_v8 = vpop.eup %4316 }
 0x4b5   : > { %v6181_v28 = vadd.f32 %v2985_v50, %v2984_v51  ;;  %v2920_v30 = vmax.f32 %v2918_v20, %v2919_v31  ;;  %v6185_v57 = vpop.eup %4318  ;;  %v2927_v19 = vmax.f32 %v2925_v54, %v2926_v14 }
 0x4b6   : > { %v2987_v60 = vadd.f32 %v6185_v57, %v6183_v8  ;;  %v6193_v22 = vpop.eup %4320 }
 0x4b7   : > { %4324 = vrcp.f32 %v6181_v28  ;;  %v2932_v24 = vsub.f32 %v6126_v37, %v2920_v30  ;;  %v2936_v29 = vsub.f32 %v6130_v11, %v2920_v30  ;;  %v2940_v61 = vsub.f32 %v6151_v36, %v2920_v30  ;;  %v6196_v1 = vpop.eup %4322 }
 0x4b8   : > { %v2944_v21 = vsub.f32 %v2892_v59, %v2920_v30  ;;  %v2988_v0 = vadd.f32 %v6193_v22, %v2987_v60  ;;  %v2928_v18 = vrot.slane %v2927_v19, 1  ;;  %v3023_v39 = vand.u32 2147483647, %v6181_v28 }
 0x4b9   : > { %v2950_v38 = vmul.f32 1.442695, %v2932_v24  ;;  %v2958_v34 = vmul.f32 1.442695, %v2936_v29  ;;  %v2966_v26 = vmul.f32 1.442695, %v2940_v61  ;;  %vm3019_vm0 = vweird.f32 %v6181_v28 }
 0x4ba   : > { %v2989_v37 = vadd.f32 %v6196_v1, %v2988_v0  ;;  %v2974_v11 = vmul.f32 1.442695, %v2944_v21  ;;  %v2929_v36 = vmax.f32 %v2927_v19, %v2928_v18  ;;  %vm3024_vm2 = vcmp.eq.f32.partialorder %v3023_v39, 8.507059e+37 }
 0x4bb   : > { %4326 = vpow2.f32 %v2950_v38 }
 0x4bc   : > { %4328 = vpow2.f32 %v2958_v34  ;;  %v2990_v9 = vrot.slane %v2989_v37, 4  ;;  %v2933_v33 = vsub.f32 %v6141_v15, %v2929_v36  ;;  %v2937_v56 = vsub.f32 %v6144_v58, %v2929_v36 }
 0x4bd   : > { %v4325_v43 = vpop.eup %4324  ;;  %4330 = vpow2.f32 %v2966_v26  ;;  %v2941_v12 = vsub.f32 %v6160_v45, %v2929_v36  ;;  %v2945_v59 = vsub.f32 %v6178_v55, %v2929_v36  ;;  %v3025_v58 = vand.u32 2147483648, %v6181_v28 }
 0x4be   : > { %v3015_v46 = vmul.f32 %v4325_v43, %v6181_v28  ;;  %v2991_v13 = vadd.f32 %v2990_v9, %v2989_v37  ;;  %4332 = vpow2.f32 %v2974_v11  ;;  %v2952_v32 = vmul.f32 1.442695, %v2933_v33 }
 0x4bf   : > { %v2960_v27 = vmul.f32 1.442695, %v2937_v56  ;;  %v2968_v2 = vmul.f32 1.442695, %v2941_v12  ;;  %vm3020_vm15 = vweird.f32 %v4325_v43  ;;  %v2976_v52 = vmul.f32 1.442695, %v2945_v59 }
 0x4c0   : > { %v3016_v49 = vsub.f32 1.0, %v3015_v46  ;;  %v2992_v15 = vrot.slane %v2991_v13, 2  ;;  %4334 = vpow2.f32 %v2952_v32  ;;  %vm3021_vm1 = vmor %vm3019_vm0, %vm3020_vm15  ;;  %v3026_v7 = vor.u32 1.1754944e-38, %v3025_v58 }
 0x4c1   : > { %v6204_v6 = vpop.eup %4326  ;;  %4336 = vpow2.f32 %v2960_v27 }
 0x4c2   : > { %v6207_v53 = vpop.eup %4328  ;;  %v3017_v63 = vmul.f32 %v4325_v43, %v3016_v49  ;;  %v2993_v17 = vadd.f32 %v2992_v15, %v2991_v13  ;;  %4338 = vpow2.f32 %v2968_v2 }
 0x4c3   : > { %v2996_v45 = vadd.f32 %v6207_v53, %v6204_v6  ;;  %v6212_v35 = vpop.eup %4330  ;;  %4340 = vpow2.f32 %v2976_v52 }
 0x4c4   : > { %v3018_v40 = vadd.f32 %v4325_v43, %v3017_v63  ;;  %v6216_v42 = vpop.eup %4332  ;;  %v2994_v55 = vrot.slane %v2993_v17, 1 }
 0x4c5   : > { %v2997_v48 = vadd.f32 %v6212_v35, %v2996_v45 }
 0x4c6   : > { %v3022_v62 = vsel %vm3021_vm1, %v4325_v43, %v3018_v40  ;;  %v6219_v5 = vpop.eup %4334  ;;  %v2995_v25 = vadd.f32 %v2994_v55, %v2993_v17 }
 0x4c7   : > { %v2998_v4 = vadd.f32 %v6216_v42, %v2997_v48  ;;  %v3027_v23 = vsel %vm3024_vm2, %v3026_v7, %v3022_v62  ;;  %v6221_v47 = vpop.eup %4336 }
 0x4c8   : > { %v3028_v20 = vmul.f32 %v6155_v44, %v3027_v23  ;;  %v3074_v16 = vmul.f32 %v6157_v10, %v3027_v23  ;;  %4342 = vrcp.f32 %v2995_v25  ;;  %v3005_v50 = vadd.f32 %v6221_v47, %v6219_v5  ;;  %v6227_v31 = vpop.eup %4338 }
 0x4c9   : > { %v2999_v51 = vrot.slane %v2998_v4, 4  ;;  %v6230_v14 = vpop.eup %4340  ;;  %v3078_v19 = vmul.f32 %v6165_v3, %v3027_v23  ;;  %v3082_v34 = vmul.f32 %v6170_v41, %v3027_v23  ;;  %v3040_v37 = vand.u32 2147483648, %v2995_v25 }
 0x4ca   : > { %v3086_v28 = vpack.c.bf16 %v3074_v16, %v3028_v20  ;;  %v3006_v30 = vadd.f32 %v6227_v31, %v3005_v50  ;;  %v3038_v43 = vand.u32 2147483647, %v2995_v25  ;;  %vm3034_vm4 = vweird.f32 %v2995_v25 }
 0x4cb   : > { %v3000_v54 = vadd.f32 %v2999_v51, %v2998_v4  ;;  %v3090_v11 = vpack.c.bf16 %v3082_v34, %v3078_v19  ;;  %v3041_v12 = vor.u32 1.1754944e-38, %v3040_v37 }
 0x4cc   : > { %3102 = vmatmul.bf16.vlgmr.msrb.gmra.mxu0 %v3086_v28  ;;  %v3007_v29 = vadd.f32 %v6230_v14, %v3006_v30  ;;  %vm3039_vm6 = vcmp.eq.f32.partialorder %v3038_v43, 8.507059e+37 }
 0x4cd   : > { %v3001_v24 = vrot.slane %v3000_v54, 2 }
 0x4ce   : > { %v4343_v44 = vpop.eup %4342  ;;  %v3008_v60 = vrot.slane %v3007_v29, 4 }
 0x4cf   : > { %v3002_v61 = vadd.f32 %v3001_v24, %v3000_v54  ;;  %v3030_v21 = vmul.f32 %v4343_v44, %v2995_v25  ;;  %vm3035_vm3 = vweird.f32 %v4343_v44 }
 0x4d0   : > { %v3009_v38 = vadd.f32 %v3008_v60, %v3007_v29  ;;  %vm3036_vm5 = vmor %vm3034_vm4, %vm3035_vm3 }
 0x4d1   : > { %v3003_v10 = vrot.slane %v3002_v61, 1  ;;  %v3031_v26 = vsub.f32 1.0, %v3030_v21 }
 0x4d2   : > { %v3010_v18 = vrot.slane %v3009_v38, 2 }
 0x4d3   : > { %v3004_v0 = vadd.f32 %v3003_v10, %v3002_v61  ;;  %v3032_v36 = vmul.f32 %v4343_v44, %v3031_v26 }
 0x4d4   : > { %v3011_v9 = vadd.f32 %v3010_v18, %v3009_v38 }
 0x4d5   : > { %4344 = vrcp.f32 %v3004_v0  ;;  %v3033_v33 = vadd.f32 %v4343_v44, %v3032_v36  ;;  %v3055_v17 = vand.u32 2147483648, %v3004_v0  ;;  %vm3049_vm8 = vweird.f32 %v3004_v0 }
 0x4d6   : > { %v3012_v56 = vrot.slane %v3011_v9, 1 }
 0x4d7   : > { %v3037_v59 = vsel %vm3036_vm5, %v4343_v44, %v3033_v33 }
 0x4d8   : > { %v3013_v3 = vadd.f32 %v3012_v56, %v3011_v9  ;;  %v3042_v46 = vsel %vm3039_vm6, %v3041_v12, %v3037_v59  ;;  %v3187_v59 = vld [vmem:[#allocation5 + $0x38] sm:$0xff] }
 0x4d9   : > { %v3043_v13 = vmul.f32 %v6183_v8, %v3042_v46  ;;  %v3075_v32 = vmul.f32 %v6185_v57, %v3042_v46  ;;  %v3079_v27 = vmul.f32 %v6193_v22, %v3042_v46  ;;  %v3083_v2 = vmul.f32 %v6196_v1, %v3042_v46 }
 0x4da   : > { %4346 = vrcp.f32 %v3013_v3  ;;  %v3053_v8 = vand.u32 2147483647, %v3004_v0  ;;  %v3056_v22 = vor.u32 1.1754944e-38, %v3055_v17  ;;  %v3070_v25 = vand.u32 2147483648, %v3013_v3 }
 0x4db   : > { %v4345_v41 = vpop.eup %4344  ;;  %v3087_v39 = vpack.c.bf16 %v3075_v32, %v3043_v13  ;;  %v3198_v15 = vadd.f32 %v3079_v27, %v3078_v19  ;;  %v3193_v45 = vadd.f32 %v3075_v32, %v3074_v16  ;;  %v3188_v52 = vadd.f32 %v3043_v13, %v3028_v20 }
 0x4dc   : > { %v3045_v49 = vmul.f32 %v4345_v41, %v3004_v0  ;;  %3107 = vmatmul.bf16.gmra.mxu0 %v3090_v11  ;;  %v3091_v63 = vpack.c.bf16 %v3083_v2, %v3079_v27  ;;  %v3203_v48 = vadd.f32 %v3083_v2, %v3082_v34  ;;  %vm3050_vm7 = vweird.f32 %v4345_v41  ;;  %v3184_v11 = vld [vmem:[#allocation5 + $0x20] sm:$0xff] }
 0x4dd   : > { %3121 = vmatmul.bf16.vlgmr.msrb.gmra.mxu1 %v3087_v39  ;;  %vm3051_vm9 = vmor %vm3049_vm8, %vm3050_vm7  ;;  %vm3054_vm10 = vcmp.eq.f32.partialorder %v3053_v8, 8.507059e+37  ;;  %v3068_v54 = vand.u32 2147483647, %v3013_v3  ;;  %vm3064_vm13 = vweird.f32 %v3013_v3  ;;  %v3171_v39 = vld [vmem:[#allocation4 + $0x20] sm:$0xff]  ;;  %v3172_v8 = vld [vmem:[#allocation4 + $0x28] sm:$0xff] }
 0x4de   : > { %v3046_v58 = vsub.f32 1.0, %v3045_v49 }
 0x4df   : > { %vm3069_vm0 = vcmp.eq.f32.partialorder %v3068_v54, 8.507059e+37 }
 0x4e0   : > { %v3047_v40 = vmul.f32 %v4345_v41, %v3046_v58  ;;  %v4347_v57 = vpop.eup %4346 }
 0x4e1   : > { %v3060_v1 = vmul.f32 %v4347_v57, %v3013_v3  ;;  %vm3065_vm11 = vweird.f32 %v4347_v57 }
 0x4e2   : > { %v3048_v55 = vadd.f32 %v4345_v41, %v3047_v40  ;;  %vm3066_vm15 = vmor %vm3064_vm13, %vm3065_vm11 }
 0x4e3   : > { %v3061_v62 = vsub.f32 1.0, %v3060_v1 }
 0x4e4   : > { %v3052_v7 = vsel %vm3051_vm9, %v4345_v41, %v3048_v55 }
 0x4e5   : > { %v3057_v4 = vsel %vm3054_vm10, %v3056_v22, %v3052_v7  ;;  %v3062_v50 = vmul.f32 %v4347_v57, %v3061_v62 }
 0x4e6   : > { %v3058_v23 = vmul.f32 %v6204_v6, %v3057_v4  ;;  %v3076_v51 = vmul.f32 %v6207_v53, %v3057_v4  ;;  %v3080_v20 = vmul.f32 %v6212_v35, %v3057_v4  ;;  %v3084_v16 = vmul.f32 %v6216_v42, %v3057_v4 }
 0x4e7   : > { %v3063_v61 = vadd.f32 %v4347_v57, %v3062_v50  ;;  %v3071_v6 = vor.u32 1.1754944e-38, %v3070_v25 }
 0x4e8   : > { %v3088_v28 = vpack.c.bf16 %v3076_v51, %v3058_v23  ;;  %v3199_v30 = vadd.f32 %v3198_v15, %v3080_v20  ;;  %v3194_v24 = vadd.f32 %v3193_v45, %v3076_v51  ;;  %v3189_v29 = vadd.f32 %v3188_v52, %v3058_v23  ;;  %v3173_v23 = vld [vmem:[#allocation4 + $0x30] sm:$0xff] }
 0x4e9   : > { %v3204_v44 = vadd.f32 %v3203_v48, %v3084_v16  ;;  %v3092_v60 = vpack.c.bf16 %v3084_v16, %v3080_v20  ;;  %v3067_v10 = vsel %vm3066_vm15, %v4347_v57, %v3063_v61 }
 0x4ea   : > { %3140 = vmatmul.bf16.vlgmr.msrb.gmra.mxu2 %v3088_v28  ;;  %v3072_v53 = vsel %vm3069_vm0, %v3071_v6, %v3067_v10 }
 0x4eb   : > { %v3073_v35 = vmul.f32 %v6219_v5, %v3072_v53  ;;  %v3077_v42 = vmul.f32 %v6221_v47, %v3072_v53  ;;  %v3081_v21 = vmul.f32 %v6227_v31, %v3072_v53  ;;  %v3085_v19 = vmul.f32 %v6230_v14, %v3072_v53  ;;  %v3186_v5 = vld [vmem:[#allocation5 + $0x30] sm:$0xff]  ;;  %v3185_v47 = vld [vmem:[#allocation5 + $0x28] sm:$0xff] }
 0x4ed   : > { %v3089_v38 = vpack.c.bf16 %v3077_v42, %v3073_v35  ;;  %v3200_v34 = vadd.f32 %v3199_v30, %v3081_v21  ;;  %v3195_v0 = vadd.f32 %v3194_v24, %v3077_v42  ;;  %v3190_v26 = vadd.f32 %v3189_v29, %v3073_v35  ;;  %3126 = vmatmul.bf16.gmra.mxu1 %v3091_v63  ;;  %v3174_v30 = vld [vmem:[#allocation4 + $0x38] sm:$0xff] }
 0x4ee   : > { %v3205_v18 = vadd.f32 %v3204_v44, %v3085_v19  ;;  %v3093_v37 = vpack.c.bf16 %v3085_v19, %v3081_v21 }
 0x4ef   : > { %3159 = vmatmul.bf16.vlgmr.msrb.gmra.mxu3 %v3089_v38  ;;  %3201 = vadd.xlane.f32.xlu2 %v3200_v34 }
 0x4f0   : > { %3196 = vadd.xlane.f32.xlu1 %v3195_v0  ;;  %3191 = vadd.xlane.f32.xlu0 %v3190_v26 }
 0x4f8   : > { %3206 = vadd.xlane.f32.xlu0 %v3205_v18 }
 0x4fa   : > { %3145 = vmatmul.bf16.gmra.mxu2 %v3092_v60 }
 0x4ff   : > { %3164 = vmatmul.bf16.gmra.mxu3 %v3093_v37 }
 0x549   : > { %v3103_v31 = vpop.f32.mrf.mxu0 }
 0x551   : > { %v3105_v32 = vpop.f32.mrf.mxu0 }
 0x559   : > { %v3108_v63 = vpop.f32.mrf.mxu0 }
 0x55a   : > { %v3122_v33 = vpop.f32.mrf.mxu1 }
 0x55b   : > { %v3123_v13 = vadd.f32 %v3122_v33, %v3103_v31 }
 0x561   : > { %v3110_v4 = vpop.f32.mrf.mxu0 }
 0x562   : > { %v3202_v36 = vpop.xlane.xlu2 %3201  ;;  %v3124_v27 = vpop.f32.mrf.mxu1 }
 0x563   : > { %v3210_v14 = vadd.f32 %v3202_v36, %v3186_v5  ;;  %v3197_v43 = vpop.xlane.xlu1 %3196  ;;  %v3192_v9 = vpop.xlane.xlu0 %3191  ;;  %v3125_v45 = vadd.f32 %v3124_v27, %v3105_v32 }
 0x564   : > { %v3209_v56 = vadd.f32 %v3197_v43, %v3185_v47  ;;  %v3208_v12 = vadd.f32 %v3192_v9, %v3184_v11 }
 0x565   : > { %3214 = vst.msk [vmem:[#allocation5 + $0x30] sm:$0xff] %vm2498_vm14, %v3210_v14 }
 0x566   : > { %3213 = vst.msk [vmem:[#allocation5 + $0x28] sm:$0xff] %vm2498_vm14, %v3209_v56 }
 0x567   : > { %3212 = vst.msk [vmem:[#allocation5 + $0x20] sm:$0xff] %vm2498_vm14, %v3208_v12 }
 0x56a   : > { %v3127_v48 = vpop.f32.mrf.mxu1 }
 0x56b   : > { %v3207_v3 = vpop.xlane.xlu0 %3206  ;;  %v3128_v22 = vadd.f32 %v3127_v48, %v3108_v63 }
 0x56c   : > { %v3211_v41 = vadd.f32 %v3207_v3, %v3187_v59 }
 0x56d   : > { %v3141_v46 = vpop.f32.mrf.mxu2 }
 0x56e   : > { %3215 = vst.msk [vmem:[#allocation5 + $0x38] sm:$0xff] %vm2498_vm14, %v3211_v41  ;;  %v3142_v2 = vadd.f32 %v3141_v46, %v3123_v13 }
 0x572   : > { %v3160_v49 = vpop.f32.mrf.mxu3  ;;  %v3129_v62 = vpop.f32.mrf.mxu1 }
 0x573   : > { %v3161_v15 = vadd.f32 %v3160_v49, %v3142_v2  ;;  %v3130_v16 = vadd.f32 %v3129_v62, %v3110_v4 }
 0x575   : > { %v3143_v58 = vpop.f32.mrf.mxu2  ;;  %v3175_v52 = vadd.f32 %v3171_v39, %v3161_v15 }
 0x576   : > { %v3144_v17 = vadd.f32 %v3143_v58, %v3125_v45 }
 0x577   : > { %3179 = vst.msk [vmem:[#allocation4 + $0x20] sm:$0xff] %vm1995_vm12, %v3175_v52 }
 0x57a   : > { %v3162_v40 = vpop.f32.mrf.mxu3 }
 0x57b   : > { %v3163_v57 = vadd.f32 %v3162_v40, %v3144_v17 }
 0x57d   : > { %v3146_v55 = vpop.f32.mrf.mxu2  ;;  %v3176_v1 = vadd.f32 %v3172_v8, %v3163_v57 }
 0x57e   : > { %v3147_v7 = vadd.f32 %v3146_v55, %v3128_v22 }
 0x57f   : > { %3180 = vst.msk [vmem:[#allocation4 + $0x28] sm:$0xff] %vm1995_vm12, %v3176_v1 }
 0x582   : > { %v3165_v25 = vpop.f32.mrf.mxu3 }
 0x583   : > { %v3166_v51 = vadd.f32 %v3165_v25, %v3147_v7 }
 0x585   : > { %v3148_v20 = vpop.f32.mrf.mxu2  ;;  %v3177_v50 = vadd.f32 %v3173_v23, %v3166_v51 }
 0x586   : > { %v3149_v54 = vadd.f32 %v3148_v20, %v3130_v16 }
 0x587   : > { %3181 = vst.msk [vmem:[#allocation4 + $0x30] sm:$0xff] %vm1995_vm12, %v3177_v50 }
 0x58a   : > { %v3167_v28 = vpop.f32.mrf.mxu3 }
 0x58b   : > { %v3168_v24 = vadd.f32 %v3167_v28, %v3149_v54  ;;  %3219 = sbr.rel (%p4144_p1) target bundleno = 1941 (0x795), region = 115 }
 0x58d   : > { %v3178_v29 = vadd.f32 %v3174_v30, %v3168_v24 }
 0x58f   : > { %3182 = vst.msk [vmem:[#allocation4 + $0x38] sm:$0xff] %vm1995_vm12, %v3178_v29 }
 0x590   : > { %v3232_v61 = vld [vmem:[#allocation5 + $0x20] sm:$0xff]  ;;  %v4482_v60 = vmov 0   ;;  %v3230_v6 = vld [vmem:[#allocation5 + $0x10] sm:$0xff]  ;;  %v3233_v10 = vld [vmem:[#allocation5 + $0x28] sm:$0xff]  ;;  %vm3594_vm13 = vcmask 1041409   ;;  %vm3852_vm15 = vcmask 58368  }
 0x591   : > { %v3228_v44 = vld [vmem:[#allocation5] sm:$0xff]  ;;  %4349 = vset.pattern.permute.xlu1 %v4482_v60  ;;  %4348 = vset.pattern.permute.xlu0 %v4482_v60  ;;  %v3229_v53 = vld [vmem:[#allocation5 + $0x8] sm:$0xff]  ;;  %v3234_v35 = vld [vmem:[#allocation5 + $0x30] sm:$0xff]  ;;  %vm3815_vm0 = vcmask 15360  }
 0x592   : > { %3262 = vperm.xlu1 %4349, %v3232_v61   ;;  %3242 = vperm.xlu0 %4348, %v3228_v44   ;;  %v3235_v42 = vld [vmem:[#allocation5 + $0x38] sm:$0xff]  ;;  %v3436_v19 = vld [vmem:[%s6611_s8] sm:$0xff]  ;;  %v3438_v38 = vld [vmem:[%s6611_s8 + $0x10] sm:$0xff] }
 0x593   : > { %4350 = vset.pattern.permute.xlu2 %v4482_v60  ;;  %v3231_v21 = vld [vmem:[#allocation5 + $0x18] sm:$0xff]  ;;  %v3437_v34 = vld [vmem:[%s6611_s8 + $0x8] sm:$0xff]  ;;  %v3468_v26 = vld [vmem:[%s6612_s9] sm:$0xff] }
 0x594   : > { %3252 = vperm.xlu2 %4350, %v3230_v6   ;;  %v3469_v0 = vld [vmem:[%s6612_s9 + $0x8] sm:$0xff]  ;;  %v3236_v18 = vld [vmem:[%s6733_s29] sm:$0xff]  ;;  %v3238_v2 = vld [vmem:[%s6733_s29 + $0x10] sm:$0xff] }
 0x595   : > { %v3224_v5 = vld [vmem:[#allocation4 + $0x20] sm:$0xff]  ;;  %v3237_v12 = vld [vmem:[%s6733_s29 + $0x8] sm:$0xff]  ;;  %v3226_v48 = vld [vmem:[#allocation4 + $0x30] sm:$0xff] }
 0x596   : > { %v3220_v11 = vld [vmem:[#allocation4] sm:$0xff]  ;;  %v3225_v3 = vld [vmem:[#allocation4 + $0x28] sm:$0xff]  ;;  %v3222_v40 = vld [vmem:[#allocation4 + $0x10] sm:$0xff] }
 0x597   : > { %v3221_v41 = vld [vmem:[#allocation4 + $0x8] sm:$0xff]  ;;  %v3239_v22 = vld [vmem:[%s6733_s29 + $0x18] sm:$0xff] }
 0x598   : > { %v3227_v23 = vld [vmem:[#allocation4 + $0x38] sm:$0xff] }
 0x599   : > { %v3223_v16 = vld [vmem:[#allocation4 + $0x18] sm:$0xff] }
 0x59a   : > { %3267 = vperm.xlu1 %4349, %v3233_v10   ;;  %3247 = vperm.xlu0 %4348, %v3229_v53  }
 0x59c   : > { %3272 = vperm.xlu2 %4350, %v3234_v35  }
 0x5a2   : > { %3277 = vperm.xlu1 %4349, %v3235_v42   ;;  %3257 = vperm.xlu0 %4348, %v3231_v21  }
 0x5a4   : > { %3442 = vperm.xlu2 %4350, %v3436_v19  }
 0x5aa   : > { %3452 = vperm.xlu1 %4349, %v3438_v38   ;;  %3447 = vperm.xlu0 %4348, %v3437_v34   ;;  %v3439_v38 = vld [vmem:[%s6611_s8 + $0x18] sm:$0xff]  ;;  %v3470_v34 = vld [vmem:[%s6612_s9 + $0x10] sm:$0xff] }
 0x5ac   : > { %3479 = vperm.xlu2 %4350, %v3469_v0   ;;  %v3471_v0 = vld [vmem:[%s6612_s9 + $0x18] sm:$0xff] }
 0x5b2   : > { %3474 = vperm.xlu0 %4348, %v3468_v26   ;;  %v3544_v26 = vld [vmem:[%s6734_s25] sm:$0xff] }
 0x5ee   : > { %v3253_v14 = vpop.permute.xlu2 %3252 }
 0x5ef   : > { %v3282_v17 = vmul.f32 %v3253_v14, %v3238_v2 }
 0x5f1   : > { %v6303_v55 = vsub.f32 %v3222_v40, %v3282_v17 }
 0x5f3   : > { %v3302_v20 = vsel %vm1995_vm12, %v6303_v55, 0.0  ;;  %v3326_v54 = vmul.f32 %v6303_v55, %v6303_v55 }
 0x5f5   : > { %v3338_v24 = vsel %vm1995_vm12, %v3326_v54, 0.0 }
 0x5f6   : > { %v3273_v15 = vpop.permute.xlu2 %3272 }
 0x5f7   : > { %v3286_v58 = vmul.f32 %v3273_v15, %v3238_v2 }
 0x5f9   : > { %v6299_v8 = vsub.f32 %v3226_v48, %v3286_v58 }
 0x5fb   : > { %v3314_v62 = vsel %vm1995_vm12, %v6299_v8, 0.0  ;;  %v3330_v42 = vmul.f32 %v6299_v8, %v6299_v8 }
 0x5fd   : > { %v3350_v19 = vsel %vm1995_vm12, %v3330_v42, 0.0 }
 0x5fe   : > { %v6372_v14 = vpop.permute.xlu2 %3442 }
 0x604   : > { %v3263_v37 = vpop.permute.xlu1 %3262  ;;  %v3243_v47 = vpop.permute.xlu0 %3242 }
 0x605   : > { %v3284_v31 = vmul.f32 %v3263_v37, %v3236_v18  ;;  %v3280_v36 = vmul.f32 %v3243_v47, %v3236_v18  ;;  %v3545_v18 = vld [vmem:[%s6734_s25 + $0x8] sm:$0xff]  ;;  %v3546_v37 = vld [vmem:[%s6734_s25 + $0x10] sm:$0xff]  ;;  %v3548_v47 = vld [vmem:[%s6734_s25 + $0x20] sm:$0xff] }
 0x607   : > { %v6274_v43 = vsub.f32 %v3224_v5, %v3284_v31  ;;  %v6276_v9 = vsub.f32 %v3220_v11, %v3280_v36  ;;  %v3547_v5 = vld [vmem:[%s6734_s25 + $0x18] sm:$0xff]  ;;  %v3549_v11 = vld [vmem:[%s6734_s25 + $0x28] sm:$0xff]  ;;  %v3550_v31 = vld [vmem:[%s6734_s25 + $0x30] sm:$0xff] }
 0x608   : > { %v3551_v36 = vld [vmem:[%s6734_s25 + $0x38] sm:$0xff] }
 0x609   : > { %v3308_v33 = vsel %vm1995_vm12, %v6274_v43, 0.0  ;;  %v3296_v56 = vsel %vm1995_vm12, %v6276_v9, 0.0  ;;  %v3324_v27 = vmul.f32 %v6276_v9, %v6276_v9  ;;  %v3328_v61 = vmul.f32 %v6274_v43, %v6274_v43 }
 0x60a   : > { %3309 = vadd.xlane.f32.xlu1 %v3308_v33  ;;  %3297 = vadd.xlane.f32.xlu2 %v3296_v56  ;;  %v6376_v56 = vpop.permute.xlu2 %3479 }
 0x60b   : > { %v3332_v52 = vsel %vm1995_vm12, %v3324_v27, 0.0  ;;  %v3344_v6 = vsel %vm1995_vm12, %v3328_v61, 0.0 }
 0x60c   : > { %v3268_v59 = vpop.permute.xlu1 %3267  ;;  %v3248_v46 = vpop.permute.xlu0 %3247 }
 0x60d   : > { %v3285_v13 = vmul.f32 %v3268_v59, %v3237_v12  ;;  %v3281_v32 = vmul.f32 %v3248_v46, %v3237_v12 }
 0x60f   : > { %v6290_v49 = vsub.f32 %v3225_v3, %v3285_v13  ;;  %v6292_v39 = vsub.f32 %v3221_v41, %v3281_v32 }
 0x611   : > { %v3299_v45 = vsel %vm1995_vm12, %v6292_v39, 0.0  ;;  %v3311_v63 = vsel %vm1995_vm12, %v6290_v49, 0.0  ;;  %v3329_v57 = vmul.f32 %v6290_v49, %v6290_v49  ;;  %v3325_v60 = vmul.f32 %v6292_v39, %v6292_v39 }
 0x612   : > { %3300 = vadd.xlane.f32.xlu0 %v3299_v45  ;;  %3333 = vadd.xlane.f32.xlu1 %v3332_v52 }
 0x613   : > { %3312 = vadd.xlane.f32.xlu2 %v3311_v63  ;;  %v3347_v25 = vsel %vm1995_vm12, %v3329_v57, 0.0  ;;  %v3335_v53 = vsel %vm1995_vm12, %v3325_v60, 0.0 }
 0x614   : > { %v3278_v1 = vpop.permute.xlu1 %3277  ;;  %v3258_v7 = vpop.permute.xlu0 %3257 }
 0x615   : > { %v3287_v4 = vmul.f32 %v3278_v1, %v3239_v22  ;;  %v3283_v51 = vmul.f32 %v3258_v7, %v3239_v22 }
 0x617   : > { %v6313_v50 = vsub.f32 %v3227_v23, %v3287_v4  ;;  %v6317_v28 = vsub.f32 %v3223_v16, %v3283_v51 }
 0x619   : > { %v3317_v30 = vsel %vm1995_vm12, %v6313_v50, 0.0  ;;  %v3305_v29 = vsel %vm1995_vm12, %v6317_v28, 0.0  ;;  %v3331_v44 = vmul.f32 %v6313_v50, %v6313_v50  ;;  %v3327_v35 = vmul.f32 %v6317_v28, %v6317_v28 }
 0x61a   : > { %3315 = vadd.xlane.f32.xlu0 %v3314_v62  ;;  %3348 = vadd.xlane.f32.xlu1 %v3347_v25 }
 0x61b   : > { %3303 = vadd.xlane.f32.xlu2 %v3302_v20  ;;  %v3353_v10 = vsel %vm1995_vm12, %v3331_v44, 0.0  ;;  %v3341_v21 = vsel %vm1995_vm12, %v3327_v35, 0.0 }
 0x61c   : > { %v6374_v33 = vpop.permute.xlu0 %3447  ;;  %v6378_v12 = vpop.permute.xlu1 %3452 }
 0x622   : > { %3318 = vadd.xlane.f32.xlu0 %v3317_v30  ;;  %3339 = vadd.xlane.f32.xlu1 %v3338_v24 }
 0x623   : > { %3306 = vadd.xlane.f32.xlu2 %v3305_v29 }
 0x624   : > { %v6380_v59 = vpop.permute.xlu0 %3474 }
 0x62a   : > { %3345 = vadd.xlane.f32.xlu0 %v3344_v6  ;;  %3354 = vadd.xlane.f32.xlu1 %v3353_v10 }
 0x62b   : > { %3336 = vadd.xlane.f32.xlu2 %v3335_v53 }
 0x632   : > { %3342 = vadd.xlane.f32.xlu0 %v3341_v21 }
 0x633   : > { %3351 = vadd.xlane.f32.xlu2 %v3350_v19 }
 0x643   : > { %3457 = vperm.xlu1 %4349, %v3439_v38  }
 0x646   : > { %3484 = vperm.xlu0 %4348, %v3470_v34  }
 0x64b   : > { %3489 = vperm.xlu2 %4350, %v3471_v0   ;;  %3554 = vperm.xlu1 %4349, %v3544_v26  }
 0x64e   : > { %3559 = vperm.xlu0 %4348, %v3545_v18  }
 0x653   : > { %3564 = vperm.xlu2 %4350, %v3546_v37   ;;  %3569 = vperm.xlu1 %4349, %v3547_v5  }
 0x656   : > { %3574 = vperm.xlu0 %4348, %v3548_v47  }
 0x65b   : > { %3579 = vperm.xlu2 %4350, %v3549_v11   ;;  %3584 = vperm.xlu1 %4349, %v3550_v31  }
 0x65e   : > { %3589 = vperm.xlu0 %4348, %v3551_v36  }
 0x67d   : > { %v3310_v3 = vpop.xlane.xlu1 %3309  ;;  %v3298_v46 = vpop.xlane.xlu2 %3297 }
 0x67e   : > { %v3320_v52 = vadd.f32 %v3310_v3, %v3298_v46 }
 0x680   : > { %v6382_v48 = vmul.f32 0.0078125, %v3320_v52 }
 0x682   : > { %v3368_v25 = vmul.f32 %v6382_v48, %v6382_v48 }
 0x685   : > { %v3301_v41 = vpop.xlane.xlu0 %3300  ;;  %v3334_v32 = vpop.xlane.xlu1 %3333 }
 0x686   : > { %v3313_v13 = vpop.xlane.xlu2 %3312 }
 0x687   : > { %v3321_v63 = vadd.f32 %v3313_v13, %v3301_v41  ;;  %v3376_v13 = vsub.f32 %v6276_v9, %v6382_v48 }
 0x689   : > { %v6384_v40 = vmul.f32 0.0078125, %v3321_v63 }
 0x68b   : > { %v3369_v51 = vmul.f32 %v6384_v40, %v6384_v40  ;;  %v3377_v52 = vsub.f32 %v6292_v39, %v6384_v40 }
 0x68d   : > { %v3316_v27 = vpop.xlane.xlu0 %3315  ;;  %v3349_v15 = vpop.xlane.xlu1 %3348 }
 0x68e   : > { %v3304_v2 = vpop.xlane.xlu2 %3303 }
 0x68f   : > { %v3322_v23 = vadd.f32 %v3316_v27, %v3304_v2  ;;  %v3824_v27 = vld [vmem:[%s6735_s16] sm:$0xff] }
 0x690   : > { %4162 = vmatpush.xpose.msk.msra.mxu1 %vm1995_vm12, %v3824_v27 }
 0x691   : > { %v6392_v29 = vmul.f32 0.0078125, %v3322_v23 }
 0x693   : > { %v3370_v21 = vmul.f32 %v6392_v29, %v6392_v29 }
 0x695   : > { %v3319_v58 = vpop.xlane.xlu0 %3318  ;;  %v3340_v17 = vpop.xlane.xlu1 %3339 }
 0x696   : > { %v3307_v45 = vpop.xlane.xlu2 %3306 }
 0x697   : > { %v3323_v4 = vadd.f32 %v3319_v58, %v3307_v45 }
 0x699   : > { %v6390_v30 = vmul.f32 0.0078125, %v3323_v4 }
 0x69b   : > { %v3371_v42 = vmul.f32 %v6390_v30, %v6390_v30  ;;  %v3379_v39 = vsub.f32 %v6317_v28, %v6390_v30 }
 0x69d   : > { %v3346_v57 = vpop.xlane.xlu0 %3345  ;;  %v3355_v61 = vpop.xlane.xlu1 %3354 }
 0x69e   : > { %v3356_v22 = vadd.f32 %v3346_v57, %v3334_v32  ;;  %v3337_v1 = vpop.xlane.xlu2 %3336  ;;  %v3378_v57 = vsub.f32 %v6303_v55, %v6392_v29 }
 0x69f   : > { %v3357_v7 = vadd.f32 %v3349_v15, %v3337_v1  ;;  %v3380_v15 = vsub.f32 %v6274_v43, %v6382_v48 }
 0x6a0   : > { %v3364_v62 = vmul.f32 0.0078125, %v3356_v22 }
 0x6a1   : > { %v3365_v20 = vmul.f32 0.0078125, %v3357_v7 }
 0x6a2   : > { %v3372_v16 = vsub.f32 %v3364_v62, %v3368_v25 }
 0x6a3   : > { %v3373_v54 = vsub.f32 %v3365_v20, %v3369_v51 }
 0x6a4   : > { %v3384_v24 = vadd.f32 1e-05, %v3372_v16 }
 0x6a5   : > { %v3385_v44 = vadd.f32 1e-05, %v3373_v54  ;;  %v3343_v60 = vpop.xlane.xlu0 %3342 }
 0x6a6   : > { %4352 = vrsqrt.f32 %v3384_v24  ;;  %v3359_v6 = vadd.f32 %v3355_v61, %v3343_v60  ;;  %v3352_v10 = vpop.xlane.xlu2 %3351  ;;  %vm3394_vm2 = vweird.f32 %v3384_v24 }
 0x6a7   : > { %4354 = vrsqrt.f32 %v3385_v44  ;;  %v3358_v53 = vadd.f32 %v3352_v10, %v3340_v17  ;;  %vm3404_vm4 = vweird.f32 %v3385_v44  ;;  %v3381_v17 = vsub.f32 %v6290_v49, %v6384_v40 }
 0x6a8   : > { %v3367_v35 = vmul.f32 0.0078125, %v3359_v6  ;;  %v3383_v49 = vsub.f32 %v6313_v50, %v6390_v30 }
 0x6a9   : > { %v3366_v19 = vmul.f32 0.0078125, %v3358_v53 }
 0x6aa   : > { %v3375_v38 = vsub.f32 %v3367_v35, %v3371_v42 }
 0x6ab   : > { %v3374_v34 = vsub.f32 %v3366_v19, %v3370_v21 }
 0x6ac   : > { %v4353_v0 = vpop.eup %4352  ;;  %v3387_v26 = vadd.f32 1e-05, %v3375_v38 }
 0x6ad   : > { %v4355_v18 = vpop.eup %4354  ;;  %v3389_v37 = vmul.f32 %v4353_v0, %v3384_v24  ;;  %v6398_v5 = vadd.f32 1e-05, %v3374_v34  ;;  %vm3395_vm14 = vweird.f32 %v4353_v0 }
 0x6ae   : > { %v3399_v47 = vmul.f32 %v4355_v18, %v3385_v44  ;;  %4356 = vrsqrt.f32 %v3387_v26  ;;  %vm3405_vm1 = vweird.f32 %v4355_v18  ;;  %vm3396_vm3 = vmor %vm3394_vm2, %vm3395_vm14  ;;  %vm3424_vm8 = vweird.f32 %v3387_v26 }
 0x6af   : > { %v3390_v11 = vmul.f32 %v4353_v0, %v3389_v37  ;;  %4358 = vrsqrt.f32 %v6398_v5  ;;  %vm3406_vm5 = vmor %vm3404_vm4, %vm3405_vm1  ;;  %vm3414_vm9 = vweird.f32 %v6398_v5 }
 0x6b0   : > { %v3400_v31 = vmul.f32 %v4355_v18, %v3399_v47 }
 0x6b1   : > { %v3391_v36 = vmul.f32 0.5, %v3390_v11 }
 0x6b2   : > { %v3401_v3 = vmul.f32 0.5, %v3400_v31 }
 0x6b3   : > { %v3392_v46 = vsub.f32 1.5, %v3391_v36 }
 0x6b4   : > { %v4357_v41 = vpop.eup %4356  ;;  %v3402_v32 = vsub.f32 1.5, %v3401_v3 }
 0x6b5   : > { %v4359_v2 = vpop.eup %4358  ;;  %v3393_v58 = vmul.f32 %v4353_v0, %v3392_v46  ;;  %v3419_v45 = vmul.f32 %v4357_v41, %v3387_v26  ;;  %vm3425_vm6 = vweird.f32 %v4357_v41  ;;  %v3458_v38 = vpop.permute.xlu1 %3457 }
 0x6b6   : > { %v3403_v9 = vmul.f32 %v4355_v18, %v3402_v32  ;;  %v3409_v63 = vmul.f32 %v4359_v2, %v6398_v5  ;;  %vm3415_vm7 = vweird.f32 %v4359_v2  ;;  %vm3426_vm10 = vmor %vm3424_vm8, %vm3425_vm6 }
 0x6b7   : > { %v3397_v43 = vsel %vm3396_vm3, %v4353_v0, %v3393_v58  ;;  %v3420_v48 = vmul.f32 %v4357_v41, %v3419_v45  ;;  %vm3416_vm11 = vmor %vm3414_vm9, %vm3415_vm7 }
 0x6b8   : > { %v3407_v22 = vsel %vm3406_vm5, %v4355_v18, %v3403_v9  ;;  %v3410_v1 = vmul.f32 %v4359_v2, %v3409_v63  ;;  %v3428_v7 = vmul.f32 %v3397_v43, %v3376_v13  ;;  %v3432_v4 = vmul.f32 %v3397_v43, %v3380_v15  ;;  %v3485_v46 = vpop.permute.xlu0 %3484 }
 0x6b9   : > { %v3421_v62 = vmul.f32 0.5, %v3420_v48  ;;  %v3429_v25 = vmul.f32 %v3407_v22, %v3377_v52  ;;  %v3433_v23 = vmul.f32 %v3407_v22, %v3381_v17 }
 0x6ba   : > { %v3411_v40 = vmul.f32 0.5, %v3410_v1  ;;  %v3460_v55 = vmul.f32 %v6372_v14, %v3428_v7  ;;  %v3464_v51 = vmul.f32 %v6372_v14, %v3432_v4 }
 0x6bb   : > { %v3422_v20 = vsub.f32 1.5, %v3421_v62  ;;  %v3461_v16 = vmul.f32 %v6374_v33, %v3429_v25  ;;  %v3465_v54 = vmul.f32 %v6374_v33, %v3433_v23  ;;  %v3382_v33 = vsub.f32 %v6299_v8, %v6392_v29  ;;  %v3490_v29 = vpop.permute.xlu2 %3489 }
 0x6bc   : > { %v3412_v24 = vsub.f32 1.5, %v3411_v40  ;;  %v3492_v28 = vadd.f32 %v6380_v59, %v3460_v55  ;;  %v3496_v61 = vadd.f32 %v6380_v59, %v3464_v51 }
 0x6bd   : > { %v3423_v44 = vmul.f32 %v4357_v41, %v3422_v20  ;;  %v3493_v50 = vadd.f32 %v6376_v56, %v3461_v16  ;;  %v3497_v30 = vadd.f32 %v6376_v56, %v3465_v54  ;;  %v3536_v16 = vld [vmem:[%s6736_s28] sm:$0xff]  ;;  %v3539_v54 = vld [vmem:[%s6736_s28 + $0x18] sm:$0xff] }
 0x6be   : > { %v3413_v14 = vmul.f32 %v4359_v2, %v3412_v24  ;;  %v3500_v60 = vmax.f32 %v3492_v28, 0.0  ;;  %v3504_v6 = vmax.f32 %v3496_v61, 0.0  ;;  %v3542_v24 = vld [vmem:[%s6736_s28 + $0x30] sm:$0xff]  ;;  %v3537_v28 = vld [vmem:[%s6736_s28 + $0x8] sm:$0xff]  ;;  %v3540_v61 = vld [vmem:[%s6736_s28 + $0x20] sm:$0xff] }
 0x6bf   : > { %v3427_v10 = vsel %vm3426_vm10, %v4357_v41, %v3423_v44  ;;  %v3501_v53 = vmax.f32 %v3493_v50, 0.0  ;;  %v3505_v35 = vmax.f32 %v3497_v30, 0.0  ;;  %v3543_v44 = vld [vmem:[%s6736_s28 + $0x38] sm:$0xff]  ;;  %v3538_v50 = vld [vmem:[%s6736_s28 + $0x10] sm:$0xff]  ;;  %v3541_v30 = vld [vmem:[%s6736_s28 + $0x28] sm:$0xff] }
 0x6c0   : > { %v3431_v59 = vmul.f32 %v3427_v10, %v3379_v39  ;;  %v3435_v42 = vmul.f32 %v3427_v10, %v3383_v49  ;;  %v3417_v21 = vsel %vm3416_vm11, %v4359_v2, %v3413_v14  ;;  %v3508_v19 = vsel %vm1995_vm12, %v3500_v60, 0.0  ;;  %v3555_v14 = vpop.permute.xlu1 %3554  ;;  %v3560_v60 = vpop.permute.xlu0 %3559 }
 0x6c1   : > { %v3430_v56 = vmul.f32 %v3417_v21, %v3378_v57  ;;  %v3434_v34 = vmul.f32 %v3417_v21, %v3382_v33  ;;  %v3509_v0 = vsel %vm1995_vm12, %v3501_v53, 0.0  ;;  %v3521_v26 = vsel %vm1995_vm12, %v3504_v6, 0.0  ;;  %v4351_v6 = vld [vmem:[%s6737_s4] ss:$0 sm:$0xff] }
 0x6c2   : > { %v3463_v18 = vmul.f32 %v3458_v38, %v3431_v59  ;;  %v3467_v37 = vmul.f32 %v3458_v38, %v3435_v42  ;;  %v3510_v5 = vadd.f32 %v3509_v0, %v3508_v19  ;;  %v3522_v8 = vsel %vm1995_vm12, %v3505_v35, 0.0 }
 0x6c3   : > { %v3462_v47 = vmul.f32 %v6378_v12, %v3430_v56  ;;  %v3466_v11 = vmul.f32 %v6378_v12, %v3434_v34  ;;  %v3523_v31 = vadd.f32 %v3522_v8, %v3521_v26 }
 0x6c4   : > { %v3495_v36 = vadd.f32 %v3490_v29, %v3463_v18  ;;  %v3499_v3 = vadd.f32 %v3490_v29, %v3467_v37 }
 0x6c5   : > { %v3494_v41 = vadd.f32 %v3485_v46, %v3462_v47  ;;  %v3498_v13 = vadd.f32 %v3485_v46, %v3466_v11  ;;  %v3565_v47 = vpop.permute.xlu2 %3564 }
 0x6c6   : > { %v3503_v32 = vmax.f32 %v3495_v36, 0.0  ;;  %v3507_v27 = vmax.f32 %v3499_v3, 0.0 }
 0x6c7   : > { %v3502_v2 = vmax.f32 %v3494_v41, 0.0  ;;  %v3506_v15 = vmax.f32 %v3498_v13, 0.0 }
 0x6c8   : > { %v3513_v63 = vsel %vm1995_vm12, %v3503_v32, 0.0  ;;  %v3526_v12 = vsel %vm1995_vm12, %v3507_v27, 0.0  ;;  %v3570_v33 = vpop.permute.xlu1 %3569  ;;  %v3575_v21 = vpop.permute.xlu0 %3574 }
 0x6c9   : > { %v3511_v58 = vsel %vm1995_vm12, %v3502_v2, 0.0  ;;  %v3524_v45 = vsel %vm1995_vm12, %v3506_v15, 0.0 }
 0x6ca   : > { %v3512_v52 = vadd.f32 %v3511_v58, %v3510_v5  ;;  %v3525_v9 = vadd.f32 %v3524_v45, %v3523_v31 }
 0x6cc   : > { %v3514_v17 = vadd.f32 %v3513_v63, %v3512_v52  ;;  %v3527_v57 = vadd.f32 %v3526_v12, %v3525_v9 }
 0x6ce   : > { %v3515_v43 = vrot.slane %v3514_v17, 4  ;;  %v3528_v48 = vrot.slane %v3527_v57, 4 }
 0x6d0   : > { %v3516_v22 = vadd.f32 %v3515_v43, %v3514_v17  ;;  %v3529_v1 = vadd.f32 %v3528_v48, %v3527_v57  ;;  %v3585_v38 = vpop.permute.xlu1 %3584  ;;  %v3590_v36 = vpop.permute.xlu0 %3589 }
 0x6d1   : > { %v3580_v57 = vpop.permute.xlu2 %3579 }
 0x6d2   : > { %v3517_v7 = vrot.slane %v3516_v22, 2  ;;  %v3530_v4 = vrot.slane %v3529_v1, 2 }
 0x6d4   : > { %v3518_v39 = vadd.f32 %v3517_v7, %v3516_v22  ;;  %v3531_v62 = vadd.f32 %v3530_v4, %v3529_v1 }
 0x6d6   : > { %v3519_v25 = vrot.slane %v3518_v39, 1  ;;  %v3532_v23 = vrot.slane %v3531_v62, 1 }
 0x6d8   : > { %v3520_v49 = vadd.f32 %v3519_v25, %v3518_v39  ;;  %v3533_v40 = vadd.f32 %v3532_v23, %v3531_v62 }
 0x6da   : > { %v3534_v55 = vmul.f32 0.03125, %v3520_v49  ;;  %v3535_v51 = vmul.f32 0.03125, %v3533_v40 }
 0x6dc   : > { %v3595_v20 = vsel %vm3594_vm13, %v3535_v51, %v3534_v55 }
 0x6dd   : > { %4145 = vmatpush.xpose.msk.msra.mxu0 %vm1995_vm12, %v3595_v20  ;;  %4181 = vmatpush.xpose.msk.msra.mxu2 %vm1995_vm12, %v3595_v20 }
 0x6de   : > { %4182 = vmatpush.xpose.msk.msra.mxu3 %vm1995_vm12, %v3595_v20  ;;  %4163 = vmatmul.msk.f32.vlgmr.msra.gmra.mxu1 %vm1995_vm12, %v3595_v20 }
 0x6e0   : > { %4146 = vmatmul.msk.f32.vlgmr.msra.gmra.mxu0 %vm1995_vm12, %v3536_v16  ;;  %4149 = vmatmul.msk.f32.vlgmr.msra.gmra.mxu2 %vm1995_vm12, %v3539_v54 }
 0x6e1   : > { %4152 = vmatmul.msk.f32.vlgmr.msra.gmra.mxu3 %vm1995_vm12, %v3542_v24 }
 0x6e8   : > { %4147 = vmatmul.msk.f32.gmra.mxu0 %vm1995_vm12, %v3537_v28  ;;  %4150 = vmatmul.msk.f32.gmra.mxu2 %vm1995_vm12, %v3540_v61 }
 0x6e9   : > { %4153 = vmatmul.msk.f32.gmra.mxu3 %vm1995_vm12, %v3543_v44 }
 0x6f0   : > { %4148 = vmatmul.msk.f32.gmra.mxu0 %vm1995_vm12, %v3538_v50  ;;  %4151 = vmatmul.msk.f32.gmra.mxu2 %vm1995_vm12, %v3541_v30 }
 0x75b   : > { %v3849_v10 = vpop.f32.mrf.mxu1 }
 0x75c   : > { %v3850_v53 = vadd.f32 %v4351_v6, %v3849_v10 }
 0x75d   : > { %v3639_v35 = vpop.f32.mrf.mxu0 }
 0x75e   : > { %3853 = vst.msk [vmem:[#allocation8] sm:$0x3] %vm3852_vm15, %v3850_v53  ;;  %v3640_v59 = vadd.f32 %v3639_v35, %v3555_v14 }
 0x760   : > { %v4154_v42 = vmul.f32 -1.442695, %v3640_v59 }
 0x762   : > { %4360 = vpow2.f32 %v4154_v42 }
 0x763   : > { %v3648_v19 = vpop.f32.mrf.mxu2 }
 0x764   : > { %v3649_v56 = vadd.f32 %v3648_v19, %v3570_v33  ;;  %v3657_v34 = vpop.f32.mrf.mxu3 }
 0x765   : > { %v3658_v0 = vadd.f32 %v3657_v34, %v3585_v38  ;;  %v3642_v26 = vpop.f32.mrf.mxu0 }
 0x766   : > { %v4157_v18 = vmul.f32 -1.442695, %v3649_v56  ;;  %v3643_v37 = vadd.f32 %v3642_v26, %v3560_v60 }
 0x767   : > { %v4160_v5 = vmul.f32 -1.442695, %v3658_v0 }
 0x768   : > { %v4361_v8 = vpop.eup %4360  ;;  %4362 = vpow2.f32 %v4157_v18  ;;  %v4155_v29 = vmul.f32 -1.442695, %v3643_v37 }
 0x769   : > { %v3687_v11 = vadd.f32 1.0, %v4361_v8  ;;  %4364 = vpow2.f32 %v4160_v5 }
 0x76a   : > { %4366 = vpow2.f32 %v4155_v29 }
 0x76b   : > { %4368 = vrcp.f32 %v3687_v11  ;;  %v3651_v31 = vpop.f32.mrf.mxu2  ;;  %v3704_v43 = vand.u32 2147483647, %v3687_v11  ;;  %v3706_v48 = vand.u32 2147483648, %v3687_v11  ;;  %vm3700_vm14 = vweird.f32 %v3687_v11 }
 0x76c   : > { %v3652_v3 = vadd.f32 %v3651_v31, %v3575_v21  ;;  %v3660_v46 = vpop.f32.mrf.mxu3 }
 0x76d   : > { %v3661_v41 = vadd.f32 %v3660_v46, %v3590_v36  ;;  %v3645_v13 = vpop.f32.mrf.mxu0  ;;  %vm6490_vm1 = vcmp.eq.f32.partialorder %v3704_v43, 8.507059e+37  ;;  %v3707_v49 = vor.u32 1.1754944e-38, %v3706_v48 }
 0x76e   : > { %v4363_v32 = vpop.eup %4362  ;;  %v4158_v27 = vmul.f32 -1.442695, %v3652_v3  ;;  %v3646_v2 = vadd.f32 %v3645_v13, %v3565_v47 }
 0x76f   : > { %v4365_v15 = vpop.eup %4364  ;;  %v6481_v58 = vadd.f32 1.0, %v4363_v32  ;;  %v4161_v9 = vmul.f32 -1.442695, %v3661_v41 }
 0x770   : > { %v4367_v45 = vpop.eup %4366  ;;  %v6483_v52 = vadd.f32 1.0, %v4365_v15  ;;  %4370 = vpow2.f32 %v4158_v27  ;;  %v4156_v12 = vmul.f32 -1.442695, %v3646_v2 }
 0x771   : > { %v4369_v63 = vpop.eup %4368  ;;  %4372 = vrcp.f32 %v6481_v58  ;;  %v6487_v7 = vadd.f32 1.0, %v4367_v45  ;;  %vm3745_vm2 = vweird.f32 %v6481_v58  ;;  %v3749_v54 = vand.u32 2147483647, %v6481_v58 }
 0x772   : > { %v3696_v17 = vmul.f32 %v4369_v63, %v3687_v11  ;;  %4374 = vrcp.f32 %v6483_v52  ;;  %vm3701_vm12 = vweird.f32 %v4369_v63  ;;  %v3751_v24 = vand.u32 2147483648, %v6481_v58 }
 0x773   : > { %v3654_v22 = vpop.f32.mrf.mxu2  ;;  %4376 = vpow2.f32 %v4161_v9  ;;  %vm3702_vm3 = vmor %vm3700_vm14, %vm3701_vm12  ;;  %vm3790_vm4 = vweird.f32 %v6483_v52  ;;  %v3794_v30 = vand.u32 2147483647, %v6483_v52  ;;  %v3796_v33 = vand.u32 2147483648, %v6483_v52 }
 0x774   : > { %v3697_v1 = vsub.f32 1.0, %v3696_v17  ;;  %v3655_v4 = vadd.f32 %v3654_v22, %v3580_v57  ;;  %4378 = vpow2.f32 %v4156_v12  ;;  %vm6515_vm6 = vcmp.eq.f32.partialorder %v3749_v54, 8.507059e+37 }
 0x775   : > { %4380 = vrcp.f32 %v6487_v7  ;;  %v3752_v56 = vor.u32 1.1754944e-38, %v3751_v24  ;;  %vm6520_vm8 = vcmp.eq.f32.partialorder %v3794_v30, 8.507059e+37  ;;  %v3797_v18 = vor.u32 1.1754944e-38, %v3796_v33 }
 0x776   : > { %v4371_v39 = vpop.eup %4370  ;;  %v3698_v62 = vmul.f32 %v4369_v63, %v3697_v1  ;;  %v4159_v16 = vmul.f32 -1.442695, %v3655_v4  ;;  %v3719_v8 = vand.u32 2147483647, %v6487_v7  ;;  %v3721_v29 = vand.u32 2147483648, %v6487_v7 }
 0x777   : > { %v4373_v25 = vpop.eup %4372  ;;  %v6494_v40 = vadd.f32 1.0, %v4371_v39  ;;  %vm3715_vm13 = vweird.f32 %v6487_v7 }
 0x778   : > { %v4375_v55 = vpop.eup %4374  ;;  %v3699_v51 = vadd.f32 %v4369_v63, %v3698_v62  ;;  %v3741_v20 = vmul.f32 %v4373_v25, %v6481_v58  ;;  %vm3746_vm5 = vweird.f32 %v4373_v25  ;;  %v3722_v58 = vor.u32 1.1754944e-38, %v3721_v29 }
 0x779   : > { %v3786_v28 = vmul.f32 %v4375_v55, %v6483_v52  ;;  %4382 = vrcp.f32 %v6494_v40  ;;  %v4377_v61 = vpop.eup %4376  ;;  %vm3791_vm7 = vweird.f32 %v4375_v55  ;;  %vm3747_vm9 = vmor %vm3745_vm2, %vm3746_vm5  ;;  %v3764_v32 = vand.u32 2147483647, %v6494_v40 }
 0x77a   : > { %v3703_v44 = vsel %vm3702_vm3, %v4369_v63, %v3699_v51  ;;  %v3742_v50 = vsub.f32 1.0, %v3741_v20  ;;  %v4379_v14 = vpop.eup %4378  ;;  %v6507_v10 = vadd.f32 1.0, %v4377_v61  ;;  %4384 = vpow2.f32 %v4159_v16  ;;  %vm3792_vm10 = vmor %vm3790_vm4, %vm3791_vm7 }
 0x77b   : > { %v3708_v60 = vsel %vm6490_vm1, %v3707_v49, %v3703_v44  ;;  %v3787_v6 = vsub.f32 1.0, %v3786_v28  ;;  %v4381_v53 = vpop.eup %4380  ;;  %v6513_v59 = vadd.f32 1.0, %v4379_v14  ;;  %v3766_v27 = vand.u32 2147483648, %v6494_v40 }
 0x77c   : > { %3816 = vst.msk [vmem:[%s6740_s18] sm:$0xff] %vm3815_vm0, %v3708_v60  ;;  %v3743_v35 = vmul.f32 %v4373_v25, %v3742_v50  ;;  %v3711_v19 = vmul.f32 %v4381_v53, %v6487_v7  ;;  %4386 = vrcp.f32 %v6507_v10  ;;  %vm3716_vm11 = vweird.f32 %v4381_v53 }
 0x77d   : > { %v3788_v21 = vmul.f32 %v4375_v55, %v3787_v6  ;;  %4388 = vrcp.f32 %v6513_v59  ;;  %vm3717_vm15 = vmor %vm3715_vm13, %vm3716_vm11  ;;  %vm3720_vm14 = vcmp.eq.f32.partialorder %v3719_v8, 8.507059e+37  ;;  %vm3760_vm1 = vweird.f32 %v6494_v40 }
 0x77e   : > { %v3744_v38 = vadd.f32 %v4373_v25, %v3743_v35  ;;  %v3712_v37 = vsub.f32 1.0, %v3711_v19  ;;  %vm3765_vm3 = vcmp.eq.f32.partialorder %v3764_v32, 8.507059e+37  ;;  %v3767_v43 = vor.u32 1.1754944e-38, %v3766_v27 }
 0x77f   : > { %v4383_v0 = vpop.eup %4382  ;;  %v3789_v26 = vadd.f32 %v4375_v55, %v3788_v21  ;;  %v3809_v1 = vand.u32 2147483647, %v6507_v10  ;;  %v3811_v7 = vand.u32 2147483648, %v6507_v10  ;;  %v3734_v49 = vand.u32 2147483647, %v6513_v59 }
 0x780   : > { %v3748_v5 = vsel %vm3747_vm9, %v4373_v25, %v3744_v38  ;;  %v3756_v47 = vmul.f32 %v4383_v0, %v6494_v40  ;;  %v3713_v36 = vmul.f32 %v4381_v53, %v3712_v37  ;;  %v4385_v3 = vpop.eup %4384  ;;  %vm3761_vm12 = vweird.f32 %v4383_v0 }
 0x781   : > { %v3753_v11 = vsel %vm6515_vm6, %v3752_v56, %v3748_v5  ;;  %v3793_v31 = vsel %vm3792_vm10, %v4375_v55, %v3789_v26  ;;  %v3692_v2 = vadd.f32 1.0, %v4385_v3  ;;  %vm3762_vm2 = vmor %vm3760_vm1, %vm3761_vm12  ;;  %v3736_v25 = vand.u32 2147483648, %v6513_v59 }
 0x782   : > { %3819 = vst.msk [vmem:[%s6741_s30 + $0x18] sm:$0xff] %vm3815_vm0, %v3753_v11  ;;  %v3798_v46 = vsel %vm6520_vm8, %v3797_v18, %v3793_v31  ;;  %v3757_v41 = vsub.f32 1.0, %v3756_v47  ;;  %v3714_v13 = vadd.f32 %v4381_v53, %v3713_v36  ;;  %v4387_v15 = vpop.eup %4386  ;;  %vm3805_vm6 = vweird.f32 %v6507_v10 }
 0x783   : > { %3822 = vst.msk [vmem:[%s6741_s30 + $0x30] sm:$0xff] %vm3815_vm0, %v3798_v46  ;;  %v4389_v52 = vpop.eup %4388  ;;  %v3801_v63 = vmul.f32 %v4387_v15, %v6507_v10  ;;  %4390 = vrcp.f32 %v3692_v2  ;;  %vm3806_vm4 = vweird.f32 %v4387_v15  ;;  %v3812_v55 = vor.u32 1.1754944e-38, %v3811_v7 }
 0x784   : > { %v3758_v45 = vmul.f32 %v4383_v0, %v3757_v41  ;;  %v3718_v9 = vsel %vm3717_vm15, %v4381_v53, %v3714_v13  ;;  %v3726_v57 = vmul.f32 %v4389_v52, %v6513_v59  ;;  %vm3731_vm5 = vweird.f32 %v4389_v52  ;;  %vm3807_vm7 = vmor %vm3805_vm6, %vm3806_vm4 }
 0x785   : > { %v3723_v12 = vsel %vm3720_vm14, %v3722_v58, %v3718_v9  ;;  %v3802_v48 = vsub.f32 1.0, %v3801_v63  ;;  %vm3730_vm8 = vweird.f32 %v6513_v59  ;;  %vm3810_vm9 = vcmp.eq.f32.partialorder %v3809_v1, 8.507059e+37 }
 0x786   : > { %v3759_v17 = vadd.f32 %v4383_v0, %v3758_v45  ;;  %3817 = vst.msk [vmem:[%s6741_s30 + $0x8] sm:$0xff] %vm3815_vm0, %v3723_v12  ;;  %v3727_v4 = vsub.f32 1.0, %v3726_v57  ;;  %vm3732_vm10 = vmor %vm3730_vm8, %vm3731_vm5  ;;  %v3737_v54 = vor.u32 1.1754944e-38, %v3736_v25  ;;  %vm3735_vm11 = vcmp.eq.f32.partialorder %v3734_v49, 8.507059e+37 }
 0x787   : > { %v3803_v62 = vmul.f32 %v4387_v15, %v3802_v48  ;;  %v3781_v30 = vand.u32 2147483648, %v3692_v2  ;;  %v3779_v60 = vand.u32 2147483647, %v3692_v2  ;;  %vm3775_vm15 = vweird.f32 %v3692_v2 }
 0x788   : > { %v3763_v22 = vsel %vm3762_vm2, %v4383_v0, %v3759_v17  ;;  %v3728_v23 = vmul.f32 %v4389_v52, %v3727_v4 }
 0x789   : > { %v3768_v39 = vsel %vm3765_vm3, %v3767_v43, %v3763_v22  ;;  %v3804_v40 = vadd.f32 %v4387_v15, %v3803_v62  ;;  %v4391_v20 = vpop.eup %4390  ;;  %v3782_v33 = vor.u32 1.1754944e-38, %v3781_v30  ;;  %vm3780_vm14 = vcmp.eq.f32.partialorder %v3779_v60, 8.507059e+37 }
 0x78a   : > { %3820 = vst.msk [vmem:[%s6741_s30 + $0x20] sm:$0xff] %vm3815_vm0, %v3768_v39  ;;  %v3729_v51 = vadd.f32 %v4389_v52, %v3728_v23  ;;  %v3771_v61 = vmul.f32 %v4391_v20, %v3692_v2  ;;  %vm3776_vm13 = vweird.f32 %v4391_v20 }
 0x78b   : > { %v3808_v16 = vsel %vm3807_vm7, %v4387_v15, %v3804_v40  ;;  %vm3777_vm12 = vmor %vm3775_vm15, %vm3776_vm13 }
 0x78c   : > { %v3813_v24 = vsel %vm3810_vm9, %v3812_v55, %v3808_v16  ;;  %v3733_v28 = vsel %vm3732_vm10, %v4389_v52, %v3729_v51  ;;  %v3772_v50 = vsub.f32 1.0, %v3771_v61 }
 0x78d   : > { %3823 = vst.msk [vmem:[%s6741_s30 + $0x38] sm:$0xff] %vm3815_vm0, %v3813_v24  ;;  %v3738_v44 = vsel %vm3735_vm11, %v3737_v54, %v3733_v28 }
 0x78e   : > { %3818 = vst.msk [vmem:[%s6741_s30 + $0x10] sm:$0xff] %vm3815_vm0, %v3738_v44  ;;  %v3773_v14 = vmul.f32 %v4391_v20, %v3772_v50 }
 0x790   : > { %v3774_v6 = vadd.f32 %v4391_v20, %v3773_v14 }
 0x792   : > { %v3778_v10 = vsel %vm3777_vm12, %v4391_v20, %v3774_v6 }
 0x793   : > { %v3783_v53 = vsel %vm3780_vm14, %v3782_v33, %v3778_v10 }
 0x794   : > { %3821 = vst.msk [vmem:[%s6741_s30 + $0x28] sm:$0xff] %vm3815_vm0, %v3783_v53 }
 0x795 PF: > { %s6746_s16 = sadd.s32 4294967295, %s4478_s24   ;;  %s6747_s14 = sld [smem:[#allocation39_spill]] }
 0x796   : > { %p4187_p2 = scmp.eq.s32.totalorder %s6746_s16, 3  ;;  %s4483_s12 = smov [#allocation8]  }
 0x797   : > { %s3863_s4 = sshll.u32 %s4483_s12, 4  ;;  %s3864_s4 = int_to_ptr.vmem [resolvable:$true] %s3863_s4 }
 0x79b   : > { %s3865_s10 = sshll.u32 %s6747_s14, 4  ;;  %s3866_s10 = int_to_ptr.hbm [resolvable:$true] %s3865_s10 }
 0x79c   : > { %4184 = dma.vmem_to_hbm [thread:$0]  (%p4187_p2), %s3864_s4, 32, %s3866_s10, [#allocation9]  }
 0x79d   : > { %4449 = dma.done.wait (%p4187_p2), [#allocation9], 32  }
 0x79e   : > { %4451 = vsyncadd (%p4187_p2), [#allocation9], 4294967264 }
 0x79f PF: > { %s27_s24 = sadd.s32 1, %s4478_s24   ;;  %s6748_s20 = sld [smem:[#allocation11_spill]] }
 0x7a0   : > { %p24_p3 = scmp.ge.s32.totalorder %s27_s24, 6   ;;  %s6749_s18 = smov %s4458_s19 }
 0x7a1   : > { %s6750_s19 = smov %s4618_s13  ;;  %s6751_s21 = smov %s4474_s23 }
 0x7a2   : > { %s6752_s22 = smov %s6755_s26  ;;  %s6753_s23 = smov %s6759_s27 }
 0x7a3   :  { %26 = sbr.rel (!%p24_p3) target bundleno = 12 (0xc), region = 162 }
 0x7a8   :  { %3882 = vsyncpa [#allocation9], 1 }
 0x7a9   :  { %3884 = vsyncpa [#allocation9 + $0x1], 1 }

</bundles_post_ra>
